<compile_context>
chip_gen: v7x
topology: tpu7x:2x2x1
jax: 0.10.0
libtpu: 0.0.40
codegen_flags: <defaults>
</compile_context>

<pallas_src>
import jax
import jax.numpy as jnp
from jax.experimental import pallas as pl
from jax.experimental.pallas import tpu as pltpu


def _round_up(x: int, m: int) -> int:
    return -(-x // m) * m


def _bilinear_matrix(in_size: int, out_size: int) -> jax.Array:
    """Dense (out_size, in_size) f32 interpolation matrix, align_corners=True."""
    if out_size == 1:
        src = jnp.zeros((1,), dtype=jnp.float32)
    else:
        src = jnp.arange(out_size, dtype=jnp.float32) * (
            (in_size - 1) / (out_size - 1)
        )
    i0 = jnp.clip(jnp.floor(src).astype(jnp.int32), 0, in_size - 1)
    i1 = jnp.clip(i0 + 1, 0, in_size - 1)
    frac = src - i0.astype(jnp.float32)
    rows = jnp.arange(out_size)
    w = jnp.zeros((out_size, in_size), dtype=jnp.float32)
    w = w.at[rows, i0].add(1.0 - frac)
    w = w.at[rows, i1].add(frac)
    return w


# ---------------------------------------------------------------------------
# Kernels
# ---------------------------------------------------------------------------
def _bilinear_kron_kernel(m_ref, x_ref, o_ref):
    # m_ref: (H*W, Ho*Wo)  kron(A_h, A_w)^T, grid-invariant, VMEM resident
    # x_ref: (TB, H*W)     TB fused (n, c) images, lane-dense rows
    # o_ref: (TB, Ho*Wo)   lane-dense output rows -> unmasked stores
    o_ref[...] = jnp.dot(
        x_ref[...], m_ref[...], preferred_element_type=jnp.float32
    ).astype(o_ref.dtype)


def _bilinear_separable_kernel(ah_ref, awT_ref, x_ref, o_ref):
    # ah_ref: (Ho, H); awT_ref: (W, Wo); x_ref: (TB, H, W); o_ref: (TB, Ho, Wo)
    tb, h, w = x_ref.shape
    _, h_out, w_out = o_ref.shape
    # W-side interpolation fused across the whole block: one big MXU matmul.
    x2 = x_ref[...].reshape(tb * h, w)
    t = jnp.dot(x2, awT_ref[...], preferred_element_type=jnp.float32)
    t = t.reshape(tb, h, w_out)
    # H-side: contract the H axis of t with the H axis of A_h directly (no
    # broadcast materialisation), then swap the two minor dims (XLU transpose).
    out = jax.lax.dot_general(
        t, ah_ref[...].astype(jnp.float32),
        dimension_numbers=(((1,), (1,)), ((), ())),
        preferred_element_type=jnp.float32,
    )                                              # (TB, Wo, Ho)
    o_ref[...] = jnp.swapaxes(out, 1, 2).astype(o_ref.dtype)


# ---------------------------------------------------------------------------
# Blocking heuristics
# ---------------------------------------------------------------------------
def _vmem_capacity_bytes() -> int:
    try:
        return int(pltpu.get_tpu_info().vmem_capacity_bytes)
    except Exception:
        return 64 << 20  # conservative: v7x per-TensorCore physical VMEM


def _pick_row_block(nc, per_row_bytes, out_row_bytes, resident_bytes, vmem_limit):
    """Number of fused (n, c) rows processed per grid step."""
    budget = max(vmem_limit - resident_bytes - (4 << 20), per_row_bytes)
    tb = max(1, budget // per_row_bytes)
    # Aim for >= 4 grid steps (>= 2 per TensorCore on dual-core v7x; harmless on
    # single-core v5e/v6e) as long as the per-step output block stays >= ~1 MiB;
    # below that, per-step overhead dominates and fewer, larger steps win.
    min_block_rows = max(1, (1 << 20) // max(out_row_bytes, 1))
    target_steps = 4
    while target_steps > 1 and pl.cdiv(nc, target_steps) < min_block_rows:
        target_steps -= 1
    tb = min(tb, pl.cdiv(nc, target_steps), nc)
    # Sublane-dim blocks must be a multiple of 8 unless they span the whole axis.
    if tb < nc:
        tb = min(max(8, (tb // 8) * 8), nc)
    return max(tb, 1)


# ---------------------------------------------------------------------------
# Wrapper
# ---------------------------------------------------------------------------
def bilinear_upsample(x: jax.Array, scale: int = 4, out_dtype=None) -> jax.Array:
    """x: (N, C, H, W) -> (N, C, H*scale, W*scale), align_corners=True.

    out_dtype defaults to x.dtype (PyTorch semantics); pass jnp.bfloat16 to halve
    store traffic when the caller allows (output bytes dominate at scale=4).
    """
    N, C, H, W = x.shape
    H_out, W_out = H * scale, W * scale
    NC, HW, HWo = N * C, H * W, H_out * W_out
    out_dtype = x.dtype if out_dtype is None else jnp.dtype(out_dtype)
    out_itemsize = jnp.dtype(out_dtype).itemsize
    # bf16 inputs keep bf16 operands (halves operand traffic; keeps v7x HBM-bound);
    # f32 inputs keep f32 weights for precision parity with PyTorch.
    compute_dtype = jnp.bfloat16 if x.dtype == jnp.bfloat16 else jnp.float32
    c_itemsize = jnp.dtype(compute_dtype).itemsize

    a_h = _bilinear_matrix(H, H_out)  # (Ho, H)  f32
    a_w = _bilinear_matrix(W, W_out)  # (Wo, W)  f32

    vmem_cap = _vmem_capacity_bytes()
    # ~48 MiB on 64 MiB parts (v7x), ~108 MiB on 128 MiB parts (v5e/v6e).
    vmem_limit = max(min(vmem_cap - (16 << 20), int(vmem_cap * 0.85)), 32 << 20)

    kron_vmem = _round_up(HW, 8) * _round_up(HWo, 128) * c_itemsize
    use_kron = 2 * kron_vmem <= vmem_limit // 3  # double-buffered weights small

    if use_kron:
        # m[ih*W+iw, oh*Wo+ow] = A_h[oh, ih] * A_w[ow, iw]  ==  kron(A_h, A_w)^T
        m = jnp.einsum("oh,pw->hwop", a_h, a_w).reshape(HW, HWo).astype(compute_dtype)
        x_flat = x.reshape(NC, HW).astype(compute_dtype)  # free host reshape

        in_row = _round_up(HW, 128) * c_itemsize
        out_row = _round_up(HWo, 128) * out_itemsize
        f32_row = _round_up(HWo, 128) * 4  # f32 dot result before cast
        per_row = 2 * in_row + 2 * out_row + f32_row
        tb = _pick_row_block(NC, per_row, out_row, 2 * kron_vmem, vmem_limit)
        grid = (pl.cdiv(NC, tb),)

        cost = pl.CostEstimate(
            flops=2 * NC * HW * HWo,
            transcendentals=0,
            bytes_accessed=(
                NC * HW * c_itemsize + NC * HWo * out_itemsize + HW * HWo * c_itemsize
            ),
        )

        out_flat = pl.pallas_call(
            _bilinear_kron_kernel,
            out_shape=jax.ShapeDtypeStruct((NC, HWo), out_dtype),
            grid_spec=pltpu.PrefetchScalarGridSpec(
                num_scalar_prefetch=0,
                grid=grid,
                in_specs=[
                    pl.BlockSpec((HW, HWo), lambda b: (0, 0)),  # grid-invariant
                    pl.BlockSpec((tb, HW), lambda b: (b, 0)),
                ],
                out_specs=pl.BlockSpec((tb, HWo), lambda b: (b, 0)),
            ),
            compiler_params=pltpu.CompilerParams(
                dimension_semantics=("parallel",),
                vmem_limit_bytes=int(vmem_limit),
            ),
            cost_estimate=cost,
        )(m, x_flat)
        return out_flat.reshape(N, C, H_out, W_out)

    # ---- Separable fallback for large images (kron matrix would not fit) -------
    a_h_c = a_h.astype(compute_dtype)       # (Ho, H)
    a_wT_c = a_w.T.astype(compute_dtype)    # (W, Wo)
    x_flat = x.reshape(NC, H, W)

    in_row = _round_up(H, 8) * _round_up(W, 128) * x.dtype.itemsize
    out_row = _round_up(H_out, 8) * _round_up(W_out, 128) * out_itemsize
    f32_rows = (
        _round_up(H, 8) * _round_up(W_out, 128)
        + 2 * _round_up(H_out, 8) * _round_up(W_out, 128)
    ) * 4
    per_row = 2 * in_row + 2 * out_row + f32_rows
    weights_vmem = 2 * (
        _round_up(H_out, 8) * _round_up(H, 128)
        + _round_up(W, 8) * _round_up(W_out, 128)
    ) * c_itemsize
    tb = _pick_row_block(NC, per_row, out_row, weights_vmem, vmem_limit)
    grid = (pl.cdiv(NC, tb),)

    cost = pl.CostEstimate(
        flops=2 * NC * W_out * H * (W + H_out),
        transcendentals=0,
        bytes_accessed=(
            x.size * x.dtype.itemsize
            + NC * HWo * out_itemsize
            + (a_h_c.size + a_wT_c.size) * c_itemsize
        ),
    )

    out_sep = pl.pallas_call(
        _bilinear_separable_kernel,
        out_shape=jax.ShapeDtypeStruct((NC, H_out, W_out), out_dtype),
        grid_spec=pltpu.PrefetchScalarGridSpec(
            num_scalar_prefetch=0,
            grid=grid,
            in_specs=[
                pl.BlockSpec((H_out, H), lambda b: (0, 0)),   # grid-invariant
                pl.BlockSpec((W, W_out), lambda b: (0, 0)),   # grid-invariant
                pl.BlockSpec((tb, H, W), lambda b: (b, 0, 0)),
            ],
            out_specs=pl.BlockSpec((tb, H_out, W_out), lambda b: (b, 0, 0)),
        ),
        compiler_params=pltpu.CompilerParams(
            dimension_semantics=("parallel",),
            vmem_limit_bytes=int(vmem_limit),
        ),
        cost_estimate=cost,
    )(a_h_c, a_wT_c, x_flat)
    return out_sep.reshape(N, C, H_out, W_out)


if __name__ == "__main__":
    key = jax.random.PRNGKey(0)
    N, C, H, W = 2, 4, 16, 16
    scale = 4
    x = jax.random.normal(key, (N, C, H, W), dtype=jnp.float32)

    out = bilinear_upsample(x, scale=scale)
    out = jax.block_until_ready(out)

    assert out.shape == (N, C, H * scale, W * scale), out.shape

    # Sanity: with align_corners=True the output corners equal the input corners.
    assert jnp.allclose(out[..., 0, 0], x[..., 0, 0], atol=1e-4)
    assert jnp.allclose(out[..., -1, -1], x[..., -1, -1], atol=1e-4)

    # Cross-check against a pure-JAX einsum using the same interpolation matrices.
    a_h = _bilinear_matrix(H, H * scale)
    a_w = _bilinear_matrix(W, W * scale)
    ref = jnp.einsum("oh,nchw,pw->ncop", a_h, x, a_w)
    assert jnp.allclose(out, ref, atol=1e-3, rtol=1e-3)

    print("KERNEL_OK")
</pallas_src>

<mosaic_0001>
module attributes {stable_mosaic.version = 11 : i64} {
  func.func @_bilinear_kron_kernel(%arg0: i32, %arg1: memref<256x4096xf32, #tpu.memory_space<vmem>>, %arg2: memref<8x256xf32, #tpu.memory_space<vmem>>, %arg3: memref<8x4096xf32, #tpu.memory_space<vmem>>) attributes {dimension_semantics = [#tpu.dimension_semantics<parallel>], iteration_bounds = array<i64: 1>, scalar_prefetch = 0 : i64, scratch_operands = 0 : i64, tpu.core_type = #tpu.core_type<tc>, window_params = [{pipeline_mode = #tpu.pipeline_mode<synchronous>, transform_indices = @transform_0, window_bounds = array<i64: 256, 4096>}, {transform_indices = @transform_1, window_bounds = array<i64: 8, 256>}, {transform_indices = @transform_2, window_bounds = array<i64: 8, 4096>}]} {
    %c0 = arith.constant 0 : index
    %c0_0 = arith.constant 0 : index
    %0 = vector.load %arg2[%c0, %c0_0] : memref<8x256xf32, #tpu.memory_space<vmem>>, vector<8x256xf32>
    %c0_1 = arith.constant 0 : index
    %c0_2 = arith.constant 0 : index
    %1 = vector.load %arg1[%c0_1, %c0_2] : memref<256x4096xf32, #tpu.memory_space<vmem>>, vector<256x4096xf32>
    %cst = arith.constant dense<0.000000e+00> : vector<8x4096xf32>
    %2 = tpu.matmul %0, %1, %cst {dimension_numbers = #tpu.dot_dimension_numbers<[1], [0], [0], [1], [0, 0, 1, 1], [], []>} : vector<8x256xf32>, vector<256x4096xf32>, vector<8x4096xf32> -> vector<8x4096xf32>
    %c0_3 = arith.constant 0 : index
    %c0_4 = arith.constant 0 : index
    %3 = vector.load %arg3[%c0_3, %c0_4] : memref<8x4096xf32, #tpu.memory_space<vmem>>, vector<8x4096xf32>
    tpu.vector_store %arg3[%c0_3, %c0_4], %2 {strides = array<i32>} : memref<8x4096xf32, #tpu.memory_space<vmem>>, vector<8x4096xf32>,
    return
  }
  func.func @transform_0(%arg0: i32) -> (i32, i32) {
    %c0_i32 = arith.constant 0 : i32
    %c0_i32_0 = arith.constant 0 : i32
    %c0_i32_1 = arith.constant 0 : i32
    return %c0_i32, %c0_i32_0 : i32, i32
  }
  func.func @transform_1(%arg0: i32) -> (i32, i32) {
    %c0_i32 = arith.constant 0 : i32
    %c0_i32_0 = arith.constant 0 : i32
    return %arg0, %c0_i32 : i32, i32
  }
  func.func @transform_2(%arg0: i32) -> (i32, i32) {
    %c0_i32 = arith.constant 0 : i32
    %c0_i32_0 = arith.constant 0 : i32
    return %arg0, %c0_i32 : i32, i32
  }
}

</mosaic_0001>

<bundles_post_ra>
// kernel: tpu_custom_call.1
= control target key start
LH: loop header
LB: loop body
LE: loop exit
PB: predicated region body
PF: predicated region fallthrough
CT: control target
= control target key end

     0   :  { %7 = vsyncpa [#allocation3], 0  ;;  %s3455_s0 = inlined_call_operand.hbm [shape: f32[256,4096], index: 0, kind: input, shape index: {}]   ;;  %s3456_s1 = inlined_call_operand.hbm [shape: f32[8,256], index: 1, kind: input, shape index: {}]   ;;  %s3457_s2 = inlined_call_operand.hbm [shape: f32[8,4096], index: 2, kind: output, shape index: {}]  }
   0x1   :  { %8 = vsyncpa [#allocation6], 0 }
   0x2   :  { %9 = vsyncpa [#allocation4], 0  ;;  %s3355_s9 = smov [#allocation2]   ;;  %s3283_s13 = scalar_lea.hbm %s3455_s0, 131072 }
   0x3   :  { %s15_s10 = sshll.u32 %s3355_s9, 4  ;;  %p3284_p0 = scmp.ne.s32.totalorder %s3455_s0, %s3283_s13  ;;  %s16_s10 = int_to_ptr.vmem [resolvable:$true] %s15_s10 }
   0x4   :  { %p3287_p1 = scmp.lt.u32.totalorder %s3283_s13, %s3455_s0 }
   0x6   :  { %p3289_p2 = pnand %p3287_p1, %p3284_p0 }
   0x8   :  { %3292 = shalt.err (!%p3289_p2)
}
   0x9   :  { %s3293_s18 = scalar_lea.vmem %s16_s10, 131072  ;;  %p3298_p4 = scmp.lt.s32.totalorder %s16_s10, %s16_s10 }
   0xa   :  { %p3294_p3 = scmp.ne.s32.totalorder %s16_s10, %s3293_s18  ;;  %p3299_p5 = scmp.lt.s32.totalorder %s3293_s18, %s3293_s18 }
   0xc   :  { %p3300_p6 = por %p3299_p5, %p3298_p4 }
   0xe   :  { %p3301_p7 = pnand %p3300_p6, %p3294_p3 }
  0x10   :  { %3304 = shalt.err (!%p3301_p7)
}
  0x11   :  { %s3356_s19 = smov 4096   ;;  %s3357_s20 = smov 256  }
  0x12   :  { %21 = dma.hbm_to_vmem [thread:$0]  %s3455_s0, 131072, %s16_s10, [#allocation3], %s3356_s19, %s3356_s19, %s3357_s20  }
  0x13   :  { %s3358_s23 = smov [#allocation5]   ;;  %s3305_s27 = scalar_lea.hbm %s3456_s1, 256 }
  0x14   :  { %s28_s24 = sshll.u32 %s3358_s23, 4  ;;  %p3306_p8 = scmp.ne.s32.totalorder %s3456_s1, %s3305_s27  ;;  %s29_s24 = int_to_ptr.vmem [resolvable:$true] %s28_s24 }
  0x15   :  { %p3309_p9 = scmp.lt.u32.totalorder %s3305_s27, %s3456_s1 }
  0x17   :  { %p3311_p10 = pnand %p3309_p9, %p3306_p8 }
  0x19   :  { %3314 = shalt.err (!%p3311_p10)
}
  0x1a   :  { %s3315_s4 = scalar_lea.vmem %s29_s24, 256  ;;  %p3320_p12 = scmp.lt.s32.totalorder %s29_s24, %s29_s24 }
  0x1b   :  { %p3316_p11 = scmp.ne.s32.totalorder %s29_s24, %s3315_s4  ;;  %p3321_p13 = scmp.lt.s32.totalorder %s3315_s4, %s3315_s4 }
  0x1d   :  { %p3322_p0 = por %p3321_p13, %p3320_p12 }
  0x1f   :  { %p3323_p1 = pnand %p3322_p0, %p3316_p11 }
  0x21   :  { %3326 = shalt.err (!%p3323_p1)
}
  0x22   :  { %31 = dma.hbm_to_vmem [thread:$0]  %s3456_s1, 256, %s29_s24, [#allocation6]  }
  0x23   :  { %3349 = dma.done.wait [#allocation3], 131072  }
  0x24   :  { %3350 = vsyncadd [#allocation3], 4294836224 }
  0x25   :  { %3351 = dma.done.wait [#allocation6], 256  }
  0x26   :  { %3352 = vsyncadd [#allocation6], 4294967040  ;;  %v41_v0 = vld [vmem:[#allocation2 + $0x8] sm:$0xff]  ;;  %v43_v2 = vld [vmem:[#allocation2 + $0x18] sm:$0xff]  ;;  %s3359_s1 = smov [#allocation7]  }
  0x27   :  { %v73_v1 = vld [vmem:[#allocation2 + $0x108] sm:$0xff]  ;;  %v75_v4 = vld [vmem:[#allocation2 + $0x118] sm:$0xff]  ;;  %v40_v5 = vld [vmem:[#allocation2] sm:$0xff]  ;;  %s2238_s6 = sshll.u32 %s3359_s1, 4  ;;  %s2239_s6 = int_to_ptr.vmem [resolvable:$true] %s2238_s6 }
  0x28   :  { %v2248_v3 = vpack.c.bf16 %v73_v1, %v41_v0  ;;  %v72_v6 = vld [vmem:[#allocation2 + $0x100] sm:$0xff]  ;;  %v2312_v7 = vpack.c.bf16 %v75_v4, %v43_v2  ;;  %v42_v9 = vld [vmem:[#allocation2 + $0x10] sm:$0xff]  ;;  %v105_v11 = vld [vmem:[#allocation2 + $0x208] sm:$0xff]  ;;  %s3327_s7 = scalar_lea.vmem %s2239_s6, 4096  ;;  %p3332_p3 = scmp.lt.s32.totalorder %s2239_s6, %s2239_s6 }
  0x29   :  { %v2250_v8 = vpack.c.bf16 %v72_v6, %v40_v5  ;;  %v74_v10 = vld [vmem:[#allocation2 + $0x110] sm:$0xff]  ;;  %v137_v13 = vld [vmem:[#allocation2 + $0x308] sm:$0xff]  ;;  %v107_v14 = vld [vmem:[#allocation2 + $0x218] sm:$0xff]  ;;  %p3328_p2 = scmp.ne.s32.totalorder %s2239_s6, %s3327_s7  ;;  %p3333_p4 = scmp.lt.s32.totalorder %s3327_s7, %s3327_s7 }
  0x2a   :  { %2249 = vmatprep.subr.bf16.mxu0 %v2248_v3  ;;  %v2314_v12 = vpack.c.bf16 %v74_v10, %v42_v9  ;;  %v139_v15 = vld [vmem:[#allocation2 + $0x318] sm:$0xff]  ;;  %2313 = vmatprep.subr.bf16.mxu1 %v2312_v7  ;;  %v2252_v16 = vpack.c.bf16 %v137_v13, %v105_v11  ;;  %v104_v18 = vld [vmem:[#allocation2 + $0x200] sm:$0xff]  ;;  %v106_v20 = vld [vmem:[#allocation2 + $0x210] sm:$0xff] }
  0x2b   :  { %2251 = vmatpush1.bf16.msra.mxu0 %v2250_v8  ;;  %v2316_v17 = vpack.c.bf16 %v139_v15, %v107_v14  ;;  %v136_v19 = vld [vmem:[#allocation2 + $0x300] sm:$0xff]  ;;  %v138_v22 = vld [vmem:[#allocation2 + $0x310] sm:$0xff]  ;;  %v169_v23 = vld [vmem:[#allocation2 + $0x408] sm:$0xff]  ;;  %p3334_p5 = por %p3333_p4, %p3332_p3 }
  0x2c   :  { %2315 = vmatpush1.bf16.msra.mxu1 %v2314_v12  ;;  %v2254_v21 = vpack.c.bf16 %v136_v19, %v104_v18  ;;  %v201_v24 = vld [vmem:[#allocation2 + $0x508] sm:$0xff]  ;;  %2253 = vmatprep.subr.bf16.mxu0 %v2252_v16  ;;  %v2318_v25 = vpack.c.bf16 %v138_v22, %v106_v20  ;;  %v171_v27 = vld [vmem:[#allocation2 + $0x418] sm:$0xff]  ;;  %v168_v29 = vld [vmem:[#allocation2 + $0x400] sm:$0xff] }
  0x2d   :  { %2317 = vmatprep.subr.bf16.mxu1 %v2316_v17  ;;  %v2256_v26 = vpack.c.bf16 %v201_v24, %v169_v23  ;;  %v203_v28 = vld [vmem:[#allocation2 + $0x518] sm:$0xff]  ;;  %v200_v31 = vld [vmem:[#allocation2 + $0x500] sm:$0xff]  ;;  %v170_v32 = vld [vmem:[#allocation2 + $0x410] sm:$0xff]  ;;  %p3335_p6 = pnand %p3334_p5, %p3328_p2 }
  0x2e   :  { %v2320_v30 = vpack.c.bf16 %v203_v28, %v171_v27  ;;  %v202_v33 = vld [vmem:[#allocation2 + $0x510] sm:$0xff]  ;;  %v2258_v34 = vpack.c.bf16 %v200_v31, %v168_v29  ;;  %v233_v35 = vld [vmem:[#allocation2 + $0x608] sm:$0xff]  ;;  %v235_v37 = vld [vmem:[#allocation2 + $0x618] sm:$0xff] }
  0x2f   :  { %2255 = vmatpush1.bf16.msra.mxu0 %v2254_v21  ;;  %v265_v36 = vld [vmem:[#allocation2 + $0x708] sm:$0xff]  ;;  %v2322_v38 = vpack.c.bf16 %v202_v33, %v170_v32  ;;  %v267_v40 = vld [vmem:[#allocation2 + $0x718] sm:$0xff]  ;;  %v232_v41 = vld [vmem:[#allocation2 + $0x600] sm:$0xff] }
  0x30   :  { %2319 = vmatpush1.bf16.msra.mxu1 %v2318_v25  ;;  %2257 = vmatprep.subr.bf16.mxu0 %v2256_v26  ;;  %v2260_v39 = vpack.c.bf16 %v265_v36, %v233_v35  ;;  %v264_v42 = vld [vmem:[#allocation2 + $0x700] sm:$0xff]  ;;  %v2324_v43 = vpack.c.bf16 %v267_v40, %v235_v37  ;;  %v234_v44 = vld [vmem:[#allocation2 + $0x610] sm:$0xff]  ;;  %v297_v46 = vld [vmem:[#allocation2 + $0x808] sm:$0xff] }
  0x31   :  { %2321 = vmatprep.subr.bf16.mxu1 %v2320_v30  ;;  %v266_v45 = vld [vmem:[#allocation2 + $0x710] sm:$0xff]  ;;  %v329_v47 = vld [vmem:[#allocation2 + $0x908] sm:$0xff]  ;;  %v299_v48 = vld [vmem:[#allocation2 + $0x818] sm:$0xff]  ;;  %v2262_v50 = vpack.c.bf16 %v264_v42, %v232_v41 }
  0x32   :  { %v331_v49 = vld [vmem:[#allocation2 + $0x918] sm:$0xff]  ;;  %v2326_v51 = vpack.c.bf16 %v266_v45, %v234_v44  ;;  %v2264_v52 = vpack.c.bf16 %v329_v47, %v297_v46  ;;  %v296_v53 = vld [vmem:[#allocation2 + $0x800] sm:$0xff]  ;;  %v298_v55 = vld [vmem:[#allocation2 + $0x810] sm:$0xff] }
  0x33   :  { %2259 = vmatpush1.bf16.msra.mxu0 %v2258_v34  ;;  %v328_v54 = vld [vmem:[#allocation2 + $0x900] sm:$0xff]  ;;  %v2328_v56 = vpack.c.bf16 %v331_v49, %v299_v48  ;;  %v330_v57 = vld [vmem:[#allocation2 + $0x910] sm:$0xff]  ;;  %v361_v58 = vld [vmem:[#allocation2 + $0xa08] sm:$0xff] }
  0x34   :  { %2323 = vmatpush1.bf16.msra.mxu1 %v2322_v38  ;;  %2261 = vmatprep.subr.bf16.mxu0 %v2260_v39  ;;  %v393_v59 = vld [vmem:[#allocation2 + $0xb08] sm:$0xff]  ;;  %v363_v60 = vld [vmem:[#allocation2 + $0xa18] sm:$0xff]  ;;  %v2266_v62 = vpack.c.bf16 %v328_v54, %v296_v53  ;;  %v2330_v63 = vpack.c.bf16 %v330_v57, %v298_v55  ;;  %v360_v1 = vld [vmem:[#allocation2 + $0xa00] sm:$0xff] }
  0x35   :  { %2325 = vmatprep.subr.bf16.mxu1 %v2324_v43  ;;  %v395_v61 = vld [vmem:[#allocation2 + $0xb18] sm:$0xff]  ;;  %v2268_v0 = vpack.c.bf16 %v393_v59, %v361_v58  ;;  %v392_v2 = vld [vmem:[#allocation2 + $0xb00] sm:$0xff]  ;;  %v362_v3 = vld [vmem:[#allocation2 + $0xa10] sm:$0xff] }
  0x36   :  { %v2332_v4 = vpack.c.bf16 %v395_v61, %v363_v60  ;;  %v394_v5 = vld [vmem:[#allocation2 + $0xb10] sm:$0xff]  ;;  %v425_v6 = vld [vmem:[#allocation2 + $0xc08] sm:$0xff]  ;;  %v427_v8 = vld [vmem:[#allocation2 + $0xc18] sm:$0xff]  ;;  %v2270_v10 = vpack.c.bf16 %v392_v2, %v360_v1 }
  0x37   :  { %2263 = vmatpush1.bf16.msra.mxu0 %v2262_v50  ;;  %v457_v7 = vld [vmem:[#allocation2 + $0xd08] sm:$0xff]  ;;  %v459_v9 = vld [vmem:[#allocation2 + $0xd18] sm:$0xff]  ;;  %v2334_v11 = vpack.c.bf16 %v394_v5, %v362_v3  ;;  %v424_v13 = vld [vmem:[#allocation2 + $0xc00] sm:$0xff] }
  0x38   :  { %2327 = vmatpush1.bf16.msra.mxu1 %v2326_v51  ;;  %2265 = vmatprep.subr.bf16.mxu0 %v2264_v52  ;;  %v2272_v12 = vpack.c.bf16 %v457_v7, %v425_v6  ;;  %v456_v14 = vld [vmem:[#allocation2 + $0xd00] sm:$0xff]  ;;  %v426_v15 = vld [vmem:[#allocation2 + $0xc10] sm:$0xff]  ;;  %v2336_v16 = vpack.c.bf16 %v459_v9, %v427_v8  ;;  %v489_v18 = vld [vmem:[#allocation2 + $0xe08] sm:$0xff] }
  0x39   :  { %2329 = vmatprep.subr.bf16.mxu1 %v2328_v56  ;;  %v458_v17 = vld [vmem:[#allocation2 + $0xd10] sm:$0xff]  ;;  %v521_v19 = vld [vmem:[#allocation2 + $0xf08] sm:$0xff]  ;;  %v491_v20 = vld [vmem:[#allocation2 + $0xe18] sm:$0xff]  ;;  %v2274_v22 = vpack.c.bf16 %v456_v14, %v424_v13 }
  0x3a   :  { %v523_v21 = vld [vmem:[#allocation2 + $0xf18] sm:$0xff]  ;;  %v2338_v23 = vpack.c.bf16 %v458_v17, %v426_v15  ;;  %v2276_v24 = vpack.c.bf16 %v521_v19, %v489_v18  ;;  %v488_v25 = vld [vmem:[#allocation2 + $0xe00] sm:$0xff]  ;;  %v490_v27 = vld [vmem:[#allocation2 + $0xe10] sm:$0xff] }
  0x3b   :  { %2267 = vmatpush1.bf16.msra.mxu0 %v2266_v62  ;;  %v520_v26 = vld [vmem:[#allocation2 + $0xf00] sm:$0xff]  ;;  %v2340_v28 = vpack.c.bf16 %v523_v21, %v491_v20  ;;  %v522_v29 = vld [vmem:[#allocation2 + $0xf10] sm:$0xff]  ;;  %v553_v30 = vld [vmem:[#allocation2 + $0x1008] sm:$0xff] }
  0x3c   :  { %2331 = vmatpush1.bf16.msra.mxu1 %v2330_v63  ;;  %2269 = vmatprep.subr.bf16.mxu0 %v2268_v0  ;;  %v585_v31 = vld [vmem:[#allocation2 + $0x1108] sm:$0xff]  ;;  %v555_v32 = vld [vmem:[#allocation2 + $0x1018] sm:$0xff]  ;;  %v2278_v34 = vpack.c.bf16 %v520_v26, %v488_v25  ;;  %v2342_v35 = vpack.c.bf16 %v522_v29, %v490_v27  ;;  %v552_v37 = vld [vmem:[#allocation2 + $0x1000] sm:$0xff] }
  0x3d   :  { %2333 = vmatprep.subr.bf16.mxu1 %v2332_v4  ;;  %v587_v33 = vld [vmem:[#allocation2 + $0x1118] sm:$0xff]  ;;  %v2280_v36 = vpack.c.bf16 %v585_v31, %v553_v30  ;;  %v584_v38 = vld [vmem:[#allocation2 + $0x1100] sm:$0xff]  ;;  %v554_v39 = vld [vmem:[#allocation2 + $0x1010] sm:$0xff] }
  0x3e   :  { %v2344_v40 = vpack.c.bf16 %v587_v33, %v555_v32  ;;  %v586_v41 = vld [vmem:[#allocation2 + $0x1110] sm:$0xff]  ;;  %v617_v42 = vld [vmem:[#allocation2 + $0x1208] sm:$0xff]  ;;  %v619_v44 = vld [vmem:[#allocation2 + $0x1218] sm:$0xff]  ;;  %v2282_v46 = vpack.c.bf16 %v584_v38, %v552_v37 }
  0x3f   :  { %2271 = vmatpush1.bf16.msra.mxu0 %v2270_v10  ;;  %v649_v43 = vld [vmem:[#allocation2 + $0x1308] sm:$0xff]  ;;  %v651_v45 = vld [vmem:[#allocation2 + $0x1318] sm:$0xff]  ;;  %v2346_v47 = vpack.c.bf16 %v586_v41, %v554_v39  ;;  %v616_v49 = vld [vmem:[#allocation2 + $0x1200] sm:$0xff] }
  0x40   :  { %2335 = vmatpush1.bf16.msra.mxu1 %v2334_v11  ;;  %2273 = vmatprep.subr.bf16.mxu0 %v2272_v12  ;;  %v2284_v48 = vpack.c.bf16 %v649_v43, %v617_v42  ;;  %v648_v50 = vld [vmem:[#allocation2 + $0x1300] sm:$0xff]  ;;  %v618_v51 = vld [vmem:[#allocation2 + $0x1210] sm:$0xff]  ;;  %v2348_v52 = vpack.c.bf16 %v651_v45, %v619_v44  ;;  %v681_v54 = vld [vmem:[#allocation2 + $0x1408] sm:$0xff] }
  0x41   :  { %2337 = vmatprep.subr.bf16.mxu1 %v2336_v16  ;;  %v650_v53 = vld [vmem:[#allocation2 + $0x1310] sm:$0xff]  ;;  %v713_v55 = vld [vmem:[#allocation2 + $0x1508] sm:$0xff]  ;;  %v683_v56 = vld [vmem:[#allocation2 + $0x1418] sm:$0xff]  ;;  %v2286_v58 = vpack.c.bf16 %v648_v50, %v616_v49 }
  0x42   :  { %v715_v57 = vld [vmem:[#allocation2 + $0x1518] sm:$0xff]  ;;  %v2350_v59 = vpack.c.bf16 %v650_v53, %v618_v51  ;;  %v2288_v60 = vpack.c.bf16 %v713_v55, %v681_v54  ;;  %v680_v61 = vld [vmem:[#allocation2 + $0x1400] sm:$0xff]  ;;  %v682_v63 = vld [vmem:[#allocation2 + $0x1410] sm:$0xff] }
  0x43   :  { %2275 = vmatpush1.bf16.msra.mxu0 %v2274_v22  ;;  %v712_v62 = vld [vmem:[#allocation2 + $0x1500] sm:$0xff]  ;;  %v2352_v0 = vpack.c.bf16 %v715_v57, %v683_v56  ;;  %v714_v1 = vld [vmem:[#allocation2 + $0x1510] sm:$0xff]  ;;  %v745_v2 = vld [vmem:[#allocation2 + $0x1608] sm:$0xff] }
  0x44   :  { %2339 = vmatpush1.bf16.msra.mxu1 %v2338_v23  ;;  %2277 = vmatprep.subr.bf16.mxu0 %v2276_v24  ;;  %v777_v3 = vld [vmem:[#allocation2 + $0x1708] sm:$0xff]  ;;  %v747_v4 = vld [vmem:[#allocation2 + $0x1618] sm:$0xff]  ;;  %v2290_v6 = vpack.c.bf16 %v712_v62, %v680_v61  ;;  %v744_v7 = vld [vmem:[#allocation2 + $0x1600] sm:$0xff]  ;;  %v2354_v8 = vpack.c.bf16 %v714_v1, %v682_v63 }
  0x45   :  { %2341 = vmatprep.subr.bf16.mxu1 %v2340_v28  ;;  %v779_v5 = vld [vmem:[#allocation2 + $0x1718] sm:$0xff]  ;;  %v2292_v9 = vpack.c.bf16 %v777_v3, %v745_v2  ;;  %v776_v10 = vld [vmem:[#allocation2 + $0x1700] sm:$0xff]  ;;  %v746_v11 = vld [vmem:[#allocation2 + $0x1610] sm:$0xff] }
  0x46   :  { %v778_v12 = vld [vmem:[#allocation2 + $0x1710] sm:$0xff]  ;;  %v2356_v13 = vpack.c.bf16 %v779_v5, %v747_v4  ;;  %v809_v14 = vld [vmem:[#allocation2 + $0x1808] sm:$0xff]  ;;  %v811_v17 = vld [vmem:[#allocation2 + $0x1818] sm:$0xff]  ;;  %v2294_v19 = vpack.c.bf16 %v776_v10, %v744_v7 }
  0x47   :  { %2279 = vmatpush1.bf16.msra.mxu0 %v2278_v34  ;;  %v841_v15 = vld [vmem:[#allocation2 + $0x1908] sm:$0xff]  ;;  %v843_v18 = vld [vmem:[#allocation2 + $0x1918] sm:$0xff]  ;;  %v2358_v20 = vpack.c.bf16 %v778_v12, %v746_v11  ;;  %v808_v22 = vld [vmem:[#allocation2 + $0x1800] sm:$0xff] }
  0x48   :  { %2343 = vmatpush1.bf16.msra.mxu1 %v2342_v35  ;;  %2281 = vmatprep.subr.bf16.mxu0 %v2280_v36  ;;  %v3399_v16 = vld [vmem:[#allocation5 + $0x8] sm:$0xff]  ;;  %v2296_v21 = vpack.c.bf16 %v841_v15, %v809_v14  ;;  %v840_v23 = vld [vmem:[#allocation2 + $0x1900] sm:$0xff]  ;;  %v810_v24 = vld [vmem:[#allocation2 + $0x1810] sm:$0xff]  ;;  %v2360_v25 = vpack.c.bf16 %v843_v18, %v811_v17 }
  0x49   :  { %2345 = vmatprep.subr.bf16.mxu1 %v2344_v40  ;;  %1128 = vmatprep.mubr.f32.mxu0 %v3399_v16  ;;  %v842_v26 = vld [vmem:[#allocation2 + $0x1910] sm:$0xff]  ;;  %v873_v27 = vld [vmem:[#allocation2 + $0x1a08] sm:$0xff]  ;;  %v875_v29 = vld [vmem:[#allocation2 + $0x1a18] sm:$0xff]  ;;  %v2298_v31 = vpack.c.bf16 %v840_v23, %v808_v22 }
  0x4a   :  { %1199 = vmatprep.mubr.f32.mxu1 %v3399_v16  ;;  %v905_v28 = vld [vmem:[#allocation2 + $0x1b08] sm:$0xff]  ;;  %v907_v30 = vld [vmem:[#allocation2 + $0x1b18] sm:$0xff]  ;;  %v2362_v32 = vpack.c.bf16 %v842_v26, %v810_v24  ;;  %v872_v34 = vld [vmem:[#allocation2 + $0x1a00] sm:$0xff] }
  0x4b   :  { %2283 = vmatpush1.bf16.msra.mxu0 %v2282_v46  ;;  %v2300_v33 = vpack.c.bf16 %v905_v28, %v873_v27  ;;  %v904_v35 = vld [vmem:[#allocation2 + $0x1b00] sm:$0xff]  ;;  %v874_v36 = vld [vmem:[#allocation2 + $0x1a10] sm:$0xff]  ;;  %v2364_v37 = vpack.c.bf16 %v907_v30, %v875_v29  ;;  %v937_v39 = vld [vmem:[#allocation2 + $0x1c08] sm:$0xff] }
  0x4c   :  { %2347 = vmatpush1.bf16.msra.mxu1 %v2346_v47  ;;  %2285 = vmatprep.subr.bf16.mxu0 %v2284_v48  ;;  %v906_v38 = vld [vmem:[#allocation2 + $0x1b10] sm:$0xff]  ;;  %v969_v40 = vld [vmem:[#allocation2 + $0x1d08] sm:$0xff]  ;;  %v939_v41 = vld [vmem:[#allocation2 + $0x1c18] sm:$0xff]  ;;  %v2302_v43 = vpack.c.bf16 %v904_v35, %v872_v34 }
  0x4d   :  { %2349 = vmatprep.subr.bf16.mxu1 %v2348_v52  ;;  %v971_v42 = vld [vmem:[#allocation2 + $0x1d18] sm:$0xff]  ;;  %v2366_v44 = vpack.c.bf16 %v906_v38, %v874_v36  ;;  %v2304_v45 = vpack.c.bf16 %v969_v40, %v937_v39  ;;  %v936_v46 = vld [vmem:[#allocation2 + $0x1c00] sm:$0xff]  ;;  %v938_v48 = vld [vmem:[#allocation2 + $0x1c10] sm:$0xff] }
  0x4e   :  { %v968_v47 = vld [vmem:[#allocation2 + $0x1d00] sm:$0xff]  ;;  %v2368_v49 = vpack.c.bf16 %v971_v42, %v939_v41  ;;  %v970_v50 = vld [vmem:[#allocation2 + $0x1d10] sm:$0xff]  ;;  %v1001_v51 = vld [vmem:[#allocation2 + $0x1e08] sm:$0xff] }
  0x4f   :  { %2287 = vmatpush1.bf16.msra.mxu0 %v2286_v58  ;;  %v1033_v52 = vld [vmem:[#allocation2 + $0x1f08] sm:$0xff]  ;;  %v1003_v53 = vld [vmem:[#allocation2 + $0x1e18] sm:$0xff]  ;;  %v2306_v55 = vpack.c.bf16 %v968_v47, %v936_v46  ;;  %v2370_v56 = vpack.c.bf16 %v970_v50, %v938_v48  ;;  %v1000_v58 = vld [vmem:[#allocation2 + $0x1e00] sm:$0xff] }
  0x50   :  { %2351 = vmatpush1.bf16.msra.mxu1 %v2350_v59  ;;  %2289 = vmatprep.subr.bf16.mxu0 %v2288_v60  ;;  %v1035_v54 = vld [vmem:[#allocation2 + $0x1f18] sm:$0xff]  ;;  %v2308_v57 = vpack.c.bf16 %v1033_v52, %v1001_v51  ;;  %v1032_v59 = vld [vmem:[#allocation2 + $0x1f00] sm:$0xff]  ;;  %v1002_v60 = vld [vmem:[#allocation2 + $0x1e10] sm:$0xff] }
  0x51   :  { %2353 = vmatprep.subr.bf16.mxu1 %v2352_v0  ;;  %v2372_v61 = vpack.c.bf16 %v1035_v54, %v1003_v53  ;;  %v1034_v62 = vld [vmem:[#allocation2 + $0x1f10] sm:$0xff]  ;;  %v45_v63 = vld [vmem:[#allocation2 + $0x28] sm:$0xff]  ;;  %v47_v1 = vld [vmem:[#allocation2 + $0x38] sm:$0xff]  ;;  %v2310_v3 = vpack.c.bf16 %v1032_v59, %v1000_v58 }
  0x52   :  { %v77_v0 = vld [vmem:[#allocation2 + $0x128] sm:$0xff]  ;;  %v79_v2 = vld [vmem:[#allocation2 + $0x138] sm:$0xff]  ;;  %v2374_v4 = vpack.c.bf16 %v1034_v62, %v1002_v60  ;;  %v76_v7 = vld [vmem:[#allocation2 + $0x120] sm:$0xff] }
  0x53   :  { %2291 = vmatpush1.bf16.msra.mxu0 %v2290_v6  ;;  %v2376_v5 = vpack.c.bf16 %v77_v0, %v45_v63  ;;  %v44_v6 = vld [vmem:[#allocation2 + $0x20] sm:$0xff]  ;;  %v78_v10 = vld [vmem:[#allocation2 + $0x130] sm:$0xff]  ;;  %v109_v11 = vld [vmem:[#allocation2 + $0x228] sm:$0xff] }
  0x54   :  { %2355 = vmatpush1.bf16.msra.mxu1 %v2354_v8  ;;  %2293 = vmatprep.subr.bf16.mxu0 %v2292_v9  ;;  %v46_v8 = vld [vmem:[#allocation2 + $0x30] sm:$0xff]  ;;  %v2440_v9 = vpack.c.bf16 %v79_v2, %v47_v1  ;;  %v141_v12 = vld [vmem:[#allocation2 + $0x328] sm:$0xff]  ;;  %v143_v14 = vld [vmem:[#allocation2 + $0x338] sm:$0xff]  ;;  %v2378_v17 = vpack.c.bf16 %v76_v7, %v44_v6 }
  0x55   :  { %2357 = vmatprep.subr.bf16.mxu1 %v2356_v13  ;;  %v111_v13 = vld [vmem:[#allocation2 + $0x238] sm:$0xff]  ;;  %v3403_v15 = vld [vmem:[#allocation5] sm:$0xff]  ;;  %v2442_v18 = vpack.c.bf16 %v78_v10, %v46_v8  ;;  %v110_v22 = vld [vmem:[#allocation2 + $0x230] sm:$0xff] }
  0x56   :  { %v2444_v23 = vpack.c.bf16 %v143_v14, %v111_v13  ;;  %v142_v24 = vld [vmem:[#allocation2 + $0x330] sm:$0xff]  ;;  %v205_v26 = vld [vmem:[#allocation2 + $0x528] sm:$0xff]  ;;  %v175_v27 = vld [vmem:[#allocation2 + $0x438] sm:$0xff] }
  0x57   :  { %2295 = vmatpush1.bf16.msra.mxu0 %v2294_v19  ;;  %v2380_v19 = vpack.c.bf16 %v141_v12, %v109_v11  ;;  %v207_v28 = vld [vmem:[#allocation2 + $0x538] sm:$0xff]  ;;  %v2446_v30 = vpack.c.bf16 %v142_v24, %v110_v22  ;;  %v174_v34 = vld [vmem:[#allocation2 + $0x430] sm:$0xff]  ;;  %v269_v38 = vld [vmem:[#allocation2 + $0x728] sm:$0xff] }
  0x58   :  { %2359 = vmatpush1.bf16.msra.mxu1 %v2358_v20  ;;  %2297 = vmatprep.subr.bf16.mxu0 %v2296_v21  ;;  %v108_v20 = vld [vmem:[#allocation2 + $0x220] sm:$0xff]  ;;  %v2448_v35 = vpack.c.bf16 %v207_v28, %v175_v27  ;;  %v206_v36 = vld [vmem:[#allocation2 + $0x530] sm:$0xff]  ;;  %v239_v39 = vld [vmem:[#allocation2 + $0x638] sm:$0xff] }
  0x59   :  { %2361 = vmatprep.subr.bf16.mxu1 %v2360_v25  ;;  %v140_v21 = vld [vmem:[#allocation2 + $0x320] sm:$0xff]  ;;  %v173_v25 = vld [vmem:[#allocation2 + $0x428] sm:$0xff]  ;;  %v271_v40 = vld [vmem:[#allocation2 + $0x738] sm:$0xff]  ;;  %v2450_v42 = vpack.c.bf16 %v206_v36, %v174_v34 }
  0x5a   :  { %v2382_v29 = vpack.c.bf16 %v140_v21, %v108_v20  ;;  %v238_v46 = vld [vmem:[#allocation2 + $0x630] sm:$0xff]  ;;  %v2452_v47 = vpack.c.bf16 %v271_v40, %v239_v39  ;;  %v333_v50 = vld [vmem:[#allocation2 + $0x928] sm:$0xff]  ;;  %v303_v51 = vld [vmem:[#allocation2 + $0x838] sm:$0xff] }
  0x5b   :  { %2299 = vmatpush1.bf16.msra.mxu0 %v2298_v31  ;;  %v2384_v31 = vpack.c.bf16 %v205_v26, %v173_v25  ;;  %v270_v48 = vld [vmem:[#allocation2 + $0x730] sm:$0xff]  ;;  %v335_v52 = vld [vmem:[#allocation2 + $0x938] sm:$0xff]  ;;  %v397_v62 = vld [vmem:[#allocation2 + $0xb28] sm:$0xff] }
  0x5c   :  { %2363 = vmatpush1.bf16.msra.mxu1 %v2362_v32  ;;  %2301 = vmatprep.subr.bf16.mxu0 %v2300_v33  ;;  %v172_v32 = vld [vmem:[#allocation2 + $0x420] sm:$0xff]  ;;  %v2454_v54 = vpack.c.bf16 %v270_v48, %v238_v46  ;;  %v302_v58 = vld [vmem:[#allocation2 + $0x830] sm:$0xff]  ;;  %v2456_v59 = vpack.c.bf16 %v335_v52, %v303_v51  ;;  %v367_v63 = vld [vmem:[#allocation2 + $0xa38] sm:$0xff] }
  0x5d   :  { %2365 = vmatprep.subr.bf16.mxu1 %v2364_v37  ;;  %v204_v33 = vld [vmem:[#allocation2 + $0x520] sm:$0xff]  ;;  %v237_v37 = vld [vmem:[#allocation2 + $0x628] sm:$0xff]  ;;  %v334_v60 = vld [vmem:[#allocation2 + $0x930] sm:$0xff] }
  0x5e   :  { %v2386_v41 = vpack.c.bf16 %v204_v33, %v172_v32  ;;  %v399_v0 = vld [vmem:[#allocation2 + $0xb38] sm:$0xff]  ;;  %v2458_v2 = vpack.c.bf16 %v334_v60, %v302_v58  ;;  %v366_v6 = vld [vmem:[#allocation2 + $0xa30] sm:$0xff]  ;;  %v461_v10 = vld [vmem:[#allocation2 + $0xd28] sm:$0xff] }
  0x5f   :  { %2303 = vmatpush1.bf16.msra.mxu0 %v2302_v43  ;;  %v2388_v43 = vpack.c.bf16 %v269_v38, %v237_v37  ;;  %v2460_v7 = vpack.c.bf16 %v399_v0, %v367_v63  ;;  %v398_v8 = vld [vmem:[#allocation2 + $0xb30] sm:$0xff]  ;;  %v431_v11 = vld [vmem:[#allocation2 + $0xc38] sm:$0xff]  ;;  %v525_v24 = vld [vmem:[#allocation2 + $0xf28] sm:$0xff] }
  0x60   :  { %2367 = vmatpush1.bf16.msra.mxu1 %v2366_v44  ;;  %2305 = vmatprep.subr.bf16.mxu0 %v2304_v45  ;;  %v236_v44 = vld [vmem:[#allocation2 + $0x620] sm:$0xff]  ;;  %v463_v12 = vld [vmem:[#allocation2 + $0xd38] sm:$0xff]  ;;  %v2462_v14 = vpack.c.bf16 %v398_v8, %v366_v6  ;;  %v430_v20 = vld [vmem:[#allocation2 + $0xc30] sm:$0xff] }
  0x61   :  { %2369 = vmatprep.subr.bf16.mxu1 %v2368_v49  ;;  %v268_v45 = vld [vmem:[#allocation2 + $0x720] sm:$0xff]  ;;  %v301_v49 = vld [vmem:[#allocation2 + $0x828] sm:$0xff]  ;;  %v2464_v21 = vpack.c.bf16 %v463_v12, %v431_v11  ;;  %v462_v22 = vld [vmem:[#allocation2 + $0xd30] sm:$0xff] }
  0x62   :  { %v2390_v53 = vpack.c.bf16 %v268_v45, %v236_v44  ;;  %v495_v25 = vld [vmem:[#allocation2 + $0xe38] sm:$0xff]  ;;  %v2466_v28 = vpack.c.bf16 %v462_v22, %v430_v20  ;;  %v494_v32 = vld [vmem:[#allocation2 + $0xe30] sm:$0xff]  ;;  %v589_v36 = vld [vmem:[#allocation2 + $0x1128] sm:$0xff] }
  0x63   :  { %2307 = vmatpush1.bf16.msra.mxu0 %v2306_v55  ;;  %v2392_v55 = vpack.c.bf16 %v333_v50, %v301_v49  ;;  %v527_v26 = vld [vmem:[#allocation2 + $0xf38] sm:$0xff]  ;;  %v526_v34 = vld [vmem:[#allocation2 + $0xf30] sm:$0xff]  ;;  %v653_v48 = vld [vmem:[#allocation2 + $0x1328] sm:$0xff] }
  0x64   :  { %2371 = vmatpush1.bf16.msra.mxu1 %v2370_v56  ;;  %2309 = vmatprep.subr.bf16.mxu0 %v2308_v57  ;;  %v300_v56 = vld [vmem:[#allocation2 + $0x820] sm:$0xff]  ;;  %v2468_v33 = vpack.c.bf16 %v527_v26, %v495_v25  ;;  %v559_v37 = vld [vmem:[#allocation2 + $0x1038] sm:$0xff]  ;;  %v2470_v40 = vpack.c.bf16 %v526_v34, %v494_v32  ;;  %v558_v44 = vld [vmem:[#allocation2 + $0x1030] sm:$0xff] }
  0x65   :  { %2373 = vmatprep.subr.bf16.mxu1 %v2372_v61  ;;  %v332_v57 = vld [vmem:[#allocation2 + $0x920] sm:$0xff]  ;;  %v365_v61 = vld [vmem:[#allocation2 + $0xa28] sm:$0xff]  ;;  %v591_v38 = vld [vmem:[#allocation2 + $0x1138] sm:$0xff] }
  0x66   :  { %v2394_v1 = vpack.c.bf16 %v332_v57, %v300_v56  ;;  %v2472_v45 = vpack.c.bf16 %v591_v38, %v559_v37  ;;  %v590_v46 = vld [vmem:[#allocation2 + $0x1130] sm:$0xff]  ;;  %v623_v49 = vld [vmem:[#allocation2 + $0x1238] sm:$0xff]  ;;  %v717_v60 = vld [vmem:[#allocation2 + $0x1528] sm:$0xff] }
  0x67   :  { %2311 = vmatpush1.bf16.msra.mxu0 %v2310_v3  ;;  %v2396_v3 = vpack.c.bf16 %v397_v62, %v365_v61  ;;  %v655_v50 = vld [vmem:[#allocation2 + $0x1338] sm:$0xff]  ;;  %v2474_v52 = vpack.c.bf16 %v590_v46, %v558_v44  ;;  %v622_v56 = vld [vmem:[#allocation2 + $0x1230] sm:$0xff]  ;;  %v781_v8 = vld [vmem:[#allocation2 + $0x1728] sm:$0xff] }
  0x68   :  { %2375 = vmatpush1.bf16.msra.mxu1 %v2374_v4  ;;  %2377 = vmatprep.subr.bf16.mxu0 %v2376_v5  ;;  %v364_v4 = vld [vmem:[#allocation2 + $0xa20] sm:$0xff]  ;;  %v2476_v57 = vpack.c.bf16 %v655_v50, %v623_v49  ;;  %v654_v58 = vld [vmem:[#allocation2 + $0x1330] sm:$0xff]  ;;  %v687_v61 = vld [vmem:[#allocation2 + $0x1438] sm:$0xff] }
  0x69   :  { %2441 = vmatprep.subr.bf16.mxu1 %v2440_v9  ;;  %v396_v5 = vld [vmem:[#allocation2 + $0xb20] sm:$0xff]  ;;  %v429_v9 = vld [vmem:[#allocation2 + $0xc28] sm:$0xff]  ;;  %v719_v62 = vld [vmem:[#allocation2 + $0x1538] sm:$0xff]  ;;  %v2478_v0 = vpack.c.bf16 %v654_v58, %v622_v56 }
  0x6a   :  { %1129 = vmatmul.mubr.f32.vlgmr.msra.gmra.mrb[0].mxu0 %v3403_v15  ;;  %v2398_v13 = vpack.c.bf16 %v396_v5, %v364_v4  ;;  %v686_v4 = vld [vmem:[#allocation2 + $0x1430] sm:$0xff]  ;;  %v2480_v5 = vpack.c.bf16 %v719_v62, %v687_v61  ;;  %v845_v22 = vld [vmem:[#allocation2 + $0x1928] sm:$0xff] }
  0x6b   :  { %1200 = vmatmul.mubr.f32.vlgmr.msra.gmra.mrb[0].mxu1 %v3403_v15  ;;  %2379 = vmatpush1.bf16.msra.mxu0 %v2378_v17  ;;  %v2400_v17 = vpack.c.bf16 %v461_v10, %v429_v9  ;;  %v718_v6 = vld [vmem:[#allocation2 + $0x1530] sm:$0xff]  ;;  %v751_v9 = vld [vmem:[#allocation2 + $0x1638] sm:$0xff]  ;;  %v909_v34 = vld [vmem:[#allocation2 + $0x1b28] sm:$0xff] }
  0x6c   :  { %2443 = vmatpush1.bf16.msra.mxu1 %v2442_v18  ;;  %2381 = vmatprep.subr.bf16.mxu0 %v2380_v19  ;;  %v428_v18 = vld [vmem:[#allocation2 + $0xc20] sm:$0xff]  ;;  %v783_v10 = vld [vmem:[#allocation2 + $0x1738] sm:$0xff]  ;;  %v2482_v12 = vpack.c.bf16 %v718_v6, %v686_v4  ;;  %v782_v20 = vld [vmem:[#allocation2 + $0x1730] sm:$0xff] }
  0x6d   :  { %2445 = vmatprep.subr.bf16.mxu1 %v2444_v23  ;;  %1270 = vmatprep.mubr.f32.mxu0 %v3399_v16  ;;  %v460_v19 = vld [vmem:[#allocation2 + $0xd20] sm:$0xff]  ;;  %v493_v23 = vld [vmem:[#allocation2 + $0xe28] sm:$0xff]  ;;  %v846_v32 = vld [vmem:[#allocation2 + $0x1930] sm:$0xff] }
  0x6e   :  { %1341 = vmatprep.mubr.f32.mxu1 %v3399_v16  ;;  %v2402_v27 = vpack.c.bf16 %v460_v19, %v428_v18  ;;  %v750_v18 = vld [vmem:[#allocation2 + $0x1630] sm:$0xff]  ;;  %v2484_v19 = vpack.c.bf16 %v783_v10, %v751_v9  ;;  %v973_v46 = vld [vmem:[#allocation2 + $0x1d28] sm:$0xff] }
  0x6f   :  { %2383 = vmatpush1.bf16.msra.mxu0 %v2382_v29  ;;  %v2404_v29 = vpack.c.bf16 %v525_v24, %v493_v23  ;;  %v815_v23 = vld [vmem:[#allocation2 + $0x1838] sm:$0xff]  ;;  %v2486_v26 = vpack.c.bf16 %v782_v20, %v750_v18  ;;  %v910_v44 = vld [vmem:[#allocation2 + $0x1b30] sm:$0xff]  ;;  %v1037_v58 = vld [vmem:[#allocation2 + $0x1f28] sm:$0xff] }
  0x70   :  { %2447 = vmatpush1.bf16.msra.mxu1 %v2446_v30  ;;  %2385 = vmatprep.subr.bf16.mxu0 %v2384_v31  ;;  %v492_v30 = vld [vmem:[#allocation2 + $0xe20] sm:$0xff]  ;;  %v847_v24 = vld [vmem:[#allocation2 + $0x1938] sm:$0xff]  ;;  %v974_v56 = vld [vmem:[#allocation2 + $0x1d30] sm:$0xff] }
  0x71   :  { %2449 = vmatprep.subr.bf16.mxu1 %v2448_v35  ;;  %v524_v31 = vld [vmem:[#allocation2 + $0xf20] sm:$0xff]  ;;  %v557_v35 = vld [vmem:[#allocation2 + $0x1028] sm:$0xff]  ;;  %v1038_v4 = vld [vmem:[#allocation2 + $0x1f30] sm:$0xff] }
  0x72   :  { %v2406_v39 = vpack.c.bf16 %v524_v31, %v492_v30  ;;  %v814_v30 = vld [vmem:[#allocation2 + $0x1830] sm:$0xff]  ;;  %v2488_v31 = vpack.c.bf16 %v847_v24, %v815_v23  ;;  %v81_v6 = vld [vmem:[#allocation2 + $0x148] sm:$0xff] }
  0x73   :  { %2387 = vmatpush1.bf16.msra.mxu0 %v2386_v41  ;;  %v2408_v41 = vpack.c.bf16 %v589_v36, %v557_v35  ;;  %v879_v35 = vld [vmem:[#allocation2 + $0x1a38] sm:$0xff]  ;;  %v2490_v38 = vpack.c.bf16 %v846_v32, %v814_v30  ;;  %v82_v18 = vld [vmem:[#allocation2 + $0x150] sm:$0xff]  ;;  %v145_v20 = vld [vmem:[#allocation2 + $0x348] sm:$0xff] }
  0x74   :  { %2451 = vmatpush1.bf16.msra.mxu1 %v2450_v42  ;;  %2389 = vmatprep.subr.bf16.mxu0 %v2388_v43  ;;  %v556_v42 = vld [vmem:[#allocation2 + $0x1020] sm:$0xff]  ;;  %v911_v36 = vld [vmem:[#allocation2 + $0x1b38] sm:$0xff]  ;;  %v146_v30 = vld [vmem:[#allocation2 + $0x350] sm:$0xff] }
  0x75   :  { %2453 = vmatprep.subr.bf16.mxu1 %v2452_v47  ;;  %v588_v43 = vld [vmem:[#allocation2 + $0x1120] sm:$0xff]  ;;  %v621_v47 = vld [vmem:[#allocation2 + $0x1228] sm:$0xff] }
  0x76   :  { %v2410_v51 = vpack.c.bf16 %v588_v43, %v556_v42  ;;  %v878_v42 = vld [vmem:[#allocation2 + $0x1a30] sm:$0xff]  ;;  %v2492_v43 = vpack.c.bf16 %v911_v36, %v879_v35  ;;  %v209_v32 = vld [vmem:[#allocation2 + $0x548] sm:$0xff] }
  0x77   :  { %2391 = vmatpush1.bf16.msra.mxu0 %v2390_v53  ;;  %v2412_v53 = vpack.c.bf16 %v653_v48, %v621_v47  ;;  %v943_v47 = vld [vmem:[#allocation2 + $0x1c38] sm:$0xff]  ;;  %v2494_v50 = vpack.c.bf16 %v910_v44, %v878_v42  ;;  %v210_v42 = vld [vmem:[#allocation2 + $0x550] sm:$0xff]  ;;  %v273_v44 = vld [vmem:[#allocation2 + $0x748] sm:$0xff] }
  0x78   :  { %2455 = vmatpush1.bf16.msra.mxu1 %v2454_v54  ;;  %2393 = vmatprep.subr.bf16.mxu0 %v2392_v55  ;;  %v620_v54 = vld [vmem:[#allocation2 + $0x1220] sm:$0xff]  ;;  %v975_v48 = vld [vmem:[#allocation2 + $0x1d38] sm:$0xff] }
  0x79   :  { %2457 = vmatprep.subr.bf16.mxu1 %v2456_v59  ;;  %v652_v55 = vld [vmem:[#allocation2 + $0x1320] sm:$0xff]  ;;  %v685_v59 = vld [vmem:[#allocation2 + $0x1428] sm:$0xff] }
  0x7a   :  { %v2414_v63 = vpack.c.bf16 %v652_v55, %v620_v54  ;;  %v942_v54 = vld [vmem:[#allocation2 + $0x1c30] sm:$0xff]  ;;  %v2496_v55 = vpack.c.bf16 %v975_v48, %v943_v47 }
  0x7b   :  { %2395 = vmatpush1.bf16.msra.mxu0 %v2394_v1  ;;  %v2416_v1 = vpack.c.bf16 %v717_v60, %v685_v59  ;;  %v1007_v59 = vld [vmem:[#allocation2 + $0x1e38] sm:$0xff]  ;;  %v2498_v62 = vpack.c.bf16 %v974_v56, %v942_v54  ;;  %v305_v54 = vld [vmem:[#allocation2 + $0x848] sm:$0xff] }
  0x7c   :  { %2459 = vmatpush1.bf16.msra.mxu1 %v2458_v2  ;;  %2397 = vmatprep.subr.bf16.mxu0 %v2396_v3  ;;  %v684_v2 = vld [vmem:[#allocation2 + $0x1420] sm:$0xff]  ;;  %v1039_v60 = vld [vmem:[#allocation2 + $0x1f38] sm:$0xff] }
  0x7d   :  { %2461 = vmatprep.subr.bf16.mxu1 %v2460_v7  ;;  %v716_v3 = vld [vmem:[#allocation2 + $0x1520] sm:$0xff]  ;;  %v749_v7 = vld [vmem:[#allocation2 + $0x1628] sm:$0xff]  ;;  %v307_v56 = vld [vmem:[#allocation2 + $0x858] sm:$0xff] }
  0x7e   :  { %v2418_v11 = vpack.c.bf16 %v716_v3, %v684_v2  ;;  %v1006_v2 = vld [vmem:[#allocation2 + $0x1e30] sm:$0xff]  ;;  %v2500_v3 = vpack.c.bf16 %v1039_v60, %v1007_v59  ;;  %v304_v60 = vld [vmem:[#allocation2 + $0x840] sm:$0xff] }
  0x7f   :  { %2399 = vmatpush1.bf16.msra.mxu0 %v2398_v13  ;;  %v2420_v13 = vpack.c.bf16 %v781_v8, %v749_v7  ;;  %v51_v7 = vld [vmem:[#allocation2 + $0x58] sm:$0xff]  ;;  %v2502_v10 = vpack.c.bf16 %v1038_v4, %v1006_v2  ;;  %v401_v2 = vld [vmem:[#allocation2 + $0xb48] sm:$0xff] }
  0x80   :  { %2463 = vmatpush1.bf16.msra.mxu1 %v2462_v14  ;;  %2401 = vmatprep.subr.bf16.mxu0 %v2400_v17  ;;  %v748_v14 = vld [vmem:[#allocation2 + $0x1620] sm:$0xff]  ;;  %v83_v8 = vld [vmem:[#allocation2 + $0x158] sm:$0xff] }
  0x81   :  { %2465 = vmatprep.subr.bf16.mxu1 %v2464_v21  ;;  %v780_v17 = vld [vmem:[#allocation2 + $0x1720] sm:$0xff]  ;;  %v813_v21 = vld [vmem:[#allocation2 + $0x1828] sm:$0xff]  ;;  %v403_v4 = vld [vmem:[#allocation2 + $0xb58] sm:$0xff] }
  0x82   :  { %v2422_v25 = vpack.c.bf16 %v780_v17, %v748_v14  ;;  %v50_v14 = vld [vmem:[#allocation2 + $0x50] sm:$0xff]  ;;  %v2568_v17 = vpack.c.bf16 %v83_v8, %v51_v7  ;;  %v368_v8 = vld [vmem:[#allocation2 + $0xa40] sm:$0xff] }
  0x83   :  { %2403 = vmatpush1.bf16.msra.mxu0 %v2402_v27  ;;  %v2424_v27 = vpack.c.bf16 %v845_v22, %v813_v21  ;;  %v115_v21 = vld [vmem:[#allocation2 + $0x258] sm:$0xff]  ;;  %v2570_v24 = vpack.c.bf16 %v82_v18, %v50_v14  ;;  %v465_v14 = vld [vmem:[#allocation2 + $0xd48] sm:$0xff] }
  0x84   :  { %2467 = vmatpush1.bf16.msra.mxu1 %v2466_v28  ;;  %2405 = vmatprep.subr.bf16.mxu0 %v2404_v29  ;;  %v812_v28 = vld [vmem:[#allocation2 + $0x1820] sm:$0xff]  ;;  %v147_v22 = vld [vmem:[#allocation2 + $0x358] sm:$0xff] }
  0x85   :  { %2469 = vmatprep.subr.bf16.mxu1 %v2468_v33  ;;  %v844_v29 = vld [vmem:[#allocation2 + $0x1920] sm:$0xff]  ;;  %v877_v33 = vld [vmem:[#allocation2 + $0x1a28] sm:$0xff]  ;;  %v467_v18 = vld [vmem:[#allocation2 + $0xd58] sm:$0xff] }
  0x86   :  { %v2426_v37 = vpack.c.bf16 %v844_v29, %v812_v28  ;;  %v114_v28 = vld [vmem:[#allocation2 + $0x250] sm:$0xff]  ;;  %v2572_v29 = vpack.c.bf16 %v147_v22, %v115_v21  ;;  %v432_v22 = vld [vmem:[#allocation2 + $0xc40] sm:$0xff] }
  0x87   :  { %2407 = vmatpush1.bf16.msra.mxu0 %v2406_v39  ;;  %v2428_v39 = vpack.c.bf16 %v909_v34, %v877_v33  ;;  %v179_v33 = vld [vmem:[#allocation2 + $0x458] sm:$0xff]  ;;  %v2574_v36 = vpack.c.bf16 %v146_v30, %v114_v28  ;;  %v529_v28 = vld [vmem:[#allocation2 + $0xf48] sm:$0xff] }
  0x88   :  { %2471 = vmatpush1.bf16.msra.mxu1 %v2470_v40  ;;  %2409 = vmatprep.subr.bf16.mxu0 %v2408_v41  ;;  %v876_v40 = vld [vmem:[#allocation2 + $0x1a20] sm:$0xff]  ;;  %v211_v34 = vld [vmem:[#allocation2 + $0x558] sm:$0xff] }
  0x89   :  { %2473 = vmatprep.subr.bf16.mxu1 %v2472_v45  ;;  %v908_v41 = vld [vmem:[#allocation2 + $0x1b20] sm:$0xff]  ;;  %v941_v45 = vld [vmem:[#allocation2 + $0x1c28] sm:$0xff]  ;;  %v531_v30 = vld [vmem:[#allocation2 + $0xf58] sm:$0xff] }
  0x8a   :  { %v2430_v49 = vpack.c.bf16 %v908_v41, %v876_v40  ;;  %v178_v40 = vld [vmem:[#allocation2 + $0x450] sm:$0xff]  ;;  %v2576_v41 = vpack.c.bf16 %v211_v34, %v179_v33  ;;  %v496_v34 = vld [vmem:[#allocation2 + $0xe40] sm:$0xff] }
  0x8b   :  { %2411 = vmatpush1.bf16.msra.mxu0 %v2410_v51  ;;  %v2432_v51 = vpack.c.bf16 %v973_v46, %v941_v45  ;;  %v243_v45 = vld [vmem:[#allocation2 + $0x658] sm:$0xff]  ;;  %v2578_v47 = vpack.c.bf16 %v210_v42, %v178_v40  ;;  %v593_v40 = vld [vmem:[#allocation2 + $0x1148] sm:$0xff] }
  0x8c   :  { %2475 = vmatpush1.bf16.msra.mxu1 %v2474_v52  ;;  %2413 = vmatprep.subr.bf16.mxu0 %v2412_v53  ;;  %v940_v52 = vld [vmem:[#allocation2 + $0x1c20] sm:$0xff]  ;;  %v275_v46 = vld [vmem:[#allocation2 + $0x758] sm:$0xff] }
  0x8d   :  { %2477 = vmatprep.subr.bf16.mxu1 %v2476_v57  ;;  %v972_v53 = vld [vmem:[#allocation2 + $0x1d20] sm:$0xff]  ;;  %v1005_v57 = vld [vmem:[#allocation2 + $0x1e28] sm:$0xff]  ;;  %v595_v42 = vld [vmem:[#allocation2 + $0x1158] sm:$0xff] }
  0x8e   :  { %v2434_v61 = vpack.c.bf16 %v972_v53, %v940_v52  ;;  %v2580_v52 = vpack.c.bf16 %v275_v46, %v243_v45  ;;  %v274_v53 = vld [vmem:[#allocation2 + $0x750] sm:$0xff]  ;;  %v560_v46 = vld [vmem:[#allocation2 + $0x1040] sm:$0xff] }
  0x8f   :  { %2415 = vmatpush1.bf16.msra.mxu0 %v2414_v63  ;;  %v2436_v63 = vpack.c.bf16 %v1037_v58, %v1005_v57  ;;  %v339_v57 = vld [vmem:[#allocation2 + $0x958] sm:$0xff] }
  0x90   :  { %2479 = vmatpush1.bf16.msra.mxu1 %v2478_v0  ;;  %2417 = vmatprep.subr.bf16.mxu0 %v2416_v1  ;;  %v1004_v0 = vld [vmem:[#allocation2 + $0x1e20] sm:$0xff] }
  0x91   :  { %2481 = vmatprep.subr.bf16.mxu1 %v2480_v5  ;;  %v1036_v1 = vld [vmem:[#allocation2 + $0x1f20] sm:$0xff]  ;;  %v49_v5 = vld [vmem:[#allocation2 + $0x48] sm:$0xff] }
  0x92   :  { %v2438_v9 = vpack.c.bf16 %v1036_v1, %v1004_v0  ;;  %v338_v0 = vld [vmem:[#allocation2 + $0x950] sm:$0xff]  ;;  %v369_v1 = vld [vmem:[#allocation2 + $0xa48] sm:$0xff] }
  0x93   :  { %2419 = vmatpush1.bf16.msra.mxu0 %v2418_v11  ;;  %v2504_v11 = vpack.c.bf16 %v81_v6, %v49_v5  ;;  %v2524_v7 = vpack.c.bf16 %v401_v2, %v369_v1 }
  0x94   :  { %2483 = vmatpush1.bf16.msra.mxu1 %v2482_v12  ;;  %2421 = vmatprep.subr.bf16.mxu0 %v2420_v13  ;;  %v48_v12 = vld [vmem:[#allocation2 + $0x40] sm:$0xff] }
  0x95   :  { %2485 = vmatprep.subr.bf16.mxu1 %v2484_v19  ;;  %v80_v13 = vld [vmem:[#allocation2 + $0x140] sm:$0xff]  ;;  %v113_v19 = vld [vmem:[#allocation2 + $0x248] sm:$0xff] }
  0x96   :  { %v2506_v23 = vpack.c.bf16 %v80_v13, %v48_v12  ;;  %v402_v12 = vld [vmem:[#allocation2 + $0xb50] sm:$0xff]  ;;  %v433_v13 = vld [vmem:[#allocation2 + $0xc48] sm:$0xff] }
  0x97   :  { %2423 = vmatpush1.bf16.msra.mxu0 %v2422_v25  ;;  %v2508_v25 = vpack.c.bf16 %v145_v20, %v113_v19  ;;  %v2528_v21 = vpack.c.bf16 %v465_v14, %v433_v13 }
  0x98   :  { %2487 = vmatpush1.bf16.msra.mxu1 %v2486_v26  ;;  %2425 = vmatprep.subr.bf16.mxu0 %v2424_v27  ;;  %v112_v26 = vld [vmem:[#allocation2 + $0x240] sm:$0xff] }
  0x99   :  { %2489 = vmatprep.subr.bf16.mxu1 %v2488_v31  ;;  %v144_v27 = vld [vmem:[#allocation2 + $0x340] sm:$0xff]  ;;  %v177_v31 = vld [vmem:[#allocation2 + $0x448] sm:$0xff] }
  0x9a   :  { %v2510_v35 = vpack.c.bf16 %v144_v27, %v112_v26  ;;  %v466_v26 = vld [vmem:[#allocation2 + $0xd50] sm:$0xff]  ;;  %v497_v27 = vld [vmem:[#allocation2 + $0xe48] sm:$0xff] }
  0x9b   :  { %2427 = vmatpush1.bf16.msra.mxu0 %v2426_v37  ;;  %v2512_v37 = vpack.c.bf16 %v209_v32, %v177_v31  ;;  %v2532_v33 = vpack.c.bf16 %v529_v28, %v497_v27 }
  0x9c   :  { %2491 = vmatpush1.bf16.msra.mxu1 %v2490_v38  ;;  %2429 = vmatprep.subr.bf16.mxu0 %v2428_v39  ;;  %v176_v38 = vld [vmem:[#allocation2 + $0x440] sm:$0xff] }
  0x9d   :  { %2493 = vmatprep.subr.bf16.mxu1 %v2492_v43  ;;  %v208_v39 = vld [vmem:[#allocation2 + $0x540] sm:$0xff]  ;;  %v241_v43 = vld [vmem:[#allocation2 + $0x648] sm:$0xff] }
  0x9e   :  { %v2516_v48 = vpack.c.bf16 %v273_v44, %v241_v43 }
  0x9f   :  { %2431 = vmatpush1.bf16.msra.mxu0 %v2430_v49  ;;  %v240_v49 = vld [vmem:[#allocation2 + $0x640] sm:$0xff] }
  0xa0   :  { %2495 = vmatpush1.bf16.msra.mxu1 %v2494_v50  ;;  %2433 = vmatprep.subr.bf16.mxu0 %v2432_v51  ;;  %v272_v50 = vld [vmem:[#allocation2 + $0x740] sm:$0xff]  ;;  %v242_v51 = vld [vmem:[#allocation2 + $0x650] sm:$0xff] }
  0xa1   :  { %2497 = vmatprep.subr.bf16.mxu1 %v2496_v55  ;;  %v337_v55 = vld [vmem:[#allocation2 + $0x948] sm:$0xff]  ;;  %v2518_v58 = vpack.c.bf16 %v272_v50, %v240_v49  ;;  %v594_v49 = vld [vmem:[#allocation2 + $0x1150] sm:$0xff] }
  0xa2   :  { %v2520_v59 = vpack.c.bf16 %v337_v55, %v305_v54  ;;  %v625_v50 = vld [vmem:[#allocation2 + $0x1248] sm:$0xff] }
  0xa3   :  { %2435 = vmatpush1.bf16.msra.mxu0 %v2434_v61  ;;  %v336_v61 = vld [vmem:[#allocation2 + $0x940] sm:$0xff] }
  0xa4   :  { %2499 = vmatpush1.bf16.msra.mxu1 %v2498_v62  ;;  %2437 = vmatprep.subr.bf16.mxu0 %v2436_v63  ;;  %v306_v62 = vld [vmem:[#allocation2 + $0x850] sm:$0xff]  ;;  %v2584_v63 = vpack.c.bf16 %v339_v57, %v307_v56  ;;  %v2522_v5 = vpack.c.bf16 %v336_v61, %v304_v60  ;;  %v624_v57 = vld [vmem:[#allocation2 + $0x1240] sm:$0xff]  ;;  %v689_v61 = vld [vmem:[#allocation2 + $0x1448] sm:$0xff] }
  0xa5   :  { %2501 = vmatprep.subr.bf16.mxu1 %v2500_v3  ;;  %v371_v3 = vld [vmem:[#allocation2 + $0xa58] sm:$0xff]  ;;  %v2586_v6 = vpack.c.bf16 %v338_v0, %v306_v62  ;;  %v658_v60 = vld [vmem:[#allocation2 + $0x1350] sm:$0xff]  ;;  %v721_v62 = vld [vmem:[#allocation2 + $0x1548] sm:$0xff] }
  0xa6   :  { %v723_v0 = vld [vmem:[#allocation2 + $0x1558] sm:$0xff] }
  0xa7   :  { %2439 = vmatpush1.bf16.msra.mxu0 %v2438_v9  ;;  %v400_v9 = vld [vmem:[#allocation2 + $0xb40] sm:$0xff] }
  0xa8   :  { %2503 = vmatpush1.bf16.msra.mxu1 %v2502_v10  ;;  %2505 = vmatprep.subr.bf16.mxu0 %v2504_v11  ;;  %v370_v10 = vld [vmem:[#allocation2 + $0xa50] sm:$0xff]  ;;  %v2588_v11 = vpack.c.bf16 %v403_v4, %v371_v3  ;;  %v2526_v19 = vpack.c.bf16 %v400_v9, %v368_v8  ;;  %v2544_v3 = vpack.c.bf16 %v721_v62, %v689_v61  ;;  %v688_v4 = vld [vmem:[#allocation2 + $0x1440] sm:$0xff]  ;;  %v753_v9 = vld [vmem:[#allocation2 + $0x1648] sm:$0xff] }
  0xa9   :  { %2569 = vmatprep.subr.bf16.mxu1 %v2568_v17  ;;  %v435_v17 = vld [vmem:[#allocation2 + $0xc58] sm:$0xff]  ;;  %v2590_v20 = vpack.c.bf16 %v402_v12, %v370_v10  ;;  %v722_v8 = vld [vmem:[#allocation2 + $0x1550] sm:$0xff]  ;;  %v785_v10 = vld [vmem:[#allocation2 + $0x1748] sm:$0xff] }
  0xaa   :  { %1271 = vmatmul.mubr.f32.vlgmr.msra.gmra.mrb[2].mxu0 %v3403_v15  ;;  %v787_v12 = vld [vmem:[#allocation2 + $0x1758] sm:$0xff] }
  0xab   :  { %1342 = vmatmul.mubr.f32.vlgmr.msra.gmra.mrb[2].mxu1 %v3403_v15  ;;  %2507 = vmatpush1.bf16.msra.mxu0 %v2506_v23  ;;  %v2514_v15 = vpack.c.bf16 %v208_v39, %v176_v38  ;;  %v464_v23 = vld [vmem:[#allocation2 + $0xd40] sm:$0xff]  ;;  %v530_v38 = vld [vmem:[#allocation2 + $0xf50] sm:$0xff]  ;;  %v561_v39 = vld [vmem:[#allocation2 + $0x1048] sm:$0xff] }
  0xac   :  { %2571 = vmatpush1.bf16.msra.mxu1 %v2570_v24  ;;  %2509 = vmatprep.subr.bf16.mxu0 %v2508_v25  ;;  %v434_v24 = vld [vmem:[#allocation2 + $0xc50] sm:$0xff]  ;;  %v2592_v25 = vpack.c.bf16 %v467_v18, %v435_v17  ;;  %v2530_v31 = vpack.c.bf16 %v464_v23, %v432_v22  ;;  %v2536_v45 = vpack.c.bf16 %v593_v40, %v561_v39  ;;  %v752_v18 = vld [vmem:[#allocation2 + $0x1640] sm:$0xff]  ;;  %v817_v23 = vld [vmem:[#allocation2 + $0x1848] sm:$0xff] }
  0xad   :  { %2573 = vmatprep.subr.bf16.mxu1 %v2572_v29  ;;  %1412 = vmatprep.mubr.f32.mxu0 %v3399_v16  ;;  %v499_v29 = vld [vmem:[#allocation2 + $0xe58] sm:$0xff]  ;;  %v2594_v32 = vpack.c.bf16 %v466_v26, %v434_v24  ;;  %v2548_v17 = vpack.c.bf16 %v785_v10, %v753_v9  ;;  %v786_v22 = vld [vmem:[#allocation2 + $0x1750] sm:$0xff]  ;;  %v849_v24 = vld [vmem:[#allocation2 + $0x1948] sm:$0xff] }
  0xae   :  { %1483 = vmatprep.mubr.f32.mxu1 %v3399_v16  ;;  %v2582_v16 = vpack.c.bf16 %v274_v53, %v242_v51  ;;  %v657_v51 = vld [vmem:[#allocation2 + $0x1348] sm:$0xff]  ;;  %v659_v53 = vld [vmem:[#allocation2 + $0x1358] sm:$0xff] }
  0xaf   :  { %2511 = vmatpush1.bf16.msra.mxu0 %v2510_v35  ;;  %v528_v35 = vld [vmem:[#allocation2 + $0xf40] sm:$0xff]  ;;  %v2540_v56 = vpack.c.bf16 %v657_v51, %v625_v50  ;;  %v851_v26 = vld [vmem:[#allocation2 + $0x1958] sm:$0xff] }
  0xb0   :  { %2575 = vmatpush1.bf16.msra.mxu1 %v2574_v36  ;;  %2513 = vmatprep.subr.bf16.mxu0 %v2512_v37  ;;  %v498_v36 = vld [vmem:[#allocation2 + $0xe50] sm:$0xff]  ;;  %v2596_v37 = vpack.c.bf16 %v531_v30, %v499_v29  ;;  %v2534_v43 = vpack.c.bf16 %v528_v35, %v496_v34  ;;  %v2552_v29 = vpack.c.bf16 %v849_v24, %v817_v23  ;;  %v816_v30 = vld [vmem:[#allocation2 + $0x1840] sm:$0xff]  ;;  %v881_v35 = vld [vmem:[#allocation2 + $0x1a48] sm:$0xff] }
  0xb1   :  { %2577 = vmatprep.subr.bf16.mxu1 %v2576_v41  ;;  %v563_v41 = vld [vmem:[#allocation2 + $0x1058] sm:$0xff]  ;;  %v2598_v44 = vpack.c.bf16 %v530_v38, %v498_v36  ;;  %v850_v34 = vld [vmem:[#allocation2 + $0x1950] sm:$0xff]  ;;  %v913_v36 = vld [vmem:[#allocation2 + $0x1b48] sm:$0xff] }
  0xb2   :  { %v915_v38 = vld [vmem:[#allocation2 + $0x1b58] sm:$0xff] }
  0xb3   :  { %2515 = vmatpush1.bf16.msra.mxu0 %v2514_v15  ;;  %v592_v15 = vld [vmem:[#allocation2 + $0x1140] sm:$0xff] }
  0xb4   :  { %2579 = vmatpush1.bf16.msra.mxu1 %v2578_v47  ;;  %2517 = vmatprep.subr.bf16.mxu0 %v2516_v48  ;;  %v562_v47 = vld [vmem:[#allocation2 + $0x1050] sm:$0xff]  ;;  %v2600_v48 = vpack.c.bf16 %v595_v42, %v563_v41  ;;  %v2538_v54 = vpack.c.bf16 %v592_v15, %v560_v46  ;;  %v2556_v41 = vpack.c.bf16 %v913_v36, %v881_v35  ;;  %v880_v42 = vld [vmem:[#allocation2 + $0x1a40] sm:$0xff]  ;;  %v945_v15 = vld [vmem:[#allocation2 + $0x1c48] sm:$0xff] }
  0xb5   :  { %2581 = vmatprep.subr.bf16.mxu1 %v2580_v52  ;;  %v627_v52 = vld [vmem:[#allocation2 + $0x1258] sm:$0xff]  ;;  %v2602_v55 = vpack.c.bf16 %v594_v49, %v562_v47  ;;  %v914_v46 = vld [vmem:[#allocation2 + $0x1b50] sm:$0xff]  ;;  %v977_v47 = vld [vmem:[#allocation2 + $0x1d48] sm:$0xff] }
  0xb6   :  { %v979_v49 = vld [vmem:[#allocation2 + $0x1d58] sm:$0xff] }
  0xb7   :  { %2519 = vmatpush1.bf16.msra.mxu0 %v2518_v58  ;;  %v656_v58 = vld [vmem:[#allocation2 + $0x1340] sm:$0xff]  ;;  %v215_v35 = vld [vmem:[#allocation2 + $0x578] sm:$0xff] }
  0xb8   :  { %2583 = vmatpush1.bf16.msra.mxu1 %v2582_v16  ;;  %2521 = vmatprep.subr.bf16.mxu0 %v2520_v59  ;;  %v626_v16 = vld [vmem:[#allocation2 + $0x1250] sm:$0xff]  ;;  %v2604_v59 = vpack.c.bf16 %v659_v53, %v627_v52  ;;  %v2542_v1 = vpack.c.bf16 %v656_v58, %v624_v57  ;;  %v2560_v52 = vpack.c.bf16 %v977_v47, %v945_v15  ;;  %v944_v53 = vld [vmem:[#allocation2 + $0x1c40] sm:$0xff]  ;;  %v1009_v58 = vld [vmem:[#allocation2 + $0x1e48] sm:$0xff] }
  0xb9   :  { %2585 = vmatprep.subr.bf16.mxu1 %v2584_v63  ;;  %v691_v63 = vld [vmem:[#allocation2 + $0x1458] sm:$0xff]  ;;  %v2606_v2 = vpack.c.bf16 %v658_v60, %v626_v16  ;;  %v978_v57 = vld [vmem:[#allocation2 + $0x1d50] sm:$0xff]  ;;  %v1041_v16 = vld [vmem:[#allocation2 + $0x1f48] sm:$0xff] }
  0xba   :  { %v1043_v60 = vld [vmem:[#allocation2 + $0x1f58] sm:$0xff] }
  0xbb   :  { %2523 = vmatpush1.bf16.msra.mxu0 %v2522_v5  ;;  %v720_v5 = vld [vmem:[#allocation2 + $0x1540] sm:$0xff]  ;;  %v247_v15 = vld [vmem:[#allocation2 + $0x678] sm:$0xff] }
  0xbc   :  { %2587 = vmatpush1.bf16.msra.mxu1 %v2586_v6  ;;  %2525 = vmatprep.subr.bf16.mxu0 %v2524_v7  ;;  %v690_v6 = vld [vmem:[#allocation2 + $0x1450] sm:$0xff]  ;;  %v2608_v7 = vpack.c.bf16 %v723_v0, %v691_v63  ;;  %v2546_v13 = vpack.c.bf16 %v720_v5, %v688_v4  ;;  %v2564_v63 = vpack.c.bf16 %v1041_v16, %v1009_v58  ;;  %v1008_v0 = vld [vmem:[#allocation2 + $0x1e40] sm:$0xff]  ;;  %v53_v5 = vld [vmem:[#allocation2 + $0x68] sm:$0xff] }
  0xbd   :  { %2589 = vmatprep.subr.bf16.mxu1 %v2588_v11  ;;  %v755_v11 = vld [vmem:[#allocation2 + $0x1658] sm:$0xff]  ;;  %v2610_v14 = vpack.c.bf16 %v722_v8, %v690_v6  ;;  %v1042_v4 = vld [vmem:[#allocation2 + $0x1f50] sm:$0xff]  ;;  %v85_v6 = vld [vmem:[#allocation2 + $0x168] sm:$0xff] }
  0xbe   :  { %v87_v8 = vld [vmem:[#allocation2 + $0x178] sm:$0xff] }
  0xbf   :  { %2527 = vmatpush1.bf16.msra.mxu0 %v2526_v19  ;;  %v784_v19 = vld [vmem:[#allocation2 + $0x1740] sm:$0xff]  ;;  %v279_v47 = vld [vmem:[#allocation2 + $0x778] sm:$0xff] }
  0xc0   :  { %2591 = vmatpush1.bf16.msra.mxu1 %v2590_v20  ;;  %2529 = vmatprep.subr.bf16.mxu0 %v2528_v21  ;;  %v754_v20 = vld [vmem:[#allocation2 + $0x1650] sm:$0xff]  ;;  %v2612_v21 = vpack.c.bf16 %v787_v12, %v755_v11  ;;  %v2550_v27 = vpack.c.bf16 %v784_v19, %v752_v18  ;;  %v2632_v11 = vpack.c.bf16 %v85_v6, %v53_v5  ;;  %v52_v12 = vld [vmem:[#allocation2 + $0x60] sm:$0xff]  ;;  %v117_v19 = vld [vmem:[#allocation2 + $0x268] sm:$0xff] }
  0xc1   :  { %2593 = vmatprep.subr.bf16.mxu1 %v2592_v25  ;;  %v819_v25 = vld [vmem:[#allocation2 + $0x1858] sm:$0xff]  ;;  %v2614_v28 = vpack.c.bf16 %v786_v22, %v754_v20  ;;  %v86_v18 = vld [vmem:[#allocation2 + $0x170] sm:$0xff]  ;;  %v149_v20 = vld [vmem:[#allocation2 + $0x368] sm:$0xff] }
  0xc2   :  { %v151_v22 = vld [vmem:[#allocation2 + $0x378] sm:$0xff] }
  0xc3   :  { %2531 = vmatpush1.bf16.msra.mxu0 %v2530_v31  ;;  %v848_v31 = vld [vmem:[#allocation2 + $0x1940] sm:$0xff]  ;;  %v311_v58 = vld [vmem:[#allocation2 + $0x878] sm:$0xff] }
  0xc4   :  { %2595 = vmatpush1.bf16.msra.mxu1 %v2594_v32  ;;  %2533 = vmatprep.subr.bf16.mxu0 %v2532_v33  ;;  %v818_v32 = vld [vmem:[#allocation2 + $0x1850] sm:$0xff]  ;;  %v2616_v33 = vpack.c.bf16 %v851_v26, %v819_v25  ;;  %v2554_v39 = vpack.c.bf16 %v848_v31, %v816_v30  ;;  %v2636_v25 = vpack.c.bf16 %v149_v20, %v117_v19  ;;  %v116_v26 = vld [vmem:[#allocation2 + $0x260] sm:$0xff]  ;;  %v181_v31 = vld [vmem:[#allocation2 + $0x468] sm:$0xff] }
  0xc5   :  { %2597 = vmatprep.subr.bf16.mxu1 %v2596_v37  ;;  %v883_v37 = vld [vmem:[#allocation2 + $0x1a58] sm:$0xff]  ;;  %v2618_v40 = vpack.c.bf16 %v850_v34, %v818_v32  ;;  %v150_v30 = vld [vmem:[#allocation2 + $0x370] sm:$0xff]  ;;  %v213_v32 = vld [vmem:[#allocation2 + $0x568] sm:$0xff] }
  0xc6   :  { %v183_v34 = vld [vmem:[#allocation2 + $0x478] sm:$0xff] }
  0xc7   :  { %2535 = vmatpush1.bf16.msra.mxu0 %v2534_v43  ;;  %v912_v43 = vld [vmem:[#allocation2 + $0x1b40] sm:$0xff]  ;;  %v343_v16 = vld [vmem:[#allocation2 + $0x978] sm:$0xff] }
  0xc8   :  { %2599 = vmatpush1.bf16.msra.mxu1 %v2598_v44  ;;  %2537 = vmatprep.subr.bf16.mxu0 %v2536_v45  ;;  %v882_v44 = vld [vmem:[#allocation2 + $0x1a50] sm:$0xff]  ;;  %v2620_v45 = vpack.c.bf16 %v915_v38, %v883_v37  ;;  %v2558_v50 = vpack.c.bf16 %v912_v43, %v880_v42  ;;  %v2640_v38 = vpack.c.bf16 %v213_v32, %v181_v31  ;;  %v375_v5 = vld [vmem:[#allocation2 + $0xa78] sm:$0xff] }
  0xc9   :  { %2601 = vmatprep.subr.bf16.mxu1 %v2600_v48  ;;  %v947_v48 = vld [vmem:[#allocation2 + $0x1c58] sm:$0xff]  ;;  %v2622_v51 = vpack.c.bf16 %v914_v46, %v882_v44  ;;  %v2704_v42 = vpack.c.bf16 %v215_v35, %v183_v34  ;;  %v214_v43 = vld [vmem:[#allocation2 + $0x570] sm:$0xff]  ;;  %v245_v44 = vld [vmem:[#allocation2 + $0x668] sm:$0xff] }
  0xca   :  { %v3417_v46 = vld [vmem:[#allocation5 + $0x8] sm:$0xff]  ;;  %v407_v6 = vld [vmem:[#allocation2 + $0xb78] sm:$0xff] }
  0xcb   :  { %2539 = vmatpush1.bf16.msra.mxu0 %v2538_v54  ;;  %v976_v54 = vld [vmem:[#allocation2 + $0x1d40] sm:$0xff]  ;;  %v439_v19 = vld [vmem:[#allocation2 + $0xc78] sm:$0xff] }
  0xcc   :  { %2603 = vmatpush1.bf16.msra.mxu1 %v2602_v55  ;;  %2541 = vmatprep.subr.bf16.mxu0 %v2540_v56  ;;  %v946_v55 = vld [vmem:[#allocation2 + $0x1c50] sm:$0xff]  ;;  %v2624_v56 = vpack.c.bf16 %v979_v49, %v947_v48  ;;  %v2562_v61 = vpack.c.bf16 %v976_v54, %v944_v53  ;;  %v2708_v54 = vpack.c.bf16 %v279_v47, %v247_v15  ;;  %v471_v20 = vld [vmem:[#allocation2 + $0xd78] sm:$0xff] }
  0xcd   :  { %2605 = vmatprep.subr.bf16.mxu1 %v2604_v59  ;;  %v1011_v59 = vld [vmem:[#allocation2 + $0x1e58] sm:$0xff]  ;;  %v2626_v62 = vpack.c.bf16 %v978_v57, %v946_v55  ;;  %v246_v53 = vld [vmem:[#allocation2 + $0x670] sm:$0xff]  ;;  %v341_v57 = vld [vmem:[#allocation2 + $0x968] sm:$0xff] }
  0xce   :  { %v278_v55 = vld [vmem:[#allocation2 + $0x770] sm:$0xff]  ;;  %v503_v31 = vld [vmem:[#allocation2 + $0xe78] sm:$0xff] }
  0xcf   :  { %2543 = vmatpush1.bf16.msra.mxu0 %v2542_v1  ;;  %v1040_v1 = vld [vmem:[#allocation2 + $0x1f40] sm:$0xff]  ;;  %v535_v32 = vld [vmem:[#allocation2 + $0xf78] sm:$0xff] }
  0xd0   :  { %2607 = vmatpush1.bf16.msra.mxu1 %v2606_v2  ;;  %2545 = vmatprep.subr.bf16.mxu0 %v2544_v3  ;;  %v1010_v2 = vld [vmem:[#allocation2 + $0x1e50] sm:$0xff]  ;;  %v2628_v3 = vpack.c.bf16 %v1043_v60, %v1011_v59  ;;  %v2566_v9 = vpack.c.bf16 %v1040_v1, %v1008_v0  ;;  %v2710_v60 = vpack.c.bf16 %v278_v55, %v246_v53  ;;  %v661_v55 = vld [vmem:[#allocation2 + $0x1368] sm:$0xff] }
  0xd1   :  { %2609 = vmatprep.subr.bf16.mxu1 %v2608_v7  ;;  %v55_v7 = vld [vmem:[#allocation2 + $0x78] sm:$0xff]  ;;  %v2630_v10 = vpack.c.bf16 %v1042_v4, %v1010_v2  ;;  %v310_v0 = vld [vmem:[#allocation2 + $0x870] sm:$0xff]  ;;  %v2712_v1 = vpack.c.bf16 %v343_v16, %v311_v58  ;;  %v405_v4 = vld [vmem:[#allocation2 + $0xb68] sm:$0xff] }
  0xd2   :  { %v342_v2 = vld [vmem:[#allocation2 + $0x970] sm:$0xff] }
  0xd3   :  { %2547 = vmatpush1.bf16.msra.mxu0 %v2546_v13  ;;  %v84_v13 = vld [vmem:[#allocation2 + $0x160] sm:$0xff]  ;;  %v598_v53 = vld [vmem:[#allocation2 + $0x1170] sm:$0xff] }
  0xd4   :  { %2611 = vmatpush1.bf16.msra.mxu1 %v2610_v14  ;;  %2549 = vmatprep.subr.bf16.mxu0 %v2548_v17  ;;  %v54_v14 = vld [vmem:[#allocation2 + $0x70] sm:$0xff]  ;;  %v2696_v17 = vpack.c.bf16 %v87_v8, %v55_v7  ;;  %v2634_v23 = vpack.c.bf16 %v84_v13, %v52_v12  ;;  %v2714_v8 = vpack.c.bf16 %v342_v2, %v310_v0  ;;  %v725_v2 = vld [vmem:[#allocation2 + $0x1568] sm:$0xff] }
  0xd5   :  { %2613 = vmatprep.subr.bf16.mxu1 %v2612_v21  ;;  %v119_v21 = vld [vmem:[#allocation2 + $0x278] sm:$0xff]  ;;  %v2698_v24 = vpack.c.bf16 %v86_v18, %v54_v14  ;;  %v374_v12 = vld [vmem:[#allocation2 + $0xa70] sm:$0xff]  ;;  %v2716_v13 = vpack.c.bf16 %v407_v6, %v375_v5  ;;  %v469_v18 = vld [vmem:[#allocation2 + $0xd68] sm:$0xff] }
  0xd6   :  { %v406_v14 = vld [vmem:[#allocation2 + $0xb70] sm:$0xff] }
  0xd7   :  { %2551 = vmatpush1.bf16.msra.mxu0 %v2550_v27  ;;  %v148_v27 = vld [vmem:[#allocation2 + $0x360] sm:$0xff]  ;;  %v662_v0 = vld [vmem:[#allocation2 + $0x1370] sm:$0xff] }
  0xd8   :  { %2615 = vmatpush1.bf16.msra.mxu1 %v2614_v28  ;;  %2553 = vmatprep.subr.bf16.mxu0 %v2552_v29  ;;  %v118_v28 = vld [vmem:[#allocation2 + $0x270] sm:$0xff]  ;;  %v2700_v29 = vpack.c.bf16 %v151_v22, %v119_v21  ;;  %v2638_v36 = vpack.c.bf16 %v148_v27, %v116_v26  ;;  %v2718_v22 = vpack.c.bf16 %v406_v14, %v374_v12  ;;  %v789_v14 = vld [vmem:[#allocation2 + $0x1768] sm:$0xff] }
  0xd9   :  { %2617 = vmatprep.subr.bf16.mxu1 %v2616_v33  ;;  %v3413_v33 = vld [vmem:[#allocation5] sm:$0xff]  ;;  %v2702_v37 = vpack.c.bf16 %v150_v30, %v118_v28  ;;  %v438_v26 = vld [vmem:[#allocation2 + $0xc70] sm:$0xff]  ;;  %v2720_v27 = vpack.c.bf16 %v471_v20, %v439_v19  ;;  %v533_v30 = vld [vmem:[#allocation2 + $0xf68] sm:$0xff] }
  0xda   :  { %v470_v28 = vld [vmem:[#allocation2 + $0xd70] sm:$0xff] }
  0xdb   :  { %2555 = vmatpush1.bf16.msra.mxu0 %v2554_v39  ;;  %v180_v39 = vld [vmem:[#allocation2 + $0x460] sm:$0xff]  ;;  %v2722_v35 = vpack.c.bf16 %v470_v28, %v438_v26  ;;  %v726_v12 = vld [vmem:[#allocation2 + $0x1570] sm:$0xff]  ;;  %v853_v28 = vld [vmem:[#allocation2 + $0x1968] sm:$0xff] }
  0xdc   :  { %2619 = vmatpush1.bf16.msra.mxu1 %v2618_v40  ;;  %2557 = vmatprep.subr.bf16.mxu0 %v2556_v41  ;;  %v212_v40 = vld [vmem:[#allocation2 + $0x560] sm:$0xff]  ;;  %v182_v41 = vld [vmem:[#allocation2 + $0x470] sm:$0xff] }
  0xdd   :  { %2621 = vmatprep.subr.bf16.mxu1 %v2620_v45  ;;  %v277_v45 = vld [vmem:[#allocation2 + $0x768] sm:$0xff]  ;;  %v2642_v48 = vpack.c.bf16 %v212_v40, %v180_v39  ;;  %v2706_v49 = vpack.c.bf16 %v214_v43, %v182_v41  ;;  %v502_v39 = vld [vmem:[#allocation2 + $0xe70] sm:$0xff]  ;;  %v2724_v40 = vpack.c.bf16 %v535_v32, %v503_v31 }
  0xde   :  { %v534_v41 = vld [vmem:[#allocation2 + $0xf70] sm:$0xff]  ;;  %v597_v43 = vld [vmem:[#allocation2 + $0x1168] sm:$0xff] }
  0xdf   :  { %2559 = vmatpush1.bf16.msra.mxu0 %v2558_v50  ;;  %v2644_v50 = vpack.c.bf16 %v277_v45, %v245_v44  ;;  %v567_v44 = vld [vmem:[#allocation2 + $0x1078] sm:$0xff]  ;;  %v2726_v47 = vpack.c.bf16 %v534_v41, %v502_v39  ;;  %v790_v26 = vld [vmem:[#allocation2 + $0x1770] sm:$0xff]  ;;  %v917_v41 = vld [vmem:[#allocation2 + $0x1b68] sm:$0xff] }
  0xe0   :  { %2623 = vmatpush1.bf16.msra.mxu1 %v2622_v51  ;;  %2561 = vmatprep.subr.bf16.mxu0 %v2560_v52  ;;  %v244_v51 = vld [vmem:[#allocation2 + $0x660] sm:$0xff]  ;;  %v599_v45 = vld [vmem:[#allocation2 + $0x1178] sm:$0xff]  ;;  %v854_v39 = vld [vmem:[#allocation2 + $0x1970] sm:$0xff] }
  0xe1   :  { %2625 = vmatprep.subr.bf16.mxu1 %v2624_v56  ;;  %v276_v52 = vld [vmem:[#allocation2 + $0x760] sm:$0xff]  ;;  %v309_v56 = vld [vmem:[#allocation2 + $0x868] sm:$0xff] }
  0xe2   :  { %v2646_v59 = vpack.c.bf16 %v276_v52, %v244_v51  ;;  %v566_v51 = vld [vmem:[#allocation2 + $0x1070] sm:$0xff]  ;;  %v2728_v52 = vpack.c.bf16 %v599_v45, %v567_v44 }
  0xe3   :  { %2563 = vmatpush1.bf16.msra.mxu0 %v2562_v61  ;;  %v2648_v61 = vpack.c.bf16 %v341_v57, %v309_v56  ;;  %v631_v56 = vld [vmem:[#allocation2 + $0x1278] sm:$0xff]  ;;  %v2730_v16 = vpack.c.bf16 %v598_v53, %v566_v51  ;;  %v918_v51 = vld [vmem:[#allocation2 + $0x1b70] sm:$0xff]  ;;  %v981_v53 = vld [vmem:[#allocation2 + $0x1d68] sm:$0xff] }
  0xe4   :  { %2627 = vmatpush1.bf16.msra.mxu1 %v2626_v62  ;;  %2565 = vmatprep.subr.bf16.mxu0 %v2564_v63  ;;  %v308_v62 = vld [vmem:[#allocation2 + $0x860] sm:$0xff]  ;;  %v663_v57 = vld [vmem:[#allocation2 + $0x1378] sm:$0xff] }
  0xe5   :  { %2629 = vmatprep.subr.bf16.mxu1 %v2628_v3  ;;  %v340_v63 = vld [vmem:[#allocation2 + $0x960] sm:$0xff]  ;;  %v373_v3 = vld [vmem:[#allocation2 + $0xa68] sm:$0xff] }
  0xe6   :  { %v2650_v7 = vpack.c.bf16 %v340_v63, %v308_v62  ;;  %v630_v62 = vld [vmem:[#allocation2 + $0x1270] sm:$0xff]  ;;  %v2732_v63 = vpack.c.bf16 %v663_v57, %v631_v56 }
  0xe7   :  { %2567 = vmatpush1.bf16.msra.mxu0 %v2566_v9  ;;  %v2652_v9 = vpack.c.bf16 %v405_v4, %v373_v3  ;;  %v695_v3 = vld [vmem:[#allocation2 + $0x1478] sm:$0xff]  ;;  %v2734_v6 = vpack.c.bf16 %v662_v0, %v630_v62  ;;  %v982_v62 = vld [vmem:[#allocation2 + $0x1d70] sm:$0xff]  ;;  %v1045_v0 = vld [vmem:[#allocation2 + $0x1f68] sm:$0xff] }
  0xe8   :  { %2631 = vmatpush1.bf16.msra.mxu1 %v2630_v10  ;;  %2633 = vmatprep.subr.bf16.mxu0 %v2632_v11  ;;  %v372_v10 = vld [vmem:[#allocation2 + $0xa60] sm:$0xff]  ;;  %v727_v4 = vld [vmem:[#allocation2 + $0x1578] sm:$0xff] }
  0xe9   :  { %2697 = vmatprep.subr.bf16.mxu1 %v2696_v17  ;;  %v404_v11 = vld [vmem:[#allocation2 + $0xb60] sm:$0xff]  ;;  %v437_v17 = vld [vmem:[#allocation2 + $0xc68] sm:$0xff] }
  0xea   :  { %1413 = vmatmul.mubr.f32.vlgmr.msra.gmra.mrb[4].mxu0 %v3413_v33  ;;  %v2654_v21 = vpack.c.bf16 %v404_v11, %v372_v10  ;;  %v694_v10 = vld [vmem:[#allocation2 + $0x1470] sm:$0xff]  ;;  %v2736_v11 = vpack.c.bf16 %v727_v4, %v695_v3 }
  0xeb   :  { %1484 = vmatmul.mubr.f32.vlgmr.msra.gmra.mrb[4].mxu1 %v3413_v33  ;;  %2635 = vmatpush1.bf16.msra.mxu0 %v2634_v23  ;;  %v2656_v23 = vpack.c.bf16 %v469_v18, %v437_v17  ;;  %v759_v17 = vld [vmem:[#allocation2 + $0x1678] sm:$0xff]  ;;  %v2738_v20 = vpack.c.bf16 %v726_v12, %v694_v10  ;;  %v1046_v10 = vld [vmem:[#allocation2 + $0x1f70] sm:$0xff]  ;;  %v89_v12 = vld [vmem:[#allocation2 + $0x188] sm:$0xff] }
  0xec   :  { %2699 = vmatpush1.bf16.msra.mxu1 %v2698_v24  ;;  %2637 = vmatprep.subr.bf16.mxu0 %v2636_v25  ;;  %v436_v24 = vld [vmem:[#allocation2 + $0xc60] sm:$0xff]  ;;  %v791_v18 = vld [vmem:[#allocation2 + $0x1778] sm:$0xff] }
  0xed   :  { %2701 = vmatprep.subr.bf16.mxu1 %v2700_v29  ;;  %1554 = vmatprep.mubr.f32.mxu0 %v3417_v46  ;;  %v468_v25 = vld [vmem:[#allocation2 + $0xd60] sm:$0xff]  ;;  %v501_v29 = vld [vmem:[#allocation2 + $0xe68] sm:$0xff] }
  0xee   :  { %1625 = vmatprep.mubr.f32.mxu1 %v3417_v46  ;;  %v2658_v34 = vpack.c.bf16 %v468_v25, %v436_v24  ;;  %v758_v24 = vld [vmem:[#allocation2 + $0x1670] sm:$0xff]  ;;  %v2740_v25 = vpack.c.bf16 %v791_v18, %v759_v17 }
  0xef   :  { %2639 = vmatpush1.bf16.msra.mxu0 %v2638_v36  ;;  %v2660_v36 = vpack.c.bf16 %v533_v30, %v501_v29  ;;  %v823_v29 = vld [vmem:[#allocation2 + $0x1878] sm:$0xff]  ;;  %v2742_v32 = vpack.c.bf16 %v790_v26, %v758_v24  ;;  %v90_v24 = vld [vmem:[#allocation2 + $0x190] sm:$0xff]  ;;  %v153_v26 = vld [vmem:[#allocation2 + $0x388] sm:$0xff] }
  0xf0   :  { %2703 = vmatpush1.bf16.msra.mxu1 %v2702_v37  ;;  %2641 = vmatprep.subr.bf16.mxu0 %v2640_v38  ;;  %v500_v37 = vld [vmem:[#allocation2 + $0xe60] sm:$0xff]  ;;  %v855_v30 = vld [vmem:[#allocation2 + $0x1978] sm:$0xff] }
  0xf1   :  { %2705 = vmatprep.subr.bf16.mxu1 %v2704_v42  ;;  %v532_v38 = vld [vmem:[#allocation2 + $0xf60] sm:$0xff]  ;;  %v565_v42 = vld [vmem:[#allocation2 + $0x1068] sm:$0xff] }
  0xf2   :  { %v2662_v15 = vpack.c.bf16 %v532_v38, %v500_v37  ;;  %v822_v37 = vld [vmem:[#allocation2 + $0x1870] sm:$0xff]  ;;  %v2744_v38 = vpack.c.bf16 %v855_v30, %v823_v29 }
  0xf3   :  { %2643 = vmatpush1.bf16.msra.mxu0 %v2642_v48  ;;  %v2664_v48 = vpack.c.bf16 %v597_v43, %v565_v42  ;;  %v887_v42 = vld [vmem:[#allocation2 + $0x1a78] sm:$0xff]  ;;  %v2746_v45 = vpack.c.bf16 %v854_v39, %v822_v37  ;;  %v154_v37 = vld [vmem:[#allocation2 + $0x390] sm:$0xff]  ;;  %v217_v39 = vld [vmem:[#allocation2 + $0x588] sm:$0xff] }
  0xf4   :  { %2707 = vmatpush1.bf16.msra.mxu1 %v2706_v49  ;;  %2645 = vmatprep.subr.bf16.mxu0 %v2644_v50  ;;  %v564_v49 = vld [vmem:[#allocation2 + $0x1060] sm:$0xff]  ;;  %v919_v43 = vld [vmem:[#allocation2 + $0x1b78] sm:$0xff] }
  0xf5   :  { %2709 = vmatprep.subr.bf16.mxu1 %v2708_v54  ;;  %v596_v50 = vld [vmem:[#allocation2 + $0x1160] sm:$0xff]  ;;  %v629_v54 = vld [vmem:[#allocation2 + $0x1268] sm:$0xff] }
  0xf6   :  { %v2666_v58 = vpack.c.bf16 %v596_v50, %v564_v49  ;;  %v886_v49 = vld [vmem:[#allocation2 + $0x1a70] sm:$0xff]  ;;  %v2748_v50 = vpack.c.bf16 %v919_v43, %v887_v42 }
  0xf7   :  { %2647 = vmatpush1.bf16.msra.mxu0 %v2646_v59  ;;  %v2668_v59 = vpack.c.bf16 %v661_v55, %v629_v54  ;;  %v951_v54 = vld [vmem:[#allocation2 + $0x1c78] sm:$0xff]  ;;  %v2750_v57 = vpack.c.bf16 %v918_v51, %v886_v49  ;;  %v218_v49 = vld [vmem:[#allocation2 + $0x590] sm:$0xff]  ;;  %v281_v51 = vld [vmem:[#allocation2 + $0x788] sm:$0xff] }
  0xf8   :  { %2711 = vmatpush1.bf16.msra.mxu1 %v2710_v60  ;;  %2649 = vmatprep.subr.bf16.mxu0 %v2648_v61  ;;  %v628_v60 = vld [vmem:[#allocation2 + $0x1260] sm:$0xff]  ;;  %v983_v55 = vld [vmem:[#allocation2 + $0x1d78] sm:$0xff] }
  0xf9   :  { %2713 = vmatprep.subr.bf16.mxu1 %v2712_v1  ;;  %v660_v61 = vld [vmem:[#allocation2 + $0x1360] sm:$0xff]  ;;  %v693_v1 = vld [vmem:[#allocation2 + $0x1468] sm:$0xff] }
  0xfa   :  { %v2670_v5 = vpack.c.bf16 %v660_v61, %v628_v60  ;;  %v950_v60 = vld [vmem:[#allocation2 + $0x1c70] sm:$0xff]  ;;  %v2752_v61 = vpack.c.bf16 %v983_v55, %v951_v54 }
  0xfb   :  { %2651 = vmatpush1.bf16.msra.mxu0 %v2650_v7  ;;  %v2672_v7 = vpack.c.bf16 %v725_v2, %v693_v1  ;;  %v1015_v1 = vld [vmem:[#allocation2 + $0x1e78] sm:$0xff]  ;;  %v2754_v4 = vpack.c.bf16 %v982_v62, %v950_v60  ;;  %v313_v60 = vld [vmem:[#allocation2 + $0x888] sm:$0xff] }
  0xfc   :  { %2715 = vmatpush1.bf16.msra.mxu1 %v2714_v8  ;;  %2653 = vmatprep.subr.bf16.mxu0 %v2652_v9  ;;  %v692_v8 = vld [vmem:[#allocation2 + $0x1460] sm:$0xff]  ;;  %v1047_v2 = vld [vmem:[#allocation2 + $0x1f78] sm:$0xff] }
  0xfd   :  { %2717 = vmatprep.subr.bf16.mxu1 %v2716_v13  ;;  %v724_v9 = vld [vmem:[#allocation2 + $0x1560] sm:$0xff]  ;;  %v757_v13 = vld [vmem:[#allocation2 + $0x1668] sm:$0xff]  ;;  %v315_v62 = vld [vmem:[#allocation2 + $0x898] sm:$0xff] }
  0xfe   :  { %v2674_v19 = vpack.c.bf16 %v724_v9, %v692_v8  ;;  %v1014_v8 = vld [vmem:[#allocation2 + $0x1e70] sm:$0xff]  ;;  %v2756_v9 = vpack.c.bf16 %v1047_v2, %v1015_v1  ;;  %v312_v2 = vld [vmem:[#allocation2 + $0x880] sm:$0xff] }
  0xff   :  { %2655 = vmatpush1.bf16.msra.mxu0 %v2654_v21  ;;  %v2676_v21 = vpack.c.bf16 %v789_v14, %v757_v13  ;;  %v59_v13 = vld [vmem:[#allocation2 + $0x98] sm:$0xff]  ;;  %v2758_v18 = vpack.c.bf16 %v1046_v10, %v1014_v8  ;;  %v409_v8 = vld [vmem:[#allocation2 + $0xb88] sm:$0xff] }
 0x100   :  { %2719 = vmatpush1.bf16.msra.mxu1 %v2718_v22  ;;  %2657 = vmatprep.subr.bf16.mxu0 %v2656_v23  ;;  %v756_v22 = vld [vmem:[#allocation2 + $0x1660] sm:$0xff]  ;;  %v91_v14 = vld [vmem:[#allocation2 + $0x198] sm:$0xff] }
 0x101   :  { %2721 = vmatprep.subr.bf16.mxu1 %v2720_v27  ;;  %v788_v23 = vld [vmem:[#allocation2 + $0x1760] sm:$0xff]  ;;  %v821_v27 = vld [vmem:[#allocation2 + $0x1868] sm:$0xff]  ;;  %v411_v10 = vld [vmem:[#allocation2 + $0xb98] sm:$0xff] }
 0x102   :  { %v2678_v31 = vpack.c.bf16 %v788_v23, %v756_v22  ;;  %v58_v22 = vld [vmem:[#allocation2 + $0x90] sm:$0xff]  ;;  %v2824_v23 = vpack.c.bf16 %v91_v14, %v59_v13  ;;  %v376_v14 = vld [vmem:[#allocation2 + $0xa80] sm:$0xff] }
 0x103   :  { %2659 = vmatpush1.bf16.msra.mxu0 %v2658_v34  ;;  %v2680_v34 = vpack.c.bf16 %v853_v28, %v821_v27  ;;  %v123_v27 = vld [vmem:[#allocation2 + $0x298] sm:$0xff]  ;;  %v2826_v30 = vpack.c.bf16 %v90_v24, %v58_v22  ;;  %v473_v22 = vld [vmem:[#allocation2 + $0xd88] sm:$0xff] }
 0x104   :  { %2723 = vmatpush1.bf16.msra.mxu1 %v2722_v35  ;;  %2661 = vmatprep.subr.bf16.mxu0 %v2660_v36  ;;  %v820_v35 = vld [vmem:[#allocation2 + $0x1860] sm:$0xff]  ;;  %v155_v28 = vld [vmem:[#allocation2 + $0x398] sm:$0xff] }
 0x105   :  { %2725 = vmatprep.subr.bf16.mxu1 %v2724_v40  ;;  %v852_v36 = vld [vmem:[#allocation2 + $0x1960] sm:$0xff]  ;;  %v885_v40 = vld [vmem:[#allocation2 + $0x1a68] sm:$0xff]  ;;  %v475_v24 = vld [vmem:[#allocation2 + $0xd98] sm:$0xff] }
 0x106   :  { %v2682_v44 = vpack.c.bf16 %v852_v36, %v820_v35  ;;  %v122_v35 = vld [vmem:[#allocation2 + $0x290] sm:$0xff]  ;;  %v2828_v36 = vpack.c.bf16 %v155_v28, %v123_v27  ;;  %v440_v28 = vld [vmem:[#allocation2 + $0xc80] sm:$0xff] }
 0x107   :  { %2663 = vmatpush1.bf16.msra.mxu0 %v2662_v15  ;;  %v2684_v15 = vpack.c.bf16 %v917_v41, %v885_v40  ;;  %v187_v40 = vld [vmem:[#allocation2 + $0x498] sm:$0xff]  ;;  %v2830_v43 = vpack.c.bf16 %v154_v37, %v122_v35  ;;  %v505_v35 = vld [vmem:[#allocation2 + $0xe88] sm:$0xff] }
 0x108   :  { %2727 = vmatpush1.bf16.msra.mxu1 %v2726_v47  ;;  %2665 = vmatprep.subr.bf16.mxu0 %v2664_v48  ;;  %v884_v47 = vld [vmem:[#allocation2 + $0x1a60] sm:$0xff]  ;;  %v219_v41 = vld [vmem:[#allocation2 + $0x598] sm:$0xff] }
 0x109   :  { %2729 = vmatprep.subr.bf16.mxu1 %v2728_v52  ;;  %v916_v48 = vld [vmem:[#allocation2 + $0x1b60] sm:$0xff]  ;;  %v949_v52 = vld [vmem:[#allocation2 + $0x1c68] sm:$0xff] }
 0x10a   :  { %v2686_v56 = vpack.c.bf16 %v916_v48, %v884_v47  ;;  %v186_v47 = vld [vmem:[#allocation2 + $0x490] sm:$0xff]  ;;  %v2832_v48 = vpack.c.bf16 %v219_v41, %v187_v40  ;;  %v539_v40 = vld [vmem:[#allocation2 + $0xf98] sm:$0xff] }
 0x10b   :  { %2667 = vmatpush1.bf16.msra.mxu0 %v2666_v58  ;;  %v2688_v58 = vpack.c.bf16 %v981_v53, %v949_v52  ;;  %v251_v52 = vld [vmem:[#allocation2 + $0x698] sm:$0xff]  ;;  %v2834_v54 = vpack.c.bf16 %v218_v49, %v186_v47  ;;  %v506_v47 = vld [vmem:[#allocation2 + $0xe90] sm:$0xff] }
 0x10c   :  { %2731 = vmatpush1.bf16.msra.mxu1 %v2730_v16  ;;  %2669 = vmatprep.subr.bf16.mxu0 %v2668_v59  ;;  %v948_v16 = vld [vmem:[#allocation2 + $0x1c60] sm:$0xff]  ;;  %v283_v53 = vld [vmem:[#allocation2 + $0x798] sm:$0xff]  ;;  %v538_v49 = vld [vmem:[#allocation2 + $0xf90] sm:$0xff] }
 0x10d   :  { %2733 = vmatprep.subr.bf16.mxu1 %v2732_v63  ;;  %v980_v59 = vld [vmem:[#allocation2 + $0x1d60] sm:$0xff]  ;;  %v1013_v63 = vld [vmem:[#allocation2 + $0x1e68] sm:$0xff] }
 0x10e   :  { %v2690_v3 = vpack.c.bf16 %v980_v59, %v948_v16  ;;  %v2836_v16 = vpack.c.bf16 %v283_v53, %v251_v52  ;;  %v282_v59 = vld [vmem:[#allocation2 + $0x790] sm:$0xff]  ;;  %v571_v52 = vld [vmem:[#allocation2 + $0x1098] sm:$0xff] }
 0x10f   :  { %2671 = vmatpush1.bf16.msra.mxu0 %v2670_v5  ;;  %v2692_v5 = vpack.c.bf16 %v1045_v0, %v1013_v63  ;;  %v347_v63 = vld [vmem:[#allocation2 + $0x998] sm:$0xff] }
 0x110   :  { %2735 = vmatpush1.bf16.msra.mxu1 %v2734_v6  ;;  %2673 = vmatprep.subr.bf16.mxu0 %v2672_v7  ;;  %v1012_v6 = vld [vmem:[#allocation2 + $0x1e60] sm:$0xff]  ;;  %v603_v53 = vld [vmem:[#allocation2 + $0x1198] sm:$0xff] }
 0x111   :  { %2737 = vmatprep.subr.bf16.mxu1 %v2736_v11  ;;  %v1044_v7 = vld [vmem:[#allocation2 + $0x1f60] sm:$0xff]  ;;  %v57_v11 = vld [vmem:[#allocation2 + $0x88] sm:$0xff] }
 0x112   :  { %v2694_v17 = vpack.c.bf16 %v1044_v7, %v1012_v6  ;;  %v346_v6 = vld [vmem:[#allocation2 + $0x990] sm:$0xff]  ;;  %v377_v7 = vld [vmem:[#allocation2 + $0xa88] sm:$0xff] }
 0x113   :  { %2675 = vmatpush1.bf16.msra.mxu0 %v2674_v19  ;;  %v2760_v19 = vpack.c.bf16 %v89_v12, %v57_v11  ;;  %v2780_v13 = vpack.c.bf16 %v409_v8, %v377_v7  ;;  %v697_v7 = vld [vmem:[#allocation2 + $0x1488] sm:$0xff] }
 0x114   :  { %2739 = vmatpush1.bf16.msra.mxu1 %v2738_v20  ;;  %2677 = vmatprep.subr.bf16.mxu0 %v2676_v21  ;;  %v56_v20 = vld [vmem:[#allocation2 + $0x80] sm:$0xff]  ;;  %v729_v8 = vld [vmem:[#allocation2 + $0x1588] sm:$0xff] }
 0x115   :  { %2741 = vmatprep.subr.bf16.mxu1 %v2740_v25  ;;  %v88_v21 = vld [vmem:[#allocation2 + $0x180] sm:$0xff]  ;;  %v121_v25 = vld [vmem:[#allocation2 + $0x288] sm:$0xff] }
 0x116   :  { %v2762_v29 = vpack.c.bf16 %v88_v21, %v56_v20  ;;  %v410_v20 = vld [vmem:[#allocation2 + $0xb90] sm:$0xff]  ;;  %v441_v21 = vld [vmem:[#allocation2 + $0xc88] sm:$0xff] }
 0x117   :  { %2679 = vmatpush1.bf16.msra.mxu0 %v2678_v31  ;;  %v2764_v31 = vpack.c.bf16 %v153_v26, %v121_v25  ;;  %v2784_v27 = vpack.c.bf16 %v473_v22, %v441_v21  ;;  %v761_v21 = vld [vmem:[#allocation2 + $0x1688] sm:$0xff] }
 0x118   :  { %2743 = vmatpush1.bf16.msra.mxu1 %v2742_v32  ;;  %2681 = vmatprep.subr.bf16.mxu0 %v2680_v34  ;;  %v120_v32 = vld [vmem:[#allocation2 + $0x280] sm:$0xff]  ;;  %v793_v22 = vld [vmem:[#allocation2 + $0x1788] sm:$0xff] }
 0x119   :  { %2745 = vmatprep.subr.bf16.mxu1 %v2744_v38  ;;  %v152_v34 = vld [vmem:[#allocation2 + $0x380] sm:$0xff]  ;;  %v185_v38 = vld [vmem:[#allocation2 + $0x488] sm:$0xff] }
 0x11a   :  { %v2766_v42 = vpack.c.bf16 %v152_v34, %v120_v32  ;;  %v474_v34 = vld [vmem:[#allocation2 + $0xd90] sm:$0xff] }
 0x11b   :  { %2683 = vmatpush1.bf16.msra.mxu0 %v2682_v44  ;;  %v2768_v44 = vpack.c.bf16 %v217_v39, %v185_v38  ;;  %v507_v39 = vld [vmem:[#allocation2 + $0xe98] sm:$0xff] }
 0x11c   :  { %2747 = vmatpush1.bf16.msra.mxu1 %v2746_v45  ;;  %2685 = vmatprep.subr.bf16.mxu0 %v2684_v15  ;;  %v184_v45 = vld [vmem:[#allocation2 + $0x480] sm:$0xff] }
 0x11d   :  { %2749 = vmatprep.subr.bf16.mxu1 %v2748_v50  ;;  %v216_v15 = vld [vmem:[#allocation2 + $0x580] sm:$0xff]  ;;  %v249_v50 = vld [vmem:[#allocation2 + $0x688] sm:$0xff] }
 0x11e   :  { %v2772_v55 = vpack.c.bf16 %v281_v51, %v249_v50  ;;  %v569_v50 = vld [vmem:[#allocation2 + $0x1088] sm:$0xff] }
 0x11f   :  { %2687 = vmatpush1.bf16.msra.mxu0 %v2686_v56  ;;  %v248_v56 = vld [vmem:[#allocation2 + $0x680] sm:$0xff]  ;;  %v601_v51 = vld [vmem:[#allocation2 + $0x1188] sm:$0xff] }
 0x120   :  { %2751 = vmatpush1.bf16.msra.mxu1 %v2750_v57  ;;  %2689 = vmatprep.subr.bf16.mxu0 %v2688_v58  ;;  %v280_v57 = vld [vmem:[#allocation2 + $0x780] sm:$0xff]  ;;  %v250_v58 = vld [vmem:[#allocation2 + $0x690] sm:$0xff] }
 0x121   :  { %2753 = vmatprep.subr.bf16.mxu1 %v2752_v61  ;;  %v345_v61 = vld [vmem:[#allocation2 + $0x988] sm:$0xff]  ;;  %v2774_v0 = vpack.c.bf16 %v280_v57, %v248_v56  ;;  %v568_v56 = vld [vmem:[#allocation2 + $0x1080] sm:$0xff] }
 0x122   :  { %v2776_v1 = vpack.c.bf16 %v345_v61, %v313_v60  ;;  %v600_v57 = vld [vmem:[#allocation2 + $0x1180] sm:$0xff]  ;;  %v633_v60 = vld [vmem:[#allocation2 + $0x1288] sm:$0xff] }
 0x123   :  { %2691 = vmatpush1.bf16.msra.mxu0 %v2690_v3  ;;  %v344_v3 = vld [vmem:[#allocation2 + $0x980] sm:$0xff]  ;;  %v665_v61 = vld [vmem:[#allocation2 + $0x1388] sm:$0xff] }
 0x124   :  { %2755 = vmatpush1.bf16.msra.mxu1 %v2754_v4  ;;  %2693 = vmatprep.subr.bf16.mxu0 %v2692_v5  ;;  %v314_v4 = vld [vmem:[#allocation2 + $0x890] sm:$0xff]  ;;  %v2840_v5 = vpack.c.bf16 %v347_v63, %v315_v62  ;;  %v2778_v11 = vpack.c.bf16 %v344_v3, %v312_v2  ;;  %v635_v62 = vld [vmem:[#allocation2 + $0x1298] sm:$0xff]  ;;  %v632_v2 = vld [vmem:[#allocation2 + $0x1280] sm:$0xff] }
 0x125   :  { %2757 = vmatprep.subr.bf16.mxu1 %v2756_v9  ;;  %v379_v9 = vld [vmem:[#allocation2 + $0xa98] sm:$0xff]  ;;  %v2842_v12 = vpack.c.bf16 %v346_v6, %v314_v4  ;;  %v664_v3 = vld [vmem:[#allocation2 + $0x1380] sm:$0xff]  ;;  %v634_v4 = vld [vmem:[#allocation2 + $0x1290] sm:$0xff] }
 0x126   :  { %v667_v63 = vld [vmem:[#allocation2 + $0x1398] sm:$0xff]  ;;  %v666_v6 = vld [vmem:[#allocation2 + $0x1390] sm:$0xff] }
 0x127   :  { %2695 = vmatpush1.bf16.msra.mxu0 %v2694_v17  ;;  %v408_v17 = vld [vmem:[#allocation2 + $0xb80] sm:$0xff] }
 0x128   :  { %2759 = vmatpush1.bf16.msra.mxu1 %v2758_v18  ;;  %2761 = vmatprep.subr.bf16.mxu0 %v2760_v19  ;;  %v378_v18 = vld [vmem:[#allocation2 + $0xa90] sm:$0xff]  ;;  %v2844_v19 = vpack.c.bf16 %v411_v10, %v379_v9  ;;  %v2782_v25 = vpack.c.bf16 %v408_v17, %v376_v14  ;;  %v699_v9 = vld [vmem:[#allocation2 + $0x1498] sm:$0xff]  ;;  %v696_v14 = vld [vmem:[#allocation2 + $0x1480] sm:$0xff] }
 0x129   :  { %2825 = vmatprep.subr.bf16.mxu1 %v2824_v23  ;;  %v443_v23 = vld [vmem:[#allocation2 + $0xc98] sm:$0xff]  ;;  %v2846_v26 = vpack.c.bf16 %v410_v20, %v378_v18  ;;  %v728_v17 = vld [vmem:[#allocation2 + $0x1580] sm:$0xff]  ;;  %v698_v18 = vld [vmem:[#allocation2 + $0x1490] sm:$0xff] }
 0x12a   :  { %1555 = vmatmul.mubr.f32.vlgmr.msra.gmra.mrb[6].mxu0 %v3413_v33  ;;  %v2848_v32 = vpack.c.bf16 %v475_v24, %v443_v23  ;;  %v731_v10 = vld [vmem:[#allocation2 + $0x1598] sm:$0xff]  ;;  %v730_v20 = vld [vmem:[#allocation2 + $0x1590] sm:$0xff] }
 0x12b   :  { %1626 = vmatmul.mubr.f32.vlgmr.msra.gmra.mrb[6].mxu1 %v3413_v33  ;;  %2763 = vmatpush1.bf16.msra.mxu0 %v2762_v29  ;;  %v2770_v33 = vpack.c.bf16 %v216_v15, %v184_v45  ;;  %v472_v29 = vld [vmem:[#allocation2 + $0xd80] sm:$0xff]  ;;  %v763_v23 = vld [vmem:[#allocation2 + $0x1698] sm:$0xff] }
 0x12c   :  { %2827 = vmatpush1.bf16.msra.mxu1 %v2826_v30  ;;  %2765 = vmatprep.subr.bf16.mxu0 %v2764_v31  ;;  %v442_v30 = vld [vmem:[#allocation2 + $0xc90] sm:$0xff]  ;;  %v504_v45 = vld [vmem:[#allocation2 + $0xe80] sm:$0xff]  ;;  %v795_v24 = vld [vmem:[#allocation2 + $0x1798] sm:$0xff] }
 0x12d   :  { %2829 = vmatprep.subr.bf16.mxu1 %v2828_v36  ;;  %1696 = vmatprep.mubr.f32.mxu0 %v3417_v46  ;;  %v537_v36 = vld [vmem:[#allocation2 + $0xf88] sm:$0xff]  ;;  %v536_v15 = vld [vmem:[#allocation2 + $0xf80] sm:$0xff] }
 0x12e   :  { %1767 = vmatprep.mubr.f32.mxu1 %v3417_v46  ;;  %v2838_v46 = vpack.c.bf16 %v282_v59, %v250_v58  ;;  %v570_v58 = vld [vmem:[#allocation2 + $0x1090] sm:$0xff] }
 0x12f   :  { %2767 = vmatpush1.bf16.msra.mxu0 %v2766_v42  ;;  %v2786_v42 = vpack.c.bf16 %v472_v29, %v440_v28  ;;  %v602_v59 = vld [vmem:[#allocation2 + $0x1190] sm:$0xff]  ;;  %v760_v28 = vld [vmem:[#allocation2 + $0x1680] sm:$0xff] }
 0x130   :  { %2831 = vmatpush1.bf16.msra.mxu1 %v2830_v43  ;;  %2769 = vmatprep.subr.bf16.mxu0 %v2768_v44  ;;  %v2850_v43 = vpack.c.bf16 %v474_v34, %v442_v30  ;;  %v2788_v44 = vpack.c.bf16 %v537_v36, %v505_v35  ;;  %v792_v29 = vld [vmem:[#allocation2 + $0x1780] sm:$0xff]  ;;  %v762_v30 = vld [vmem:[#allocation2 + $0x1690] sm:$0xff]  ;;  %v825_v34 = vld [vmem:[#allocation2 + $0x1888] sm:$0xff] }
 0x131   :  { %2833 = vmatprep.subr.bf16.mxu1 %v2832_v48  ;;  %v2852_v48 = vpack.c.bf16 %v539_v40, %v507_v39  ;;  %v857_v35 = vld [vmem:[#allocation2 + $0x1988] sm:$0xff]  ;;  %v827_v36 = vld [vmem:[#allocation2 + $0x1898] sm:$0xff] }
 0x132   :  { %v2808_v40 = vpack.c.bf16 %v857_v35, %v825_v34 }
 0x133   :  { %2771 = vmatpush1.bf16.msra.mxu0 %v2770_v33  ;;  %v2790_v33 = vpack.c.bf16 %v536_v15, %v504_v45  ;;  %v858_v45 = vld [vmem:[#allocation2 + $0x1990] sm:$0xff]  ;;  %v889_v15 = vld [vmem:[#allocation2 + $0x1a88] sm:$0xff] }
 0x134   :  { %2835 = vmatpush1.bf16.msra.mxu1 %v2834_v54  ;;  %2773 = vmatprep.subr.bf16.mxu0 %v2772_v55  ;;  %v2854_v54 = vpack.c.bf16 %v538_v49, %v506_v47  ;;  %v2792_v55 = vpack.c.bf16 %v601_v51, %v569_v50  ;;  %v921_v47 = vld [vmem:[#allocation2 + $0x1b88] sm:$0xff]  ;;  %v923_v49 = vld [vmem:[#allocation2 + $0x1b98] sm:$0xff] }
 0x135   :  { %2837 = vmatprep.subr.bf16.mxu1 %v2836_v16  ;;  %v2856_v16 = vpack.c.bf16 %v603_v53, %v571_v52  ;;  %v2812_v52 = vpack.c.bf16 %v921_v47, %v889_v15  ;;  %v888_v53 = vld [vmem:[#allocation2 + $0x1a80] sm:$0xff]  ;;  %v223_v15 = vld [vmem:[#allocation2 + $0x5b8] sm:$0xff] }
 0x137   :  { %2775 = vmatpush1.bf16.msra.mxu0 %v2774_v0  ;;  %v2794_v0 = vpack.c.bf16 %v600_v57, %v568_v56  ;;  %v922_v56 = vld [vmem:[#allocation2 + $0x1b90] sm:$0xff]  ;;  %v953_v57 = vld [vmem:[#allocation2 + $0x1c88] sm:$0xff] }
 0x138   :  { %2839 = vmatpush1.bf16.msra.mxu1 %v2838_v46  ;;  %2777 = vmatprep.subr.bf16.mxu0 %v2776_v1  ;;  %v2858_v46 = vpack.c.bf16 %v602_v59, %v570_v58  ;;  %v2796_v1 = vpack.c.bf16 %v665_v61, %v633_v60  ;;  %v985_v58 = vld [vmem:[#allocation2 + $0x1d88] sm:$0xff]  ;;  %v987_v59 = vld [vmem:[#allocation2 + $0x1d98] sm:$0xff] }
 0x139   :  { %2841 = vmatprep.subr.bf16.mxu1 %v2840_v5  ;;  %v2860_v5 = vpack.c.bf16 %v667_v63, %v635_v62  ;;  %v2816_v62 = vpack.c.bf16 %v985_v58, %v953_v57  ;;  %v952_v63 = vld [vmem:[#allocation2 + $0x1c80] sm:$0xff]  ;;  %v255_v57 = vld [vmem:[#allocation2 + $0x6b8] sm:$0xff] }
 0x13a   :  { %v287_v58 = vld [vmem:[#allocation2 + $0x7b8] sm:$0xff] }
 0x13b   :  { %2779 = vmatpush1.bf16.msra.mxu0 %v2778_v11  ;;  %v2798_v11 = vpack.c.bf16 %v664_v3, %v632_v2  ;;  %v986_v2 = vld [vmem:[#allocation2 + $0x1d90] sm:$0xff]  ;;  %v1017_v3 = vld [vmem:[#allocation2 + $0x1e88] sm:$0xff] }
 0x13c   :  { %2843 = vmatpush1.bf16.msra.mxu1 %v2842_v12  ;;  %2781 = vmatprep.subr.bf16.mxu0 %v2780_v13  ;;  %v2862_v12 = vpack.c.bf16 %v666_v6, %v634_v4  ;;  %v2800_v13 = vpack.c.bf16 %v729_v8, %v697_v7  ;;  %v1049_v4 = vld [vmem:[#allocation2 + $0x1f88] sm:$0xff]  ;;  %v1051_v6 = vld [vmem:[#allocation2 + $0x1f98] sm:$0xff] }
 0x13d   :  { %v1130_v31 = vpop.f32.mrb[0].mxu0  ;;  %2845 = vmatprep.subr.bf16.mxu1 %v2844_v19  ;;  %v2864_v19 = vpack.c.bf16 %v731_v10, %v699_v9  ;;  %v2820_v9 = vpack.c.bf16 %v1049_v4, %v1017_v3  ;;  %v1016_v10 = vld [vmem:[#allocation2 + $0x1e80] sm:$0xff]  ;;  %v319_v3 = vld [vmem:[#allocation2 + $0x8b8] sm:$0xff] }
 0x13e   :  { %2200 = vst [vmem:[#allocation7] sm:$0xff] %v1130_v31  ;;  %v1201_v37 = vpop.f32.mrb[0].mxu1  ;;  %v1132_v38 = vpop.f32.mrb[1].mxu0  ;;  %v2868_v31 = vpack.c.bf16 %v795_v24, %v763_v23  ;;  %v60_v24 = vld [vmem:[#allocation2 + $0xa0] sm:$0xff]  ;;  %v351_v4 = vld [vmem:[#allocation2 + $0x9b8] sm:$0xff] }
 0x13f   :  { %2202 = vst [vmem:[#allocation7 + $0x10] sm:$0xff] %v1201_v37  ;;  %2201 = vst [vmem:[#allocation7 + $0x8] sm:$0xff] %v1132_v38  ;;  %v1203_v41 = vpop.f32.mrb[1].mxu1  ;;  %2783 = vmatpush1.bf16.msra.mxu0 %v2782_v25  ;;  %v2802_v25 = vpack.c.bf16 %v728_v17, %v696_v14  ;;  %v859_v37 = vld [vmem:[#allocation2 + $0x1998] sm:$0xff]  ;;  %v2806_v38 = vpack.c.bf16 %v792_v29, %v760_v28  ;;  %v1050_v14 = vld [vmem:[#allocation2 + $0x1f90] sm:$0xff] }
 0x140   :  { %2203 = vst [vmem:[#allocation7 + $0x18] sm:$0xff] %v1203_v41  ;;  %2847 = vmatpush1.bf16.msra.mxu1 %v2846_v26  ;;  %2785 = vmatprep.subr.bf16.mxu0 %v2784_v27  ;;  %v2866_v26 = vpack.c.bf16 %v730_v20, %v698_v18  ;;  %v2804_v27 = vpack.c.bf16 %v793_v22, %v761_v21  ;;  %v824_v41 = vld [vmem:[#allocation2 + $0x1880] sm:$0xff]  ;;  %v61_v17 = vld [vmem:[#allocation2 + $0xa8] sm:$0xff]  ;;  %v95_v20 = vld [vmem:[#allocation2 + $0x1b8] sm:$0xff] }
 0x141   :  { %2849 = vmatprep.subr.bf16.mxu1 %v2848_v32  ;;  %v794_v32 = vld [vmem:[#allocation2 + $0x1790] sm:$0xff]  ;;  %v93_v18 = vld [vmem:[#allocation2 + $0x1a8] sm:$0xff] }
 0x142   :  { %v2870_v39 = vpack.c.bf16 %v794_v32, %v762_v30  ;;  %v2888_v23 = vpack.c.bf16 %v93_v18, %v61_v17  ;;  %v94_v28 = vld [vmem:[#allocation2 + $0x1b0] sm:$0xff]  ;;  %v125_v29 = vld [vmem:[#allocation2 + $0x2a8] sm:$0xff]  ;;  %v159_v32 = vld [vmem:[#allocation2 + $0x3b8] sm:$0xff] }
 0x143   :  { %2787 = vmatpush1.bf16.msra.mxu0 %v2786_v42  ;;  %v856_v42 = vld [vmem:[#allocation2 + $0x1980] sm:$0xff]  ;;  %v157_v30 = vld [vmem:[#allocation2 + $0x3a8] sm:$0xff]  ;;  %v383_v17 = vld [vmem:[#allocation2 + $0xab8] sm:$0xff] }
 0x144   :  { %2851 = vmatpush1.bf16.msra.mxu1 %v2850_v43  ;;  %2789 = vmatprep.subr.bf16.mxu0 %v2788_v44  ;;  %v826_v43 = vld [vmem:[#allocation2 + $0x1890] sm:$0xff]  ;;  %v2872_v44 = vpack.c.bf16 %v859_v37, %v827_v36  ;;  %v2810_v50 = vpack.c.bf16 %v856_v42, %v824_v41  ;;  %v2892_v36 = vpack.c.bf16 %v157_v30, %v125_v29  ;;  %v124_v37 = vld [vmem:[#allocation2 + $0x2a0] sm:$0xff]  ;;  %v189_v42 = vld [vmem:[#allocation2 + $0x4a8] sm:$0xff] }
 0x145   :  { %2853 = vmatprep.subr.bf16.mxu1 %v2852_v48  ;;  %v891_v48 = vld [vmem:[#allocation2 + $0x1a98] sm:$0xff]  ;;  %v2874_v51 = vpack.c.bf16 %v858_v45, %v826_v43  ;;  %v158_v41 = vld [vmem:[#allocation2 + $0x3b0] sm:$0xff]  ;;  %v221_v43 = vld [vmem:[#allocation2 + $0x5a8] sm:$0xff] }
 0x146   :  { %v191_v45 = vld [vmem:[#allocation2 + $0x4b8] sm:$0xff] }
 0x147   :  { %2791 = vmatpush1.bf16.msra.mxu0 %v2790_v33  ;;  %v920_v33 = vld [vmem:[#allocation2 + $0x1b80] sm:$0xff]  ;;  %v415_v18 = vld [vmem:[#allocation2 + $0xbb8] sm:$0xff] }
 0x148   :  { %2855 = vmatpush1.bf16.msra.mxu1 %v2854_v54  ;;  %2793 = vmatprep.subr.bf16.mxu0 %v2792_v55  ;;  %v890_v54 = vld [vmem:[#allocation2 + $0x1a90] sm:$0xff]  ;;  %v2876_v55 = vpack.c.bf16 %v923_v49, %v891_v48  ;;  %v2814_v60 = vpack.c.bf16 %v920_v33, %v888_v53  ;;  %v2896_v49 = vpack.c.bf16 %v221_v43, %v189_v42  ;;  %v447_v29 = vld [vmem:[#allocation2 + $0xcb8] sm:$0xff]  ;;  %v541_v42 = vld [vmem:[#allocation2 + $0xfa8] sm:$0xff] }
 0x149   :  { %2857 = vmatprep.subr.bf16.mxu1 %v2856_v16  ;;  %v955_v16 = vld [vmem:[#allocation2 + $0x1c98] sm:$0xff]  ;;  %v2878_v61 = vpack.c.bf16 %v922_v56, %v890_v54  ;;  %v2960_v53 = vpack.c.bf16 %v223_v15, %v191_v45  ;;  %v222_v33 = vld [vmem:[#allocation2 + $0x5b0] sm:$0xff]  ;;  %v253_v54 = vld [vmem:[#allocation2 + $0x6a8] sm:$0xff] }
 0x14a   :  { %v3429_v56 = vld [vmem:[#allocation5 + $0x8] sm:$0xff]  ;;  %v479_v30 = vld [vmem:[#allocation2 + $0xdb8] sm:$0xff] }
 0x14b   :  { %2795 = vmatpush1.bf16.msra.mxu0 %v2794_v0  ;;  %v984_v0 = vld [vmem:[#allocation2 + $0x1d80] sm:$0xff]  ;;  %v511_v15 = vld [vmem:[#allocation2 + $0xeb8] sm:$0xff] }
 0x14c   :  { %2859 = vmatpush1.bf16.msra.mxu1 %v2858_v46  ;;  %2797 = vmatprep.subr.bf16.mxu0 %v2796_v1  ;;  %v954_v46 = vld [vmem:[#allocation2 + $0x1c90] sm:$0xff]  ;;  %v2880_v1 = vpack.c.bf16 %v987_v59, %v955_v16  ;;  %v2818_v7 = vpack.c.bf16 %v984_v0, %v952_v63  ;;  %v2964_v0 = vpack.c.bf16 %v287_v58, %v255_v57  ;;  %v573_v57 = vld [vmem:[#allocation2 + $0x10a8] sm:$0xff] }
 0x14d   :  { %2861 = vmatprep.subr.bf16.mxu1 %v2860_v5  ;;  %v1019_v5 = vld [vmem:[#allocation2 + $0x1e98] sm:$0xff]  ;;  %v2882_v8 = vpack.c.bf16 %v986_v2, %v954_v46  ;;  %v254_v63 = vld [vmem:[#allocation2 + $0x6b0] sm:$0xff]  ;;  %v349_v2 = vld [vmem:[#allocation2 + $0x9a8] sm:$0xff] }
 0x14e   :  { %v286_v46 = vld [vmem:[#allocation2 + $0x7b0] sm:$0xff]  ;;  %v605_v58 = vld [vmem:[#allocation2 + $0x11a8] sm:$0xff] }
 0x14f   :  { %2799 = vmatpush1.bf16.msra.mxu0 %v2798_v11  ;;  %v1048_v11 = vld [vmem:[#allocation2 + $0x1f80] sm:$0xff] }
 0x150   :  { %2863 = vmatpush1.bf16.msra.mxu1 %v2862_v12  ;;  %2801 = vmatprep.subr.bf16.mxu0 %v2800_v13  ;;  %v1018_v12 = vld [vmem:[#allocation2 + $0x1e90] sm:$0xff]  ;;  %v2884_v13 = vpack.c.bf16 %v1051_v6, %v1019_v5  ;;  %v2822_v21 = vpack.c.bf16 %v1048_v11, %v1016_v10  ;;  %v2966_v6 = vpack.c.bf16 %v286_v46, %v254_v63  ;;  %v572_v63 = vld [vmem:[#allocation2 + $0x10a0] sm:$0xff] }
 0x151   :  { %2865 = vmatprep.subr.bf16.mxu1 %v2864_v19  ;;  %v63_v19 = vld [vmem:[#allocation2 + $0xb8] sm:$0xff]  ;;  %v2886_v22 = vpack.c.bf16 %v1050_v14, %v1018_v12  ;;  %v318_v10 = vld [vmem:[#allocation2 + $0x8b0] sm:$0xff]  ;;  %v2968_v11 = vpack.c.bf16 %v351_v4, %v319_v3  ;;  %v413_v14 = vld [vmem:[#allocation2 + $0xba8] sm:$0xff] }
 0x152   :  { %v350_v12 = vld [vmem:[#allocation2 + $0x9b0] sm:$0xff]  ;;  %v637_v3 = vld [vmem:[#allocation2 + $0x12a8] sm:$0xff] }
 0x153   :  { %2803 = vmatpush1.bf16.msra.mxu0 %v2802_v25  ;;  %v92_v25 = vld [vmem:[#allocation2 + $0x1a0] sm:$0xff]  ;;  %v574_v46 = vld [vmem:[#allocation2 + $0x10b0] sm:$0xff]  ;;  %v669_v4 = vld [vmem:[#allocation2 + $0x13a8] sm:$0xff] }
 0x154   :  { %2867 = vmatpush1.bf16.msra.mxu1 %v2866_v26  ;;  %2805 = vmatprep.subr.bf16.mxu0 %v2804_v27  ;;  %v62_v26 = vld [vmem:[#allocation2 + $0xb0] sm:$0xff]  ;;  %v2952_v27 = vpack.c.bf16 %v95_v20, %v63_v19  ;;  %v2890_v34 = vpack.c.bf16 %v92_v25, %v60_v24  ;;  %v2970_v20 = vpack.c.bf16 %v350_v12, %v318_v10  ;;  %v636_v10 = vld [vmem:[#allocation2 + $0x12a0] sm:$0xff] }
 0x155   :  { %2869 = vmatprep.subr.bf16.mxu1 %v2868_v31  ;;  %v127_v31 = vld [vmem:[#allocation2 + $0x2b8] sm:$0xff]  ;;  %v2954_v35 = vpack.c.bf16 %v94_v28, %v62_v26  ;;  %v382_v24 = vld [vmem:[#allocation2 + $0xab0] sm:$0xff]  ;;  %v2972_v25 = vpack.c.bf16 %v415_v18, %v383_v17  ;;  %v477_v28 = vld [vmem:[#allocation2 + $0xda8] sm:$0xff] }
 0x156   :  { %v414_v26 = vld [vmem:[#allocation2 + $0xbb0] sm:$0xff]  ;;  %v701_v17 = vld [vmem:[#allocation2 + $0x14a8] sm:$0xff] }
 0x157   :  { %2807 = vmatpush1.bf16.msra.mxu0 %v2806_v38  ;;  %v156_v38 = vld [vmem:[#allocation2 + $0x3a0] sm:$0xff]  ;;  %v638_v12 = vld [vmem:[#allocation2 + $0x12b0] sm:$0xff]  ;;  %v733_v18 = vld [vmem:[#allocation2 + $0x15a8] sm:$0xff] }
 0x158   :  { %2871 = vmatpush1.bf16.msra.mxu1 %v2870_v39  ;;  %2809 = vmatprep.subr.bf16.mxu0 %v2808_v40  ;;  %v126_v39 = vld [vmem:[#allocation2 + $0x2b0] sm:$0xff]  ;;  %v2956_v40 = vpack.c.bf16 %v159_v32, %v127_v31  ;;  %v2894_v47 = vpack.c.bf16 %v156_v38, %v124_v37  ;;  %v2974_v32 = vpack.c.bf16 %v414_v26, %v382_v24  ;;  %v700_v24 = vld [vmem:[#allocation2 + $0x14a0] sm:$0xff] }
 0x159   :  { %2873 = vmatprep.subr.bf16.mxu1 %v2872_v44  ;;  %v3425_v44 = vld [vmem:[#allocation5] sm:$0xff]  ;;  %v2958_v48 = vpack.c.bf16 %v158_v41, %v126_v39  ;;  %v446_v37 = vld [vmem:[#allocation2 + $0xcb0] sm:$0xff]  ;;  %v2976_v39 = vpack.c.bf16 %v479_v30, %v447_v29  ;;  %v509_v41 = vld [vmem:[#allocation2 + $0xea8] sm:$0xff] }
 0x15a   :  { %v702_v26 = vld [vmem:[#allocation2 + $0x14b0] sm:$0xff]  ;;  %v765_v29 = vld [vmem:[#allocation2 + $0x16a8] sm:$0xff] }
 0x15b   :  { %2811 = vmatpush1.bf16.msra.mxu0 %v2810_v50  ;;  %v188_v50 = vld [vmem:[#allocation2 + $0x4a0] sm:$0xff]  ;;  %v797_v30 = vld [vmem:[#allocation2 + $0x17a8] sm:$0xff] }
 0x15c   :  { %2875 = vmatpush1.bf16.msra.mxu1 %v2874_v51  ;;  %2813 = vmatprep.subr.bf16.mxu0 %v2812_v52  ;;  %v220_v51 = vld [vmem:[#allocation2 + $0x5a0] sm:$0xff]  ;;  %v190_v52 = vld [vmem:[#allocation2 + $0x4b0] sm:$0xff] }
 0x15d   :  { %2877 = vmatprep.subr.bf16.mxu1 %v2876_v55  ;;  %v285_v55 = vld [vmem:[#allocation2 + $0x7a8] sm:$0xff]  ;;  %v2898_v16 = vpack.c.bf16 %v220_v51, %v188_v50  ;;  %v2962_v59 = vpack.c.bf16 %v222_v33, %v190_v52  ;;  %v2916_v51 = vpack.c.bf16 %v541_v42, %v509_v41  ;;  %v508_v52 = vld [vmem:[#allocation2 + $0xea0] sm:$0xff]  ;;  %v510_v33 = vld [vmem:[#allocation2 + $0xeb0] sm:$0xff] }
 0x15e   :  { %v798_v41 = vld [vmem:[#allocation2 + $0x17b0] sm:$0xff]  ;;  %v829_v42 = vld [vmem:[#allocation2 + $0x18a8] sm:$0xff] }
 0x15f   :  { %2815 = vmatpush1.bf16.msra.mxu0 %v2814_v60  ;;  %v2900_v60 = vpack.c.bf16 %v285_v55, %v253_v54  ;;  %v542_v55 = vld [vmem:[#allocation2 + $0xfb0] sm:$0xff] }
 0x160   :  { %2879 = vmatpush1.bf16.msra.mxu1 %v2878_v61  ;;  %2817 = vmatprep.subr.bf16.mxu0 %v2816_v62  ;;  %v252_v61 = vld [vmem:[#allocation2 + $0x6a0] sm:$0xff] }
 0x161   :  { %2881 = vmatprep.subr.bf16.mxu1 %v2880_v1  ;;  %v284_v62 = vld [vmem:[#allocation2 + $0x7a0] sm:$0xff]  ;;  %v317_v1 = vld [vmem:[#allocation2 + $0x8a8] sm:$0xff] }
 0x162   :  { %v2902_v5 = vpack.c.bf16 %v284_v62, %v252_v61  ;;  %v2982_v61 = vpack.c.bf16 %v542_v55, %v510_v33  ;;  %v2920_v62 = vpack.c.bf16 %v605_v58, %v573_v57  ;;  %v862_v33 = vld [vmem:[#allocation2 + $0x19b0] sm:$0xff]  ;;  %v925_v55 = vld [vmem:[#allocation2 + $0x1ba8] sm:$0xff]  ;;  %v895_v57 = vld [vmem:[#allocation2 + $0x1ab8] sm:$0xff] }
 0x163   :  { %2819 = vmatpush1.bf16.msra.mxu0 %v2818_v7  ;;  %v2904_v7 = vpack.c.bf16 %v349_v2, %v317_v1  ;;  %v606_v2 = vld [vmem:[#allocation2 + $0x11b0] sm:$0xff]  ;;  %v927_v58 = vld [vmem:[#allocation2 + $0x1bb8] sm:$0xff] }
 0x164   :  { %2883 = vmatpush1.bf16.msra.mxu1 %v2882_v8  ;;  %2821 = vmatprep.subr.bf16.mxu0 %v2820_v9  ;;  %v316_v8 = vld [vmem:[#allocation2 + $0x8a0] sm:$0xff] }
 0x165   :  { %2885 = vmatprep.subr.bf16.mxu1 %v2884_v13  ;;  %v348_v9 = vld [vmem:[#allocation2 + $0x9a0] sm:$0xff]  ;;  %v381_v13 = vld [vmem:[#allocation2 + $0xaa8] sm:$0xff] }
 0x166   :  { %v2906_v19 = vpack.c.bf16 %v348_v9, %v316_v8  ;;  %v2986_v8 = vpack.c.bf16 %v606_v2, %v574_v46  ;;  %v2924_v9 = vpack.c.bf16 %v669_v4, %v637_v3  ;;  %v926_v46 = vld [vmem:[#allocation2 + $0x1bb0] sm:$0xff]  ;;  %v989_v2 = vld [vmem:[#allocation2 + $0x1da8] sm:$0xff]  ;;  %v959_v3 = vld [vmem:[#allocation2 + $0x1cb8] sm:$0xff] }
 0x167   :  { %2823 = vmatpush1.bf16.msra.mxu0 %v2822_v21  ;;  %v2908_v21 = vpack.c.bf16 %v413_v14, %v381_v13  ;;  %v670_v14 = vld [vmem:[#allocation2 + $0x13b0] sm:$0xff]  ;;  %v991_v4 = vld [vmem:[#allocation2 + $0x1db8] sm:$0xff] }
 0x168   :  { %2887 = vmatpush1.bf16.msra.mxu1 %v2886_v22  ;;  %2889 = vmatprep.subr.bf16.mxu0 %v2888_v23  ;;  %v380_v22 = vld [vmem:[#allocation2 + $0xaa0] sm:$0xff] }
 0x169   :  { %2953 = vmatprep.subr.bf16.mxu1 %v2952_v27  ;;  %v412_v23 = vld [vmem:[#allocation2 + $0xba0] sm:$0xff]  ;;  %v445_v27 = vld [vmem:[#allocation2 + $0xca8] sm:$0xff] }
 0x16a   :  { %1697 = vmatmul.mubr.f32.vlgmr.msra.gmra.mrb[8].mxu0 %v3425_v44  ;;  %v2910_v31 = vpack.c.bf16 %v412_v23, %v380_v22  ;;  %v2990_v22 = vpack.c.bf16 %v670_v14, %v638_v12  ;;  %v2928_v23 = vpack.c.bf16 %v733_v18, %v701_v17  ;;  %v990_v12 = vld [vmem:[#allocation2 + $0x1db0] sm:$0xff]  ;;  %v1053_v14 = vld [vmem:[#allocation2 + $0x1fa8] sm:$0xff]  ;;  %v1023_v17 = vld [vmem:[#allocation2 + $0x1eb8] sm:$0xff] }
 0x16b   :  { %1768 = vmatmul.mubr.f32.vlgmr.msra.gmra.mrb[8].mxu1 %v3425_v44  ;;  %2891 = vmatpush1.bf16.msra.mxu0 %v2890_v34  ;;  %v2912_v34 = vpack.c.bf16 %v477_v28, %v445_v27  ;;  %v734_v28 = vld [vmem:[#allocation2 + $0x15b0] sm:$0xff]  ;;  %v1055_v18 = vld [vmem:[#allocation2 + $0x1fb8] sm:$0xff] }
 0x16c   :  { %2955 = vmatpush1.bf16.msra.mxu1 %v2954_v35  ;;  %2893 = vmatprep.subr.bf16.mxu0 %v2892_v36  ;;  %v444_v35 = vld [vmem:[#allocation2 + $0xca0] sm:$0xff] }
 0x16d   :  { %2957 = vmatprep.subr.bf16.mxu1 %v2956_v40  ;;  %1838 = vmatprep.mubr.f32.mxu0 %v3429_v56  ;;  %v476_v36 = vld [vmem:[#allocation2 + $0xda0] sm:$0xff]  ;;  %v478_v40 = vld [vmem:[#allocation2 + $0xdb0] sm:$0xff] }
 0x16e   :  { %1909 = vmatprep.mubr.f32.mxu1 %v3429_v56  ;;  %v2978_v50 = vpack.c.bf16 %v478_v40, %v446_v37  ;;  %v764_v37 = vld [vmem:[#allocation2 + $0x16a0] sm:$0xff] }
 0x16f   :  { %2895 = vmatpush1.bf16.msra.mxu0 %v2894_v47  ;;  %v543_v47 = vld [vmem:[#allocation2 + $0xfb8] sm:$0xff] }
 0x170   :  { %2959 = vmatpush1.bf16.msra.mxu1 %v2958_v48  ;;  %2897 = vmatprep.subr.bf16.mxu0 %v2896_v49  ;;  %v2914_v49 = vpack.c.bf16 %v476_v36, %v444_v35  ;;  %v2980_v54 = vpack.c.bf16 %v543_v47, %v511_v15  ;;  %v2994_v35 = vpack.c.bf16 %v734_v28, %v702_v26  ;;  %v863_v15 = vld [vmem:[#allocation2 + $0x19b8] sm:$0xff]  ;;  %v1054_v26 = vld [vmem:[#allocation2 + $0x1fb0] sm:$0xff]  ;;  %v97_v28 = vld [vmem:[#allocation2 + $0x1c8] sm:$0xff] }
 0x171   :  { %2961 = vmatprep.subr.bf16.mxu1 %v2960_v53  ;;  %v540_v53 = vld [vmem:[#allocation2 + $0xfa0] sm:$0xff]  ;;  %v2932_v36 = vpack.c.bf16 %v797_v30, %v765_v29  ;;  %v67_v29 = vld [vmem:[#allocation2 + $0xd8] sm:$0xff] }
 0x172   :  { %v99_v30 = vld [vmem:[#allocation2 + $0x1d8] sm:$0xff] }
 0x173   :  { %2899 = vmatpush1.bf16.msra.mxu0 %v2898_v16  ;;  %v575_v16 = vld [vmem:[#allocation2 + $0x10b8] sm:$0xff] }
 0x174   :  { %2963 = vmatpush1.bf16.msra.mxu1 %v2962_v59  ;;  %2901 = vmatprep.subr.bf16.mxu0 %v2900_v60  ;;  %v607_v59 = vld [vmem:[#allocation2 + $0x11b8] sm:$0xff]  ;;  %v2918_v60 = vpack.c.bf16 %v540_v53, %v508_v52  ;;  %v830_v52 = vld [vmem:[#allocation2 + $0x18b0] sm:$0xff] }
 0x175   :  { %2965 = vmatprep.subr.bf16.mxu1 %v2964_v0  ;;  %v604_v0 = vld [vmem:[#allocation2 + $0x11a0] sm:$0xff]  ;;  %v2984_v1 = vpack.c.bf16 %v607_v59, %v575_v16  ;;  %v3002_v59 = vpack.c.bf16 %v862_v33, %v830_v52  ;;  %v162_v52 = vld [vmem:[#allocation2 + $0x3d0] sm:$0xff]  ;;  %v225_v33 = vld [vmem:[#allocation2 + $0x5c8] sm:$0xff] }
 0x177   :  { %2903 = vmatpush1.bf16.msra.mxu0 %v2902_v5  ;;  %v639_v5 = vld [vmem:[#allocation2 + $0x12b8] sm:$0xff] }
 0x178   :  { %2967 = vmatpush1.bf16.msra.mxu1 %v2966_v6  ;;  %2905 = vmatprep.subr.bf16.mxu0 %v2904_v7  ;;  %v671_v6 = vld [vmem:[#allocation2 + $0x13b8] sm:$0xff]  ;;  %v2922_v7 = vpack.c.bf16 %v604_v0, %v572_v63  ;;  %v894_v63 = vld [vmem:[#allocation2 + $0x1ab0] sm:$0xff]  ;;  %v3004_v0 = vpack.c.bf16 %v927_v58, %v895_v57 }
 0x179   :  { %2969 = vmatprep.subr.bf16.mxu1 %v2968_v11  ;;  %v668_v11 = vld [vmem:[#allocation2 + $0x13a0] sm:$0xff]  ;;  %v2988_v13 = vpack.c.bf16 %v671_v6, %v639_v5  ;;  %v3006_v6 = vpack.c.bf16 %v926_v46, %v894_v63  ;;  %v226_v63 = vld [vmem:[#allocation2 + $0x5d0] sm:$0xff]  ;;  %v289_v46 = vld [vmem:[#allocation2 + $0x7c8] sm:$0xff] }
 0x17b   :  { %2907 = vmatpush1.bf16.msra.mxu0 %v2906_v19  ;;  %v703_v19 = vld [vmem:[#allocation2 + $0x14b8] sm:$0xff] }
 0x17c   :  { %2971 = vmatpush1.bf16.msra.mxu1 %v2970_v20  ;;  %2909 = vmatprep.subr.bf16.mxu0 %v2908_v21  ;;  %v735_v20 = vld [vmem:[#allocation2 + $0x15b8] sm:$0xff]  ;;  %v2926_v21 = vpack.c.bf16 %v668_v11, %v636_v10  ;;  %v958_v10 = vld [vmem:[#allocation2 + $0x1cb0] sm:$0xff]  ;;  %v3008_v11 = vpack.c.bf16 %v991_v4, %v959_v3 }
 0x17d   :  { %v1272_v38 = vpop.f32.mrb[2].mxu0  ;;  %2973 = vmatprep.subr.bf16.mxu1 %v2972_v25  ;;  %v732_v25 = vld [vmem:[#allocation2 + $0x15a0] sm:$0xff]  ;;  %v2992_v27 = vpack.c.bf16 %v735_v20, %v703_v19  ;;  %v3010_v20 = vpack.c.bf16 %v990_v12, %v958_v10  ;;  %v321_v10 = vld [vmem:[#allocation2 + $0x8c8] sm:$0xff]  ;;  %v323_v12 = vld [vmem:[#allocation2 + $0x8d8] sm:$0xff] }
 0x17e   :  { %2204 = vst [vmem:[#allocation7 + $0x20] sm:$0xff] %v1272_v38  ;;  %v1343_v43 = vpop.f32.mrb[2].mxu1  ;;  %v1274_v45 = vpop.f32.mrb[3].mxu0  ;;  %v796_v38 = vld [vmem:[#allocation2 + $0x17a0] sm:$0xff] }
 0x17f   :  { %2206 = vst [vmem:[#allocation7 + $0x30] sm:$0xff] %v1343_v43  ;;  %2205 = vst [vmem:[#allocation7 + $0x28] sm:$0xff] %v1274_v45  ;;  %v1345_v48 = vpop.f32.mrb[3].mxu1  ;;  %2911 = vmatpush1.bf16.msra.mxu0 %v2910_v31  ;;  %v767_v31 = vld [vmem:[#allocation2 + $0x16b8] sm:$0xff]  ;;  %v861_v43 = vld [vmem:[#allocation2 + $0x19a8] sm:$0xff]  ;;  %v2934_v47 = vpack.c.bf16 %v796_v38, %v764_v37  ;;  %v3080_v38 = vpack.c.bf16 %v99_v30, %v67_v29 }
 0x180   :  { %2207 = vst [vmem:[#allocation7 + $0x38] sm:$0xff] %v1345_v48  ;;  %2975 = vmatpush1.bf16.msra.mxu1 %v2974_v32  ;;  %2913 = vmatprep.subr.bf16.mxu0 %v2912_v34  ;;  %v799_v32 = vld [vmem:[#allocation2 + $0x17b8] sm:$0xff]  ;;  %v2930_v34 = vpack.c.bf16 %v732_v25, %v700_v24  ;;  %v1022_v24 = vld [vmem:[#allocation2 + $0x1eb0] sm:$0xff]  ;;  %v3012_v25 = vpack.c.bf16 %v1055_v18, %v1023_v17  ;;  %v320_v18 = vld [vmem:[#allocation2 + $0x8c0] sm:$0xff] }
 0x181   :  { %2977 = vmatprep.subr.bf16.mxu1 %v2976_v39  ;;  %v766_v39 = vld [vmem:[#allocation2 + $0x16b0] sm:$0xff]  ;;  %v2996_v40 = vpack.c.bf16 %v799_v32, %v767_v31  ;;  %v831_v45 = vld [vmem:[#allocation2 + $0x18b8] sm:$0xff]  ;;  %v3014_v32 = vpack.c.bf16 %v1054_v26, %v1022_v24  ;;  %v417_v24 = vld [vmem:[#allocation2 + $0xbc8] sm:$0xff] }
 0x182   :  { %v2998_v48 = vpack.c.bf16 %v798_v41, %v766_v39  ;;  %v3000_v53 = vpack.c.bf16 %v863_v15, %v831_v45  ;;  %v66_v37 = vld [vmem:[#allocation2 + $0xd0] sm:$0xff]  ;;  %v161_v41 = vld [vmem:[#allocation2 + $0x3c8] sm:$0xff]  ;;  %v419_v26 = vld [vmem:[#allocation2 + $0xbd8] sm:$0xff] }
 0x183   :  { %2915 = vmatpush1.bf16.msra.mxu0 %v2914_v49  ;;  %v2936_v49 = vpack.c.bf16 %v861_v43, %v829_v42  ;;  %v98_v39 = vld [vmem:[#allocation2 + $0x1d0] sm:$0xff]  ;;  %v131_v42 = vld [vmem:[#allocation2 + $0x2d8] sm:$0xff]  ;;  %v384_v30 = vld [vmem:[#allocation2 + $0xac0] sm:$0xff] }
 0x184   :  { %2979 = vmatpush1.bf16.msra.mxu1 %v2978_v50  ;;  %2917 = vmatprep.subr.bf16.mxu0 %v2916_v51  ;;  %v828_v50 = vld [vmem:[#allocation2 + $0x18a0] sm:$0xff]  ;;  %v163_v43 = vld [vmem:[#allocation2 + $0x3d8] sm:$0xff]  ;;  %v3082_v15 = vpack.c.bf16 %v98_v39, %v66_v37  ;;  %v481_v37 = vld [vmem:[#allocation2 + $0xdc8] sm:$0xff] }
 0x185   :  { %2981 = vmatprep.subr.bf16.mxu1 %v2980_v54  ;;  %v860_v51 = vld [vmem:[#allocation2 + $0x19a0] sm:$0xff]  ;;  %v893_v54 = vld [vmem:[#allocation2 + $0x1aa8] sm:$0xff]  ;;  %v483_v39 = vld [vmem:[#allocation2 + $0xdd8] sm:$0xff] }
 0x186   :  { %v2938_v16 = vpack.c.bf16 %v860_v51, %v828_v50  ;;  %v130_v50 = vld [vmem:[#allocation2 + $0x2d0] sm:$0xff]  ;;  %v3084_v51 = vpack.c.bf16 %v163_v43, %v131_v42  ;;  %v448_v43 = vld [vmem:[#allocation2 + $0xcc0] sm:$0xff] }
 0x187   :  { %2919 = vmatpush1.bf16.msra.mxu0 %v2918_v60  ;;  %v2940_v60 = vpack.c.bf16 %v925_v55, %v893_v54  ;;  %v195_v54 = vld [vmem:[#allocation2 + $0x4d8] sm:$0xff]  ;;  %v3086_v58 = vpack.c.bf16 %v162_v52, %v130_v50  ;;  %v513_v50 = vld [vmem:[#allocation2 + $0xec8] sm:$0xff] }
 0x188   :  { %2983 = vmatpush1.bf16.msra.mxu1 %v2982_v61  ;;  %2921 = vmatprep.subr.bf16.mxu0 %v2920_v62  ;;  %v892_v61 = vld [vmem:[#allocation2 + $0x1aa0] sm:$0xff]  ;;  %v227_v55 = vld [vmem:[#allocation2 + $0x5d8] sm:$0xff] }
 0x189   :  { %2985 = vmatprep.subr.bf16.mxu1 %v2984_v1  ;;  %v924_v62 = vld [vmem:[#allocation2 + $0x1ba0] sm:$0xff]  ;;  %v957_v1 = vld [vmem:[#allocation2 + $0x1ca8] sm:$0xff] }
 0x18a   :  { %v2942_v5 = vpack.c.bf16 %v924_v62, %v892_v61  ;;  %v194_v61 = vld [vmem:[#allocation2 + $0x4d0] sm:$0xff]  ;;  %v3088_v62 = vpack.c.bf16 %v227_v55, %v195_v54  ;;  %v547_v54 = vld [vmem:[#allocation2 + $0xfd8] sm:$0xff] }
 0x18b   :  { %2923 = vmatpush1.bf16.msra.mxu0 %v2922_v7  ;;  %v2944_v7 = vpack.c.bf16 %v989_v2, %v957_v1  ;;  %v259_v1 = vld [vmem:[#allocation2 + $0x6d8] sm:$0xff]  ;;  %v3090_v3 = vpack.c.bf16 %v226_v63, %v194_v61  ;;  %v514_v61 = vld [vmem:[#allocation2 + $0xed0] sm:$0xff] }
 0x18c   :  { %2987 = vmatpush1.bf16.msra.mxu1 %v2986_v8  ;;  %2925 = vmatprep.subr.bf16.mxu0 %v2924_v9  ;;  %v956_v8 = vld [vmem:[#allocation2 + $0x1ca0] sm:$0xff]  ;;  %v291_v2 = vld [vmem:[#allocation2 + $0x7d8] sm:$0xff]  ;;  %v546_v63 = vld [vmem:[#allocation2 + $0xfd0] sm:$0xff] }
 0x18d   :  { %2989 = vmatprep.subr.bf16.mxu1 %v2988_v13  ;;  %v988_v9 = vld [vmem:[#allocation2 + $0x1da0] sm:$0xff]  ;;  %v1021_v13 = vld [vmem:[#allocation2 + $0x1ea8] sm:$0xff] }
 0x18e   :  { %v2946_v19 = vpack.c.bf16 %v988_v9, %v956_v8  ;;  %v3092_v8 = vpack.c.bf16 %v291_v2, %v259_v1  ;;  %v290_v9 = vld [vmem:[#allocation2 + $0x7d0] sm:$0xff]  ;;  %v579_v1 = vld [vmem:[#allocation2 + $0x10d8] sm:$0xff] }
 0x18f   :  { %2927 = vmatpush1.bf16.msra.mxu0 %v2926_v21  ;;  %v2948_v21 = vpack.c.bf16 %v1053_v14, %v1021_v13  ;;  %v355_v13 = vld [vmem:[#allocation2 + $0x9d8] sm:$0xff] }
 0x190   :  { %2991 = vmatpush1.bf16.msra.mxu1 %v2990_v22  ;;  %2929 = vmatprep.subr.bf16.mxu0 %v2928_v23  ;;  %v1020_v22 = vld [vmem:[#allocation2 + $0x1ea0] sm:$0xff]  ;;  %v611_v2 = vld [vmem:[#allocation2 + $0x11d8] sm:$0xff] }
 0x191   :  { %2993 = vmatprep.subr.bf16.mxu1 %v2992_v27  ;;  %v1052_v23 = vld [vmem:[#allocation2 + $0x1fa0] sm:$0xff]  ;;  %v65_v27 = vld [vmem:[#allocation2 + $0xc8] sm:$0xff] }
 0x192   :  { %v2950_v31 = vpack.c.bf16 %v1052_v23, %v1020_v22  ;;  %v354_v22 = vld [vmem:[#allocation2 + $0x9d0] sm:$0xff]  ;;  %v385_v23 = vld [vmem:[#allocation2 + $0xac8] sm:$0xff] }
 0x193   :  { %2931 = vmatpush1.bf16.msra.mxu0 %v2930_v34  ;;  %v3016_v34 = vpack.c.bf16 %v97_v28, %v65_v27  ;;  %v3036_v29 = vpack.c.bf16 %v417_v24, %v385_v23  ;;  %v705_v23 = vld [vmem:[#allocation2 + $0x14c8] sm:$0xff] }
 0x194   :  { %2995 = vmatpush1.bf16.msra.mxu1 %v2994_v35  ;;  %2933 = vmatprep.subr.bf16.mxu0 %v2932_v36  ;;  %v64_v35 = vld [vmem:[#allocation2 + $0xc0] sm:$0xff]  ;;  %v737_v24 = vld [vmem:[#allocation2 + $0x15c8] sm:$0xff] }
 0x195   :  { %2997 = vmatprep.subr.bf16.mxu1 %v2996_v40  ;;  %v96_v36 = vld [vmem:[#allocation2 + $0x1c0] sm:$0xff]  ;;  %v129_v40 = vld [vmem:[#allocation2 + $0x2c8] sm:$0xff] }
 0x196   :  { %v3018_v45 = vpack.c.bf16 %v96_v36, %v64_v35  ;;  %v418_v35 = vld [vmem:[#allocation2 + $0xbd0] sm:$0xff]  ;;  %v449_v36 = vld [vmem:[#allocation2 + $0xcc8] sm:$0xff] }
 0x197   :  { %2935 = vmatpush1.bf16.msra.mxu0 %v2934_v47  ;;  %v3020_v47 = vpack.c.bf16 %v161_v41, %v129_v40  ;;  %v3040_v42 = vpack.c.bf16 %v481_v37, %v449_v36  ;;  %v769_v36 = vld [vmem:[#allocation2 + $0x16c8] sm:$0xff] }
 0x198   :  { %2999 = vmatpush1.bf16.msra.mxu1 %v2998_v48  ;;  %2937 = vmatprep.subr.bf16.mxu0 %v2936_v49  ;;  %v128_v48 = vld [vmem:[#allocation2 + $0x2c0] sm:$0xff]  ;;  %v801_v37 = vld [vmem:[#allocation2 + $0x17c8] sm:$0xff] }
 0x199   :  { %3001 = vmatprep.subr.bf16.mxu1 %v3000_v53  ;;  %v160_v49 = vld [vmem:[#allocation2 + $0x3c0] sm:$0xff]  ;;  %v193_v53 = vld [vmem:[#allocation2 + $0x4c8] sm:$0xff] }
 0x19a   :  { %v3022_v57 = vpack.c.bf16 %v160_v49, %v128_v48  ;;  %v482_v49 = vld [vmem:[#allocation2 + $0xdd0] sm:$0xff] }
 0x19b   :  { %2939 = vmatpush1.bf16.msra.mxu0 %v2938_v16  ;;  %v3024_v16 = vpack.c.bf16 %v225_v33, %v193_v53  ;;  %v515_v33 = vld [vmem:[#allocation2 + $0xed8] sm:$0xff] }
 0x19c   :  { %3003 = vmatpush1.bf16.msra.mxu1 %v3002_v59  ;;  %2941 = vmatprep.subr.bf16.mxu0 %v2940_v60  ;;  %v192_v59 = vld [vmem:[#allocation2 + $0x4c0] sm:$0xff] }
 0x19d   :  { %3005 = vmatprep.subr.bf16.mxu1 %v3004_v0  ;;  %v224_v60 = vld [vmem:[#allocation2 + $0x5c0] sm:$0xff]  ;;  %v257_v0 = vld [vmem:[#allocation2 + $0x6c8] sm:$0xff] }
 0x19e   :  { %v3028_v4 = vpack.c.bf16 %v289_v46, %v257_v0  ;;  %v577_v0 = vld [vmem:[#allocation2 + $0x10c8] sm:$0xff] }
 0x19f   :  { %2943 = vmatpush1.bf16.msra.mxu0 %v2942_v5  ;;  %v256_v5 = vld [vmem:[#allocation2 + $0x6c0] sm:$0xff]  ;;  %v609_v46 = vld [vmem:[#allocation2 + $0x11c8] sm:$0xff] }
 0x1a0   :  { %3007 = vmatpush1.bf16.msra.mxu1 %v3006_v6  ;;  %2945 = vmatprep.subr.bf16.mxu0 %v2944_v7  ;;  %v288_v6 = vld [vmem:[#allocation2 + $0x7c0] sm:$0xff]  ;;  %v258_v7 = vld [vmem:[#allocation2 + $0x6d0] sm:$0xff] }
 0x1a1   :  { %3009 = vmatprep.subr.bf16.mxu1 %v3008_v11  ;;  %v353_v11 = vld [vmem:[#allocation2 + $0x9c8] sm:$0xff]  ;;  %v3030_v14 = vpack.c.bf16 %v288_v6, %v256_v5  ;;  %v576_v5 = vld [vmem:[#allocation2 + $0x10c0] sm:$0xff] }
 0x1a2   :  { %v3032_v17 = vpack.c.bf16 %v353_v11, %v321_v10  ;;  %v608_v6 = vld [vmem:[#allocation2 + $0x11c0] sm:$0xff]  ;;  %v641_v10 = vld [vmem:[#allocation2 + $0x12c8] sm:$0xff] }
 0x1a3   :  { %2947 = vmatpush1.bf16.msra.mxu0 %v2946_v19  ;;  %v352_v19 = vld [vmem:[#allocation2 + $0x9c0] sm:$0xff]  ;;  %v673_v11 = vld [vmem:[#allocation2 + $0x13c8] sm:$0xff] }
 0x1a4   :  { %3011 = vmatpush1.bf16.msra.mxu1 %v3010_v20  ;;  %2949 = vmatprep.subr.bf16.mxu0 %v2948_v21  ;;  %v322_v20 = vld [vmem:[#allocation2 + $0x8d0] sm:$0xff]  ;;  %v3096_v21 = vpack.c.bf16 %v355_v13, %v323_v12  ;;  %v3034_v27 = vpack.c.bf16 %v352_v19, %v320_v18  ;;  %v643_v12 = vld [vmem:[#allocation2 + $0x12d8] sm:$0xff]  ;;  %v640_v18 = vld [vmem:[#allocation2 + $0x12c0] sm:$0xff] }
 0x1a5   :  { %3013 = vmatprep.subr.bf16.mxu1 %v3012_v25  ;;  %v387_v25 = vld [vmem:[#allocation2 + $0xad8] sm:$0xff]  ;;  %v3098_v28 = vpack.c.bf16 %v354_v22, %v322_v20  ;;  %v672_v19 = vld [vmem:[#allocation2 + $0x13c0] sm:$0xff]  ;;  %v642_v20 = vld [vmem:[#allocation2 + $0x12d0] sm:$0xff] }
 0x1a6   :  { %v675_v13 = vld [vmem:[#allocation2 + $0x13d8] sm:$0xff]  ;;  %v674_v22 = vld [vmem:[#allocation2 + $0x13d0] sm:$0xff] }
 0x1a7   :  { %2951 = vmatpush1.bf16.msra.mxu0 %v2950_v31  ;;  %v416_v31 = vld [vmem:[#allocation2 + $0xbc0] sm:$0xff] }
 0x1a8   :  { %3015 = vmatpush1.bf16.msra.mxu1 %v3014_v32  ;;  %3017 = vmatprep.subr.bf16.mxu0 %v3016_v34  ;;  %v386_v32 = vld [vmem:[#allocation2 + $0xad0] sm:$0xff]  ;;  %v3100_v34 = vpack.c.bf16 %v419_v26, %v387_v25  ;;  %v3038_v40 = vpack.c.bf16 %v416_v31, %v384_v30  ;;  %v707_v25 = vld [vmem:[#allocation2 + $0x14d8] sm:$0xff]  ;;  %v704_v30 = vld [vmem:[#allocation2 + $0x14c0] sm:$0xff] }
 0x1a9   :  { %3081 = vmatprep.subr.bf16.mxu1 %v3080_v38  ;;  %v451_v38 = vld [vmem:[#allocation2 + $0xcd8] sm:$0xff]  ;;  %v3102_v41 = vpack.c.bf16 %v418_v35, %v386_v32  ;;  %v736_v31 = vld [vmem:[#allocation2 + $0x15c0] sm:$0xff]  ;;  %v706_v32 = vld [vmem:[#allocation2 + $0x14d0] sm:$0xff] }
 0x1aa   :  { %1839 = vmatmul.mubr.f32.vlgmr.msra.gmra.mrb[10].mxu0 %v3425_v44  ;;  %v3104_v48 = vpack.c.bf16 %v483_v39, %v451_v38  ;;  %v739_v26 = vld [vmem:[#allocation2 + $0x15d8] sm:$0xff]  ;;  %v738_v35 = vld [vmem:[#allocation2 + $0x15d0] sm:$0xff] }
 0x1ab   :  { %1910 = vmatmul.mubr.f32.vlgmr.msra.gmra.mrb[10].mxu1 %v3425_v44  ;;  %3019 = vmatpush1.bf16.msra.mxu0 %v3018_v45  ;;  %v3026_v44 = vpack.c.bf16 %v224_v60, %v192_v59  ;;  %v480_v45 = vld [vmem:[#allocation2 + $0xdc0] sm:$0xff]  ;;  %v771_v38 = vld [vmem:[#allocation2 + $0x16d8] sm:$0xff] }
 0x1ac   :  { %3083 = vmatpush1.bf16.msra.mxu1 %v3082_v15  ;;  %3021 = vmatprep.subr.bf16.mxu0 %v3020_v47  ;;  %v450_v15 = vld [vmem:[#allocation2 + $0xcd0] sm:$0xff]  ;;  %v512_v59 = vld [vmem:[#allocation2 + $0xec0] sm:$0xff]  ;;  %v803_v39 = vld [vmem:[#allocation2 + $0x17d8] sm:$0xff] }
 0x1ad   :  { %3085 = vmatprep.subr.bf16.mxu1 %v3084_v51  ;;  %1980 = vmatprep.mubr.f32.mxu0 %v3429_v56  ;;  %v545_v51 = vld [vmem:[#allocation2 + $0xfc8] sm:$0xff]  ;;  %v544_v60 = vld [vmem:[#allocation2 + $0xfc0] sm:$0xff] }
 0x1ae   :  { %2051 = vmatprep.mubr.f32.mxu1 %v3429_v56  ;;  %v3094_v56 = vpack.c.bf16 %v290_v9, %v258_v7  ;;  %v578_v7 = vld [vmem:[#allocation2 + $0x10d0] sm:$0xff] }
 0x1af   :  { %3023 = vmatpush1.bf16.msra.mxu0 %v3022_v57  ;;  %v3042_v57 = vpack.c.bf16 %v480_v45, %v448_v43  ;;  %v610_v9 = vld [vmem:[#allocation2 + $0x11d0] sm:$0xff]  ;;  %v768_v43 = vld [vmem:[#allocation2 + $0x16c0] sm:$0xff] }
 0x1b0   :  { %3087 = vmatpush1.bf16.msra.mxu1 %v3086_v58  ;;  %3025 = vmatprep.subr.bf16.mxu0 %v3024_v16  ;;  %v3106_v58 = vpack.c.bf16 %v482_v49, %v450_v15  ;;  %v3044_v16 = vpack.c.bf16 %v545_v51, %v513_v50  ;;  %v800_v45 = vld [vmem:[#allocation2 + $0x17c0] sm:$0xff]  ;;  %v770_v15 = vld [vmem:[#allocation2 + $0x16d0] sm:$0xff]  ;;  %v833_v49 = vld [vmem:[#allocation2 + $0x18c8] sm:$0xff] }
 0x1b1   :  { %3089 = vmatprep.subr.bf16.mxu1 %v3088_v62  ;;  %v3108_v62 = vpack.c.bf16 %v547_v54, %v515_v33  ;;  %v865_v50 = vld [vmem:[#allocation2 + $0x19c8] sm:$0xff]  ;;  %v835_v51 = vld [vmem:[#allocation2 + $0x18d8] sm:$0xff] }
 0x1b2   :  { %v3064_v54 = vpack.c.bf16 %v865_v50, %v833_v49 }
 0x1b3   :  { %3027 = vmatpush1.bf16.msra.mxu0 %v3026_v44  ;;  %v3046_v44 = vpack.c.bf16 %v544_v60, %v512_v59  ;;  %v866_v59 = vld [vmem:[#allocation2 + $0x19d0] sm:$0xff]  ;;  %v897_v60 = vld [vmem:[#allocation2 + $0x1ac8] sm:$0xff] }
 0x1b4   :  { %3091 = vmatpush1.bf16.msra.mxu1 %v3090_v3  ;;  %3029 = vmatprep.subr.bf16.mxu0 %v3028_v4  ;;  %v3110_v3 = vpack.c.bf16 %v546_v63, %v514_v61  ;;  %v3048_v4 = vpack.c.bf16 %v609_v46, %v577_v0  ;;  %v929_v61 = vld [vmem:[#allocation2 + $0x1bc8] sm:$0xff]  ;;  %v931_v63 = vld [vmem:[#allocation2 + $0x1bd8] sm:$0xff] }
 0x1b5   :  { %3093 = vmatprep.subr.bf16.mxu1 %v3092_v8  ;;  %v3112_v8 = vpack.c.bf16 %v611_v2, %v579_v1  ;;  %v3068_v1 = vpack.c.bf16 %v929_v61, %v897_v60  ;;  %v896_v2 = vld [vmem:[#allocation2 + $0x1ac0] sm:$0xff]  ;;  %v231_v60 = vld [vmem:[#allocation2 + $0x5f8] sm:$0xff] }
 0x1b7   :  { %3031 = vmatpush1.bf16.msra.mxu0 %v3030_v14  ;;  %v3050_v14 = vpack.c.bf16 %v608_v6, %v576_v5  ;;  %v930_v5 = vld [vmem:[#allocation2 + $0x1bd0] sm:$0xff]  ;;  %v961_v6 = vld [vmem:[#allocation2 + $0x1cc8] sm:$0xff] }
 0x1b8   :  { %3095 = vmatpush1.bf16.msra.mxu1 %v3094_v56  ;;  %3033 = vmatprep.subr.bf16.mxu0 %v3032_v17  ;;  %v3114_v56 = vpack.c.bf16 %v610_v9, %v578_v7  ;;  %v3052_v17 = vpack.c.bf16 %v673_v11, %v641_v10  ;;  %v993_v7 = vld [vmem:[#allocation2 + $0x1dc8] sm:$0xff]  ;;  %v995_v9 = vld [vmem:[#allocation2 + $0x1dd8] sm:$0xff] }
 0x1b9   :  { %3097 = vmatprep.subr.bf16.mxu1 %v3096_v21  ;;  %v3116_v21 = vpack.c.bf16 %v675_v13, %v643_v12  ;;  %v3072_v12 = vpack.c.bf16 %v993_v7, %v961_v6  ;;  %v960_v13 = vld [vmem:[#allocation2 + $0x1cc0] sm:$0xff]  ;;  %v263_v6 = vld [vmem:[#allocation2 + $0x6f8] sm:$0xff] }
 0x1ba   :  { %v295_v7 = vld [vmem:[#allocation2 + $0x7f8] sm:$0xff] }
 0x1bb   :  { %3035 = vmatpush1.bf16.msra.mxu0 %v3034_v27  ;;  %v3054_v27 = vpack.c.bf16 %v672_v19, %v640_v18  ;;  %v994_v18 = vld [vmem:[#allocation2 + $0x1dd0] sm:$0xff]  ;;  %v1025_v19 = vld [vmem:[#allocation2 + $0x1ec8] sm:$0xff] }
 0x1bc   :  { %3099 = vmatpush1.bf16.msra.mxu1 %v3098_v28  ;;  %3037 = vmatprep.subr.bf16.mxu0 %v3036_v29  ;;  %v3118_v28 = vpack.c.bf16 %v674_v22, %v642_v20  ;;  %v3056_v29 = vpack.c.bf16 %v737_v24, %v705_v23  ;;  %v1057_v20 = vld [vmem:[#allocation2 + $0x1fc8] sm:$0xff]  ;;  %v1059_v22 = vld [vmem:[#allocation2 + $0x1fd8] sm:$0xff] }
 0x1bd   :  { %v1414_v47 = vpop.f32.mrb[4].mxu0  ;;  %3101 = vmatprep.subr.bf16.mxu1 %v3100_v34  ;;  %v3120_v34 = vpack.c.bf16 %v739_v26, %v707_v25  ;;  %v3076_v25 = vpack.c.bf16 %v1057_v20, %v1025_v19  ;;  %v1024_v26 = vld [vmem:[#allocation2 + $0x1ec0] sm:$0xff]  ;;  %v327_v19 = vld [vmem:[#allocation2 + $0x8f8] sm:$0xff] }
 0x1be   :  { %2208 = vst [vmem:[#allocation7 + $0x40] sm:$0xff] %v1414_v47  ;;  %v1485_v52 = vpop.f32.mrb[4].mxu1  ;;  %v1416_v53 = vpop.f32.mrb[5].mxu0  ;;  %v3124_v47 = vpack.c.bf16 %v803_v39, %v771_v38  ;;  %v68_v39 = vld [vmem:[#allocation2 + $0xe0] sm:$0xff]  ;;  %v359_v20 = vld [vmem:[#allocation2 + $0x9f8] sm:$0xff] }
 0x1bf   :  { %2210 = vst [vmem:[#allocation7 + $0x50] sm:$0xff] %v1485_v52  ;;  %2209 = vst [vmem:[#allocation7 + $0x48] sm:$0xff] %v1416_v53  ;;  %v1487_v55 = vpop.f32.mrb[5].mxu1  ;;  %3039 = vmatpush1.bf16.msra.mxu0 %v3038_v40  ;;  %v3058_v40 = vpack.c.bf16 %v736_v31, %v704_v30  ;;  %v867_v52 = vld [vmem:[#allocation2 + $0x19d8] sm:$0xff]  ;;  %v3062_v53 = vpack.c.bf16 %v800_v45, %v768_v43  ;;  %v1058_v30 = vld [vmem:[#allocation2 + $0x1fd0] sm:$0xff] }
 0x1c0   :  { %2211 = vst [vmem:[#allocation7 + $0x58] sm:$0xff] %v1487_v55  ;;  %3103 = vmatpush1.bf16.msra.mxu1 %v3102_v41  ;;  %3041 = vmatprep.subr.bf16.mxu0 %v3040_v42  ;;  %v3122_v41 = vpack.c.bf16 %v738_v35, %v706_v32  ;;  %v3060_v42 = vpack.c.bf16 %v801_v37, %v769_v36  ;;  %v832_v55 = vld [vmem:[#allocation2 + $0x18c0] sm:$0xff]  ;;  %v69_v31 = vld [vmem:[#allocation2 + $0xe8] sm:$0xff]  ;;  %v103_v35 = vld [vmem:[#allocation2 + $0x1f8] sm:$0xff] }
 0x1c1   :  { %3105 = vmatprep.subr.bf16.mxu1 %v3104_v48  ;;  %v802_v48 = vld [vmem:[#allocation2 + $0x17d0] sm:$0xff]  ;;  %v101_v32 = vld [vmem:[#allocation2 + $0x1e8] sm:$0xff] }
 0x1c2   :  { %v3126_v33 = vpack.c.bf16 %v802_v48, %v770_v15  ;;  %v3144_v38 = vpack.c.bf16 %v101_v32, %v69_v31  ;;  %v102_v43 = vld [vmem:[#allocation2 + $0x1f0] sm:$0xff]  ;;  %v133_v45 = vld [vmem:[#allocation2 + $0x2e8] sm:$0xff]  ;;  %v167_v48 = vld [vmem:[#allocation2 + $0x3f8] sm:$0xff] }
 0x1c3   :  { %3043 = vmatpush1.bf16.msra.mxu0 %v3042_v57  ;;  %v864_v57 = vld [vmem:[#allocation2 + $0x19c0] sm:$0xff]  ;;  %v165_v15 = vld [vmem:[#allocation2 + $0x3e8] sm:$0xff]  ;;  %v391_v31 = vld [vmem:[#allocation2 + $0xaf8] sm:$0xff] }
 0x1c4   :  { %3107 = vmatpush1.bf16.msra.mxu1 %v3106_v58  ;;  %3045 = vmatprep.subr.bf16.mxu0 %v3044_v16  ;;  %v834_v58 = vld [vmem:[#allocation2 + $0x18d0] sm:$0xff]  ;;  %v3128_v16 = vpack.c.bf16 %v867_v52, %v835_v51  ;;  %v3066_v0 = vpack.c.bf16 %v864_v57, %v832_v55  ;;  %v3148_v51 = vpack.c.bf16 %v165_v15, %v133_v45  ;;  %v132_v52 = vld [vmem:[#allocation2 + $0x2e0] sm:$0xff]  ;;  %v197_v57 = vld [vmem:[#allocation2 + $0x4e8] sm:$0xff] }
 0x1c5   :  { %3109 = vmatprep.subr.bf16.mxu1 %v3108_v62  ;;  %v899_v62 = vld [vmem:[#allocation2 + $0x1ad8] sm:$0xff]  ;;  %v3130_v46 = vpack.c.bf16 %v866_v59, %v834_v58  ;;  %v166_v55 = vld [vmem:[#allocation2 + $0x3f0] sm:$0xff]  ;;  %v229_v58 = vld [vmem:[#allocation2 + $0x5e8] sm:$0xff] }
 0x1c6   :  { %v199_v59 = vld [vmem:[#allocation2 + $0x4f8] sm:$0xff] }
 0x1c7   :  { %3047 = vmatpush1.bf16.msra.mxu0 %v3046_v44  ;;  %v928_v44 = vld [vmem:[#allocation2 + $0x1bc0] sm:$0xff]  ;;  %v423_v32 = vld [vmem:[#allocation2 + $0xbf8] sm:$0xff] }
 0x1c8   :  { %3111 = vmatpush1.bf16.msra.mxu1 %v3110_v3  ;;  %3049 = vmatprep.subr.bf16.mxu0 %v3048_v4  ;;  %v898_v3 = vld [vmem:[#allocation2 + $0x1ad0] sm:$0xff]  ;;  %v3132_v4 = vpack.c.bf16 %v931_v63, %v899_v62  ;;  %v3070_v10 = vpack.c.bf16 %v928_v44, %v896_v2  ;;  %v3152_v63 = vpack.c.bf16 %v229_v58, %v197_v57  ;;  %v455_v45 = vld [vmem:[#allocation2 + $0xcf8] sm:$0xff]  ;;  %v549_v57 = vld [vmem:[#allocation2 + $0xfe8] sm:$0xff] }
 0x1c9   :  { %3113 = vmatprep.subr.bf16.mxu1 %v3112_v8  ;;  %v963_v8 = vld [vmem:[#allocation2 + $0x1cd8] sm:$0xff]  ;;  %v3134_v11 = vpack.c.bf16 %v930_v5, %v898_v3  ;;  %v3216_v2 = vpack.c.bf16 %v231_v60, %v199_v59  ;;  %v230_v44 = vld [vmem:[#allocation2 + $0x5f0] sm:$0xff]  ;;  %v261_v3 = vld [vmem:[#allocation2 + $0x6e8] sm:$0xff] }
 0x1ca   :  { %v3282_v5 = vld [vmem:[#allocation5 + $0x8] sm:$0xff]  ;;  %v487_v15 = vld [vmem:[#allocation2 + $0xdf8] sm:$0xff] }
 0x1cb   :  { %3051 = vmatpush1.bf16.msra.mxu0 %v3050_v14  ;;  %v992_v14 = vld [vmem:[#allocation2 + $0x1dc0] sm:$0xff]  ;;  %v519_v60 = vld [vmem:[#allocation2 + $0xef8] sm:$0xff] }
 0x1cc   :  { %3115 = vmatpush1.bf16.msra.mxu1 %v3114_v56  ;;  %3053 = vmatprep.subr.bf16.mxu0 %v3052_v17  ;;  %v962_v56 = vld [vmem:[#allocation2 + $0x1cd0] sm:$0xff]  ;;  %v3136_v17 = vpack.c.bf16 %v995_v9, %v963_v8  ;;  %v3074_v23 = vpack.c.bf16 %v992_v14, %v960_v13  ;;  %v3220_v14 = vpack.c.bf16 %v295_v7, %v263_v6  ;;  %v613_v6 = vld [vmem:[#allocation2 + $0x11e8] sm:$0xff]  ;;  %v583_v7 = vld [vmem:[#allocation2 + $0x10f8] sm:$0xff] }
 0x1cd   :  { %3117 = vmatprep.subr.bf16.mxu1 %v3116_v21  ;;  %v1027_v21 = vld [vmem:[#allocation2 + $0x1ed8] sm:$0xff]  ;;  %v3138_v24 = vpack.c.bf16 %v994_v18, %v962_v56  ;;  %v262_v13 = vld [vmem:[#allocation2 + $0x6f0] sm:$0xff]  ;;  %v357_v18 = vld [vmem:[#allocation2 + $0x9e8] sm:$0xff] }
 0x1ce   :  { %v294_v56 = vld [vmem:[#allocation2 + $0x7f0] sm:$0xff] }
 0x1cf   :  { %3055 = vmatpush1.bf16.msra.mxu0 %v3054_v27  ;;  %v1056_v27 = vld [vmem:[#allocation2 + $0x1fc0] sm:$0xff] }
 0x1d0   :  { %3119 = vmatpush1.bf16.msra.mxu1 %v3118_v28  ;;  %3057 = vmatprep.subr.bf16.mxu0 %v3056_v29  ;;  %v1026_v28 = vld [vmem:[#allocation2 + $0x1ed0] sm:$0xff]  ;;  %v3140_v29 = vpack.c.bf16 %v1059_v22, %v1027_v21  ;;  %v3078_v36 = vpack.c.bf16 %v1056_v27, %v1024_v26  ;;  %v3222_v22 = vpack.c.bf16 %v294_v56, %v262_v13  ;;  %v612_v13 = vld [vmem:[#allocation2 + $0x11e0] sm:$0xff] }
 0x1d1   :  { %3121 = vmatprep.subr.bf16.mxu1 %v3120_v34  ;;  %v71_v34 = vld [vmem:[#allocation2 + $0xf8] sm:$0xff]  ;;  %v3142_v37 = vpack.c.bf16 %v1058_v30, %v1026_v28  ;;  %v326_v26 = vld [vmem:[#allocation2 + $0x8f0] sm:$0xff]  ;;  %v3224_v27 = vpack.c.bf16 %v359_v20, %v327_v19  ;;  %v421_v30 = vld [vmem:[#allocation2 + $0xbe8] sm:$0xff] }
 0x1d2   :  { %v358_v28 = vld [vmem:[#allocation2 + $0x9f0] sm:$0xff]  ;;  %v677_v19 = vld [vmem:[#allocation2 + $0x13e8] sm:$0xff]  ;;  %v647_v20 = vld [vmem:[#allocation2 + $0x12f8] sm:$0xff] }
 0x1d3   :  { %3059 = vmatpush1.bf16.msra.mxu0 %v3058_v40  ;;  %v100_v40 = vld [vmem:[#allocation2 + $0x1e0] sm:$0xff] }
 0x1d4   :  { %3123 = vmatpush1.bf16.msra.mxu1 %v3122_v41  ;;  %3061 = vmatprep.subr.bf16.mxu0 %v3060_v42  ;;  %v70_v41 = vld [vmem:[#allocation2 + $0xf0] sm:$0xff]  ;;  %v3208_v42 = vpack.c.bf16 %v103_v35, %v71_v34  ;;  %v3146_v49 = vpack.c.bf16 %v100_v40, %v68_v39  ;;  %v3226_v35 = vpack.c.bf16 %v358_v28, %v326_v26  ;;  %v676_v26 = vld [vmem:[#allocation2 + $0x13e0] sm:$0xff] }
 0x1d5   :  { %3125 = vmatprep.subr.bf16.mxu1 %v3124_v47  ;;  %v135_v47 = vld [vmem:[#allocation2 + $0x2f8] sm:$0xff]  ;;  %v3210_v50 = vpack.c.bf16 %v102_v43, %v70_v41  ;;  %v390_v39 = vld [vmem:[#allocation2 + $0xaf0] sm:$0xff]  ;;  %v3228_v40 = vpack.c.bf16 %v423_v32, %v391_v31  ;;  %v485_v43 = vld [vmem:[#allocation2 + $0xde8] sm:$0xff] }
 0x1d6   :  { %v422_v41 = vld [vmem:[#allocation2 + $0xbf0] sm:$0xff]  ;;  %v741_v31 = vld [vmem:[#allocation2 + $0x15e8] sm:$0xff]  ;;  %v711_v32 = vld [vmem:[#allocation2 + $0x14f8] sm:$0xff] }
 0x1d7   :  { %3063 = vmatpush1.bf16.msra.mxu0 %v3062_v53  ;;  %v164_v53 = vld [vmem:[#allocation2 + $0x3e0] sm:$0xff] }
 0x1d8   :  { %3127 = vmatpush1.bf16.msra.mxu1 %v3126_v33  ;;  %3065 = vmatprep.subr.bf16.mxu0 %v3064_v54  ;;  %v134_v33 = vld [vmem:[#allocation2 + $0x2f0] sm:$0xff]  ;;  %v3212_v54 = vpack.c.bf16 %v167_v48, %v135_v47  ;;  %v3150_v61 = vpack.c.bf16 %v164_v53, %v132_v52  ;;  %v3230_v48 = vpack.c.bf16 %v422_v41, %v390_v39  ;;  %v740_v39 = vld [vmem:[#allocation2 + $0x15e0] sm:$0xff] }
 0x1d9   :  { %3129 = vmatprep.subr.bf16.mxu1 %v3128_v16  ;;  %v3437_v16 = vld [vmem:[#allocation5] sm:$0xff]  ;;  %v3214_v62 = vpack.c.bf16 %v166_v55, %v134_v33  ;;  %v454_v52 = vld [vmem:[#allocation2 + $0xcf0] sm:$0xff]  ;;  %v3232_v33 = vpack.c.bf16 %v487_v15, %v455_v45  ;;  %v517_v55 = vld [vmem:[#allocation2 + $0xee8] sm:$0xff] }
 0x1da   :  { %v805_v45 = vld [vmem:[#allocation2 + $0x17e8] sm:$0xff]  ;;  %v775_v15 = vld [vmem:[#allocation2 + $0x16f8] sm:$0xff] }
 0x1db   :  { %3067 = vmatpush1.bf16.msra.mxu0 %v3066_v0  ;;  %v196_v0 = vld [vmem:[#allocation2 + $0x4e0] sm:$0xff] }
 0x1dc   :  { %3131 = vmatpush1.bf16.msra.mxu1 %v3130_v46  ;;  %3069 = vmatprep.subr.bf16.mxu0 %v3068_v1  ;;  %v228_v46 = vld [vmem:[#allocation2 + $0x5e0] sm:$0xff]  ;;  %v198_v1 = vld [vmem:[#allocation2 + $0x4f0] sm:$0xff] }
 0x1dd   :  { %3133 = vmatprep.subr.bf16.mxu1 %v3132_v4  ;;  %v293_v4 = vld [vmem:[#allocation2 + $0x7e8] sm:$0xff]  ;;  %v3154_v8 = vpack.c.bf16 %v228_v46, %v196_v0  ;;  %v3218_v9 = vpack.c.bf16 %v230_v44, %v198_v1  ;;  %v3172_v46 = vpack.c.bf16 %v549_v57, %v517_v55  ;;  %v516_v1 = vld [vmem:[#allocation2 + $0xee0] sm:$0xff]  ;;  %v518_v44 = vld [vmem:[#allocation2 + $0xef0] sm:$0xff] }
 0x1de   :  { %v837_v55 = vld [vmem:[#allocation2 + $0x18e8] sm:$0xff] }
 0x1df   :  { %3071 = vmatpush1.bf16.msra.mxu0 %v3070_v10  ;;  %v3156_v10 = vpack.c.bf16 %v293_v4, %v261_v3  ;;  %v550_v4 = vld [vmem:[#allocation2 + $0xff0] sm:$0xff]  ;;  %v869_v57 = vld [vmem:[#allocation2 + $0x19e8] sm:$0xff] }
 0x1e0   :  { %3135 = vmatpush1.bf16.msra.mxu1 %v3134_v11  ;;  %3073 = vmatprep.subr.bf16.mxu0 %v3072_v12  ;;  %v260_v11 = vld [vmem:[#allocation2 + $0x6e0] sm:$0xff] }
 0x1e1   :  { %3137 = vmatprep.subr.bf16.mxu1 %v3136_v17  ;;  %v292_v12 = vld [vmem:[#allocation2 + $0x7e0] sm:$0xff]  ;;  %v325_v17 = vld [vmem:[#allocation2 + $0x8e8] sm:$0xff] }
 0x1e2   :  { %v3158_v21 = vpack.c.bf16 %v292_v12, %v260_v11  ;;  %v580_v12 = vld [vmem:[#allocation2 + $0x10e0] sm:$0xff] }
 0x1e3   :  { %3075 = vmatpush1.bf16.msra.mxu0 %v3074_v23  ;;  %v3160_v23 = vpack.c.bf16 %v357_v18, %v325_v17  ;;  %v614_v17 = vld [vmem:[#allocation2 + $0x11f0] sm:$0xff]  ;;  %v645_v18 = vld [vmem:[#allocation2 + $0x12e8] sm:$0xff] }
 0x1e4   :  { %3139 = vmatpush1.bf16.msra.mxu1 %v3138_v24  ;;  %3077 = vmatprep.subr.bf16.mxu0 %v3076_v25  ;;  %v324_v24 = vld [vmem:[#allocation2 + $0x8e0] sm:$0xff] }
 0x1e5   :  { %3141 = vmatprep.subr.bf16.mxu1 %v3140_v29  ;;  %v356_v25 = vld [vmem:[#allocation2 + $0x9e0] sm:$0xff]  ;;  %v389_v29 = vld [vmem:[#allocation2 + $0xae8] sm:$0xff] }
 0x1e6   :  { %v3162_v34 = vpack.c.bf16 %v356_v25, %v324_v24  ;;  %v3180_v24 = vpack.c.bf16 %v677_v19, %v645_v18  ;;  %v644_v25 = vld [vmem:[#allocation2 + $0x12e0] sm:$0xff]  ;;  %v999_v18 = vld [vmem:[#allocation2 + $0x1df8] sm:$0xff] }
 0x1e7   :  { %3079 = vmatpush1.bf16.msra.mxu0 %v3078_v36  ;;  %v3164_v36 = vpack.c.bf16 %v421_v30, %v389_v29  ;;  %v678_v29 = vld [vmem:[#allocation2 + $0x13f0] sm:$0xff]  ;;  %v709_v30 = vld [vmem:[#allocation2 + $0x14e8] sm:$0xff] }
 0x1e8   :  { %3143 = vmatpush1.bf16.msra.mxu1 %v3142_v37  ;;  %3145 = vmatprep.subr.bf16.mxu0 %v3144_v38  ;;  %v388_v37 = vld [vmem:[#allocation2 + $0xae0] sm:$0xff] }
 0x1e9   :  { %3209 = vmatprep.subr.bf16.mxu1 %v3208_v42  ;;  %v420_v38 = vld [vmem:[#allocation2 + $0xbe0] sm:$0xff]  ;;  %v453_v42 = vld [vmem:[#allocation2 + $0xce8] sm:$0xff] }
 0x1ea   :  { %1981 = vmatmul.mubr.f32.vlgmr.msra.gmra.mrb[12].mxu0 %v3437_v16  ;;  %v3166_v47 = vpack.c.bf16 %v420_v38, %v388_v37  ;;  %v3184_v37 = vpack.c.bf16 %v741_v31, %v709_v30  ;;  %v708_v38 = vld [vmem:[#allocation2 + $0x14e0] sm:$0xff]  ;;  %v1063_v30 = vld [vmem:[#allocation2 + $0x1ff8] sm:$0xff] }
 0x1eb   :  { %2052 = vmatmul.mubr.f32.vlgmr.msra.gmra.mrb[12].mxu1 %v3437_v16  ;;  %3147 = vmatpush1.bf16.msra.mxu0 %v3146_v49  ;;  %v3168_v49 = vpack.c.bf16 %v485_v43, %v453_v42  ;;  %v742_v42 = vld [vmem:[#allocation2 + $0x15f0] sm:$0xff]  ;;  %v773_v43 = vld [vmem:[#allocation2 + $0x16e8] sm:$0xff] }
 0x1ec   :  { %3211 = vmatpush1.bf16.msra.mxu1 %v3210_v50  ;;  %3149 = vmatprep.subr.bf16.mxu0 %v3148_v51  ;;  %v452_v50 = vld [vmem:[#allocation2 + $0xce0] sm:$0xff] }
 0x1ed   :  { %3213 = vmatprep.subr.bf16.mxu1 %v3212_v54  ;;  %2122 = vmatprep.mubr.f32.mxu0 %v3282_v5  ;;  %v484_v51 = vld [vmem:[#allocation2 + $0xde0] sm:$0xff]  ;;  %v486_v54 = vld [vmem:[#allocation2 + $0xdf0] sm:$0xff] }
 0x1ee   :  { %2193 = vmatprep.mubr.f32.mxu1 %v3282_v5  ;;  %v3234_v0 = vpack.c.bf16 %v486_v54, %v454_v52  ;;  %v581_v5 = vld [vmem:[#allocation2 + $0x10e8] sm:$0xff]  ;;  %v804_v52 = vld [vmem:[#allocation2 + $0x17e0] sm:$0xff]  ;;  %v806_v54 = vld [vmem:[#allocation2 + $0x17f0] sm:$0xff] }
 0x1ef   :  { %3151 = vmatpush1.bf16.msra.mxu0 %v3150_v61  ;;  %v551_v61 = vld [vmem:[#allocation2 + $0xff8] sm:$0xff]  ;;  %v3176_v11 = vpack.c.bf16 %v613_v6, %v581_v5 }
 0x1f0   :  { %3215 = vmatpush1.bf16.msra.mxu1 %v3214_v62  ;;  %3153 = vmatprep.subr.bf16.mxu0 %v3152_v63  ;;  %v3170_v63 = vpack.c.bf16 %v484_v51, %v452_v50  ;;  %v3236_v3 = vpack.c.bf16 %v551_v61, %v519_v60  ;;  %v3188_v50 = vpack.c.bf16 %v805_v45, %v773_v43  ;;  %v772_v51 = vld [vmem:[#allocation2 + $0x16e0] sm:$0xff]  ;;  %v935_v5 = vld [vmem:[#allocation2 + $0x1bf8] sm:$0xff] }
 0x1f1   :  { %3217 = vmatprep.subr.bf16.mxu1 %v3216_v2  ;;  %v548_v2 = vld [vmem:[#allocation2 + $0xfe0] sm:$0xff]  ;;  %v3190_v60 = vpack.c.bf16 %v804_v52, %v772_v51 }
 0x1f3   :  { %3155 = vmatpush1.bf16.msra.mxu0 %v3154_v8  ;;  %v615_v8 = vld [vmem:[#allocation2 + $0x11f8] sm:$0xff] }
 0x1f4   :  { %3219 = vmatpush1.bf16.msra.mxu1 %v3218_v9  ;;  %3157 = vmatprep.subr.bf16.mxu0 %v3156_v10  ;;  %v3174_v9 = vpack.c.bf16 %v548_v2, %v516_v1  ;;  %v3238_v10 = vpack.c.bf16 %v550_v4, %v518_v44  ;;  %v3240_v56 = vpack.c.bf16 %v615_v8, %v583_v7  ;;  %v870_v2 = vld [vmem:[#allocation2 + $0x19f0] sm:$0xff]  ;;  %v901_v44 = vld [vmem:[#allocation2 + $0x1ae8] sm:$0xff]  ;;  %v903_v4 = vld [vmem:[#allocation2 + $0x1af8] sm:$0xff] }
 0x1f5   :  { %3221 = vmatprep.subr.bf16.mxu1 %v3220_v14  ;;  %v582_v14 = vld [vmem:[#allocation2 + $0x10f0] sm:$0xff] }
 0x1f7   :  { %3159 = vmatpush1.bf16.msra.mxu0 %v3158_v21  ;;  %v679_v21 = vld [vmem:[#allocation2 + $0x13f8] sm:$0xff] }
 0x1f8   :  { %3223 = vmatpush1.bf16.msra.mxu1 %v3222_v22  ;;  %3161 = vmatprep.subr.bf16.mxu0 %v3160_v23  ;;  %v3178_v22 = vpack.c.bf16 %v612_v13, %v580_v12  ;;  %v3242_v23 = vpack.c.bf16 %v614_v17, %v582_v14  ;;  %v3244_v28 = vpack.c.bf16 %v679_v21, %v647_v20  ;;  %v934_v13 = vld [vmem:[#allocation2 + $0x1bf0] sm:$0xff]  ;;  %v965_v14 = vld [vmem:[#allocation2 + $0x1ce8] sm:$0xff]  ;;  %v967_v17 = vld [vmem:[#allocation2 + $0x1cf8] sm:$0xff] }
 0x1f9   :  { %3225 = vmatprep.subr.bf16.mxu1 %v3224_v27  ;;  %v646_v27 = vld [vmem:[#allocation2 + $0x12f0] sm:$0xff]  ;;  %v3260_v12 = vpack.c.bf16 %v935_v5, %v903_v4 }
 0x1fb   :  { %3163 = vmatpush1.bf16.msra.mxu0 %v3162_v34  ;;  %v743_v34 = vld [vmem:[#allocation2 + $0x15f8] sm:$0xff] }
 0x1fc   :  { %3227 = vmatpush1.bf16.msra.mxu1 %v3226_v35  ;;  %3165 = vmatprep.subr.bf16.mxu0 %v3164_v36  ;;  %v3182_v35 = vpack.c.bf16 %v676_v26, %v644_v25  ;;  %v3246_v36 = vpack.c.bf16 %v678_v29, %v646_v27  ;;  %v3248_v41 = vpack.c.bf16 %v743_v34, %v711_v32  ;;  %v998_v26 = vld [vmem:[#allocation2 + $0x1df0] sm:$0xff]  ;;  %v1029_v27 = vld [vmem:[#allocation2 + $0x1ee8] sm:$0xff]  ;;  %v1031_v29 = vld [vmem:[#allocation2 + $0x1ef8] sm:$0xff] }
 0x1fd   :  { %v1556_v53 = vpop.f32.mrb[6].mxu0  ;;  %3229 = vmatprep.subr.bf16.mxu1 %v3228_v40  ;;  %v710_v40 = vld [vmem:[#allocation2 + $0x14f0] sm:$0xff]  ;;  %v3264_v25 = vpack.c.bf16 %v999_v18, %v967_v17 }
 0x1fe   :  { %2212 = vst [vmem:[#allocation7 + $0x60] sm:$0xff] %v1556_v53  ;;  %v1627_v58 = vpop.f32.mrb[6].mxu1  ;;  %v1558_v59 = vpop.f32.mrb[7].mxu0  ;;  %v774_v53 = vld [vmem:[#allocation2 + $0x16f0] sm:$0xff] }
 0x1ff   :  { %2214 = vst [vmem:[#allocation7 + $0x70] sm:$0xff] %v1627_v58  ;;  %2213 = vst [vmem:[#allocation7 + $0x68] sm:$0xff] %v1558_v59  ;;  %v1629_v62 = vpop.f32.mrb[7].mxu1  ;;  %3167 = vmatpush1.bf16.msra.mxu0 %v3166_v47  ;;  %v807_v47 = vld [vmem:[#allocation2 + $0x17f8] sm:$0xff]  ;;  %v3254_v61 = vpack.c.bf16 %v806_v54, %v774_v53 }
 0x200   :  { %2215 = vst [vmem:[#allocation7 + $0x78] sm:$0xff] %v1629_v62  ;;  %3231 = vmatpush1.bf16.msra.mxu1 %v3230_v48  ;;  %3169 = vmatprep.subr.bf16.mxu0 %v3168_v49  ;;  %v3186_v48 = vpack.c.bf16 %v740_v39, %v708_v38  ;;  %v3250_v49 = vpack.c.bf16 %v742_v42, %v710_v40  ;;  %v839_v58 = vld [vmem:[#allocation2 + $0x18f8] sm:$0xff]  ;;  %v1030_v38 = vld [vmem:[#allocation2 + $0x1ef0] sm:$0xff] }
 0x201   :  { %3233 = vmatprep.subr.bf16.mxu1 %v3232_v33  ;;  %v3252_v33 = vpack.c.bf16 %v807_v47, %v775_v15  ;;  %v871_v59 = vld [vmem:[#allocation2 + $0x19f8] sm:$0xff]  ;;  %v3192_v62 = vpack.c.bf16 %v869_v57, %v837_v55  ;;  %v1062_v39 = vld [vmem:[#allocation2 + $0x1ff0] sm:$0xff] }
 0x202   :  { %v3256_v1 = vpack.c.bf16 %v871_v59, %v839_v58 }
 0x203   :  { %3171 = vmatpush1.bf16.msra.mxu0 %v3170_v63  ;;  %v836_v63 = vld [vmem:[#allocation2 + $0x18e0] sm:$0xff] }
 0x204   :  { %3235 = vmatpush1.bf16.msra.mxu1 %v3234_v0  ;;  %3173 = vmatprep.subr.bf16.mxu0 %v3172_v46  ;;  %v868_v0 = vld [vmem:[#allocation2 + $0x19e0] sm:$0xff]  ;;  %v838_v46 = vld [vmem:[#allocation2 + $0x18f0] sm:$0xff] }
 0x205   :  { %3237 = vmatprep.subr.bf16.mxu1 %v3236_v3  ;;  %v933_v3 = vld [vmem:[#allocation2 + $0x1be8] sm:$0xff]  ;;  %v3194_v6 = vpack.c.bf16 %v868_v0, %v836_v63  ;;  %v3258_v7 = vpack.c.bf16 %v870_v2, %v838_v46 }
 0x206   :  { %v3196_v8 = vpack.c.bf16 %v933_v3, %v901_v44 }
 0x207   :  { %3175 = vmatpush1.bf16.msra.mxu0 %v3174_v9  ;;  %v900_v9 = vld [vmem:[#allocation2 + $0x1ae0] sm:$0xff] }
 0x208   :  { %3239 = vmatpush1.bf16.msra.mxu1 %v3238_v10  ;;  %3177 = vmatprep.subr.bf16.mxu0 %v3176_v11  ;;  %v932_v10 = vld [vmem:[#allocation2 + $0x1be0] sm:$0xff]  ;;  %v902_v11 = vld [vmem:[#allocation2 + $0x1af0] sm:$0xff] }
 0x209   :  { %3241 = vmatprep.subr.bf16.mxu1 %v3240_v56  ;;  %v997_v56 = vld [vmem:[#allocation2 + $0x1de8] sm:$0xff]  ;;  %v3198_v19 = vpack.c.bf16 %v932_v10, %v900_v9  ;;  %v3262_v20 = vpack.c.bf16 %v934_v13, %v902_v11 }
 0x20a   :  { %v3200_v21 = vpack.c.bf16 %v997_v56, %v965_v14 }
 0x20b   :  { %3179 = vmatpush1.bf16.msra.mxu0 %v3178_v22  ;;  %v964_v22 = vld [vmem:[#allocation2 + $0x1ce0] sm:$0xff] }
 0x20c   :  { %3243 = vmatpush1.bf16.msra.mxu1 %v3242_v23  ;;  %3181 = vmatprep.subr.bf16.mxu0 %v3180_v24  ;;  %v996_v23 = vld [vmem:[#allocation2 + $0x1de0] sm:$0xff]  ;;  %v966_v24 = vld [vmem:[#allocation2 + $0x1cf0] sm:$0xff] }
 0x20d   :  { %3245 = vmatprep.subr.bf16.mxu1 %v3244_v28  ;;  %v1061_v28 = vld [vmem:[#allocation2 + $0x1fe8] sm:$0xff]  ;;  %v3202_v31 = vpack.c.bf16 %v996_v23, %v964_v22  ;;  %v3266_v32 = vpack.c.bf16 %v998_v26, %v966_v24 }
 0x20e   :  { %v3204_v34 = vpack.c.bf16 %v1061_v28, %v1029_v27 }
 0x20f   :  { %3183 = vmatpush1.bf16.msra.mxu0 %v3182_v35  ;;  %v1028_v35 = vld [vmem:[#allocation2 + $0x1ee0] sm:$0xff] }
 0x210   :  { %3247 = vmatpush1.bf16.msra.mxu1 %v3246_v36  ;;  %3185 = vmatprep.subr.bf16.mxu0 %v3184_v37  ;;  %v1060_v36 = vld [vmem:[#allocation2 + $0x1fe0] sm:$0xff]  ;;  %v3268_v37 = vpack.c.bf16 %v1063_v30, %v1031_v29 }
 0x211   :  { %3249 = vmatprep.subr.bf16.mxu1 %v3248_v41  ;;  %v3206_v40 = vpack.c.bf16 %v1060_v36, %v1028_v35  ;;  %v3270_v41 = vpack.c.bf16 %v1062_v39, %v1030_v38 }
 0x213   :  { %3187 = vmatpush1.bf16.msra.mxu0 %v3186_v48 }
 0x214   :  { %3251 = vmatpush1.bf16.msra.mxu1 %v3250_v49  ;;  %3189 = vmatprep.subr.bf16.mxu0 %v3188_v50 }
 0x215   :  { %3253 = vmatprep.subr.bf16.mxu1 %v3252_v33 }
 0x217   :  { %3191 = vmatpush1.bf16.msra.mxu0 %v3190_v60 }
 0x218   :  { %3255 = vmatpush1.bf16.msra.mxu1 %v3254_v61  ;;  %3193 = vmatprep.subr.bf16.mxu0 %v3192_v62 }
 0x219   :  { %3257 = vmatprep.subr.bf16.mxu1 %v3256_v1 }
 0x21b   :  { %3195 = vmatpush1.bf16.msra.mxu0 %v3194_v6 }
 0x21c   :  { %3259 = vmatpush1.bf16.msra.mxu1 %v3258_v7  ;;  %3197 = vmatprep.subr.bf16.mxu0 %v3196_v8 }
 0x21d   :  { %3261 = vmatprep.subr.bf16.mxu1 %v3260_v12 }
 0x21f   :  { %3199 = vmatpush1.bf16.msra.mxu0 %v3198_v19 }
 0x220   :  { %3263 = vmatpush1.bf16.msra.mxu1 %v3262_v20  ;;  %3201 = vmatprep.subr.bf16.mxu0 %v3200_v21 }
 0x221   :  { %3265 = vmatprep.subr.bf16.mxu1 %v3264_v25 }
 0x223   :  { %3203 = vmatpush1.bf16.msra.mxu0 %v3202_v31 }
 0x224   :  { %3267 = vmatpush1.bf16.msra.mxu1 %v3266_v32  ;;  %3205 = vmatprep.subr.bf16.mxu0 %v3204_v34 }
 0x225   :  { %3269 = vmatprep.subr.bf16.mxu1 %v3268_v37 }
 0x227   :  { %3207 = vmatpush1.bf16.msra.mxu0 %v3206_v40 }
 0x228   :  { %3271 = vmatpush1.bf16.msra.mxu1 %v3270_v41 }
 0x22a   :  { %2123 = vmatmul.mubr.f32.vlgmr.msra.gmra.mrb[14].mxu0 %v3437_v16 }
 0x22b   :  { %2194 = vmatmul.mubr.f32.vlgmr.msra.gmra.mrb[14].mxu1 %v3437_v16 }
 0x23d   :  { %v1698_v42 = vpop.f32.mrb[8].mxu0 }
 0x23e   :  { %2216 = vst [vmem:[#allocation7 + $0x80] sm:$0xff] %v1698_v42  ;;  %v1769_v43 = vpop.f32.mrb[8].mxu1  ;;  %v1700_v45 = vpop.f32.mrb[9].mxu0 }
 0x23f   :  { %2218 = vst [vmem:[#allocation7 + $0x90] sm:$0xff] %v1769_v43  ;;  %2217 = vst [vmem:[#allocation7 + $0x88] sm:$0xff] %v1700_v45  ;;  %v1771_v15 = vpop.f32.mrb[9].mxu1 }
 0x240   :  { %2219 = vst [vmem:[#allocation7 + $0x98] sm:$0xff] %v1771_v15 }
 0x27d   :  { %v1840_v47 = vpop.f32.mrb[10].mxu0 }
 0x27e   :  { %2220 = vst [vmem:[#allocation7 + $0xa0] sm:$0xff] %v1840_v47  ;;  %v1911_v48 = vpop.f32.mrb[10].mxu1  ;;  %v1842_v49 = vpop.f32.mrb[11].mxu0 }
 0x27f   :  { %2222 = vst [vmem:[#allocation7 + $0xb0] sm:$0xff] %v1911_v48  ;;  %2221 = vst [vmem:[#allocation7 + $0xa8] sm:$0xff] %v1842_v49  ;;  %v1913_v50 = vpop.f32.mrb[11].mxu1 }
 0x280   :  { %2223 = vst [vmem:[#allocation7 + $0xb8] sm:$0xff] %v1913_v50 }
 0x2bd   :  { %v1982_v51 = vpop.f32.mrb[12].mxu0 }
 0x2be   :  { %2224 = vst [vmem:[#allocation7 + $0xc0] sm:$0xff] %v1982_v51  ;;  %v2053_v52 = vpop.f32.mrb[12].mxu1  ;;  %v1984_v16 = vpop.f32.mrb[13].mxu0 }
 0x2bf   :  { %2226 = vst [vmem:[#allocation7 + $0xd0] sm:$0xff] %v2053_v52  ;;  %2225 = vst [vmem:[#allocation7 + $0xc8] sm:$0xff] %v1984_v16  ;;  %v2055_v53 = vpop.f32.mrb[13].mxu1 }
 0x2c0   :  { %2227 = vst [vmem:[#allocation7 + $0xd8] sm:$0xff] %v2055_v53 }
 0x2fd   :  { %v2124_v33 = vpop.f32.mrb[14].mxu0 }
 0x2fe   :  { %2228 = vst [vmem:[#allocation7 + $0xe0] sm:$0xff] %v2124_v33  ;;  %v2195_v54 = vpop.f32.mrb[14].mxu1  ;;  %v2126_v55 = vpop.f32.mrb[15].mxu0 }
 0x2ff   :  { %2230 = vst [vmem:[#allocation7 + $0xf0] sm:$0xff] %v2195_v54  ;;  %2229 = vst [vmem:[#allocation7 + $0xe8] sm:$0xff] %v2126_v55  ;;  %v2197_v57 = vpop.f32.mrb[15].mxu1 }
 0x300   :  { %2231 = vst [vmem:[#allocation7 + $0xf8] sm:$0xff] %v2197_v57 }
 0x301   :  { %3338 = shalt.err (!%p3335_p6)
}
 0x302   :  { %s3339_s10 = scalar_lea.hbm %s3457_s2, 4096 }
 0x303   :  { %p3340_p7 = scmp.ne.s32.totalorder %s3457_s2, %s3339_s10  ;;  %p3343_p8 = scmp.lt.u32.totalorder %s3339_s10, %s3457_s2 }
 0x305   :  { %p3345_p9 = pnand %p3343_p8, %p3340_p7 }
 0x307   :  { %3348 = shalt.err (!%p3345_p9)
}
 0x308   :  { %2241 = dma.vmem_to_hbm [thread:$0]  %s2239_s6, 4096, %s3457_s2, [#allocation4]  }
 0x309   :  { %3353 = dma.done.wait [#allocation4], 4096  }
 0x30a   :  { %3354 = vsyncadd [#allocation4], 4294963200 }
 0x30b   :  { %2245 = vsyncpa [#allocation3], 1 }
 0x30c   :  { %2246 = vsyncpa [#allocation6], 1 }
 0x30d   :  { %2247 = vsyncpa [#allocation4], 1 }

</bundles_post_ra>
